<compile_context>
chip_gen: v7x
topology: tpu7x:2x2x1
jax: 0.10.0
libtpu: 0.0.40
codegen_flags: <defaults>
</compile_context>

<pallas_src>
import functools

import jax
import jax.numpy as jnp
from jax import lax
from jax.experimental import pallas as pl
from jax.experimental.pallas import tpu as pltpu


def _round_up(x, m):
    return ((x + m - 1) // m) * m


def _initialized_net_kernel(x_ref, w_ref, csel_ref, psel_ref,
                            conv_ref, act_ref, pool_ref,
                            patch_ref, acc_ref, *,
                            b_blk, C_pad, W, S, L, OC, OW, VLc, FLc,
                            k_h, k_w, pool):
    """One grid step = one block of b_blk images.

    x_ref:    (1, C_pad, b_blk*S + tail)   images packed at lane stride S
    w_ref:    (K_np, k_h*k_w*C_pad)        im2col weights, contraction last
    csel_ref: (L, OC)                      0/1 column-compaction matrix
    psel_ref: (FLc, NPW) (pool > 1)        0/1 pooling-window pick matrix
    conv_ref: (b_blk, K_np, OC)
    act_ref:  (b_blk, K_np, OC)
    pool_ref: (b_blk, K_np, NPW)
    patch_ref: VMEM scratch (k_h*k_w*C_pad, b_blk*S)
    acc_ref:   VMEM scratch (K_np, b_blk*S)
    """
    width = b_blk * S

    # ---- batched im2col: ONE wide, (8,128)-aligned slab copy per tap -------
    for kh in range(k_h):
        for kw in range(k_w):
            tap = kh * k_w + kw
            off = kh * W + kw
            patch_ref[tap * C_pad:(tap + 1) * C_pad, :] = (
                x_ref[0, :, off:off + width])

    # ---- Conv2d for the whole block: ONE MXU matmul, f32-exact -------------
    acc_ref[...] = jnp.dot(w_ref[...], patch_ref[...],
                           preferred_element_type=jnp.float32,
                           precision=lax.Precision.HIGHEST)

    # ---- per image: compact to (K_np, OH*OW), ReLU, MaxPool, dense stores --
    for b in range(b_blk):
        a_b = acc_ref[:, b * S:b * S + L]            # lane-aligned slice
        # Exact 0/1 selection matmul dropping the W-strided garbage columns.
        conv_c = jnp.dot(a_b, csel_ref[...],
                         preferred_element_type=jnp.float32,
                         precision=lax.Precision.HIGHEST)
        act_c = jnp.maximum(conv_c, 0.0)
        conv_ref[b] = conv_c
        act_ref[b] = act_c
        if pool == 1:
            pool_ref[b] = act_c
        else:
            # Running max over the pool x pool offsets on the compacted layout.
            vert = act_c[:, 0:VLc]
            for i in range(1, pool):
                vert = jnp.maximum(vert, act_c[:, i * OW:i * OW + VLc])
            full = vert[:, 0:FLc]
            for j in range(1, pool):
                full = jnp.maximum(full, vert[:, j:j + FLc])
            # Exact 0/1 window-pick matmul -> (K_np, PH*PW).
            pool_ref[b] = jnp.dot(full, psel_ref[...],
                                  preferred_element_type=jnp.float32,
                                  precision=lax.Precision.HIGHEST)


def _pick_batch_block(n, per_image_bytes, vmem_budget=24 * 1024 * 1024):
    """Images per grid step, capped by a VMEM budget (double-buffered I/O +
    patch/acc scratch).  Even batches >= 8 are split into two equal steps so
    both v7x TensorCores get work; large batches prefer a divisor of n so the
    batch never needs padding (and the wrapper [:N] slice is an identity)."""
    cap = max(1, min(64, vmem_budget // max(per_image_bytes, 1)))
    if n <= cap:
        if n >= 8 and n % 2 == 0:
            return n // 2
        return n
    best_div = 1
    for b in range(cap, 0, -1):
        if n % b == 0:
            best_div = b
            break
    return best_div if best_div >= cap // 2 else cap


def initialized_net_forward(x, weights, *, filter_stride=1, max_pool_size=1,
                            batch_block=None):
    """Returns (conv_x, activated_x, pooled_x) in NCHW, like the PyTorch module."""
    if weights.ndim == 3:        # (N, kH, kW) -> (N, 1, kH, kW), as the module does
        weights = weights[:, None]
    N, C, H, W = x.shape
    K_n, K_c, k_h, k_w = weights.shape
    assert K_c == C, "input channels must match weight channels"
    # TODO(synk): filter_stride > 1 would need strided slab extraction; only
    # the module default (stride=1) is implemented.
    assert filter_stride == 1
    # TODO(synk): only the module-default ReLU activation is implemented.
    pool = int(max_pool_size)

    OH, OW = H - k_h + 1, W - k_w + 1
    PH, PW = OH // pool, OW // pool
    assert OH >= 1 and OW >= 1 and PH >= 1 and PW >= 1

    C_pad = _round_up(C, 8)           # sublane-aligned channel groups
    K_np = _round_up(K_n, 8)          # sublane-aligned filter rows
    KKp = k_h * k_w * C_pad           # im2col contraction size (8-aligned taps)
    S = _round_up(H * W, 128)         # per-image lane stride inside a block
    max_off = (k_h - 1) * W + (k_w - 1)
    tail = _round_up(max_off, 128)    # covers the last image's shifted reads
    L = OH * W                        # W-strided conv slab length per image
    OC = OH * OW                      # compacted conv/act columns per image
    NPW = PH * PW
    VLc = ((PH - 1) * pool + 1) * OW  # row-shift running-max length
    FLc = VLc - (pool - 1)            # + column-shift running-max length

    per_image_bytes = 4 * (2 * C_pad * S + KKp * S + K_np * S
                           + 4 * K_np * OC + 2 * K_np * NPW)
    b_blk = batch_block if batch_block is not None else _pick_batch_block(
        N, per_image_bytes)
    num_blocks = -(-N // b_blk)
    N_pad = num_blocks * b_blk
    Wtot = b_blk * S + tail

    # Pack input: (N, C, H, W) -> (num_blocks, C_pad, b_blk*S + tail), image b
    # of a block starting at lane b*S.  One cheap XLA pass over the (small)
    # input; the (large) outputs never need a post-kernel pass.
    xf = x.astype(jnp.float32).reshape(N, C, H * W)
    xf = jnp.pad(xf, ((0, N_pad - N), (0, C_pad - C), (0, S - H * W)))
    xf = xf.reshape(num_blocks, b_blk, C_pad, S)
    xf = jnp.transpose(xf, (0, 2, 1, 3)).reshape(num_blocks, C_pad, b_blk * S)
    if tail:
        xf = jnp.pad(xf, ((0, 0), (0, 0), (0, tail)))

    # Weights -> (K_np, KKp): tap-major, channel-minor columns; padded filter
    # rows / channels are zero so they contribute nothing.
    wf = jnp.pad(weights.astype(jnp.float32),
                 ((0, K_np - K_n), (0, C_pad - C), (0, 0), (0, 0)))
    w2 = jnp.transpose(wf, (0, 2, 3, 1)).reshape(K_np, KKp)

    # 0/1 compaction matrix: compacted column q comes from the W-strided
    # position (q // OW) * W + q % OW.
    q = jnp.arange(OC)
    csel = (jnp.arange(L)[:, None] ==
            ((q // OW) * W + (q % OW))[None, :]).astype(jnp.float32)

    # 0/1 pooling-pick matrix on the compacted running max.
    if pool > 1:
        qq = jnp.arange(NPW)
        pick = (qq // PW) * (pool * OW) + (qq % PW) * pool
        psel = (jnp.arange(FLc)[:, None] == pick[None, :]).astype(jnp.float32)
    else:
        psel = jnp.zeros((8, 128), jnp.float32)   # unused dummy

    kernel = functools.partial(
        _initialized_net_kernel, b_blk=b_blk, C_pad=C_pad, W=W, S=S, L=L,
        OC=OC, OW=OW, VLc=VLc, FLc=FLc, k_h=k_h, k_w=k_w, pool=pool)

    out_shape = (
        jax.ShapeDtypeStruct((N_pad, K_np, OC), jnp.float32),    # conv
        jax.ShapeDtypeStruct((N_pad, K_np, OC), jnp.float32),    # relu
        jax.ShapeDtypeStruct((N_pad, K_np, NPW), jnp.float32),   # maxpool
    )
    grid_spec = pltpu.PrefetchScalarGridSpec(
        num_scalar_prefetch=0,
        grid=(num_blocks,),
        in_specs=[
            pl.BlockSpec((1, C_pad, Wtot), lambda g: (g, 0, 0)),
            pl.BlockSpec((K_np, KKp), lambda g: (0, 0)),
            pl.BlockSpec((L, OC), lambda g: (0, 0)),
            pl.BlockSpec(psel.shape, lambda g: (0, 0)),
        ],
        out_specs=[
            pl.BlockSpec((b_blk, K_np, OC), lambda g: (g, 0, 0)),
            pl.BlockSpec((b_blk, K_np, OC), lambda g: (g, 0, 0)),
            pl.BlockSpec((b_blk, K_np, NPW), lambda g: (g, 0, 0)),
        ],
        scratch_shapes=[
            pltpu.VMEM((KKp, b_blk * S), jnp.float32),    # im2col patch
            pltpu.VMEM((K_np, b_blk * S), jnp.float32),   # wide conv result
        ],
    )
    conv_f, act_f, pool_f = pl.pallas_call(
        kernel,
        out_shape=out_shape,
        grid_spec=grid_spec,
        compiler_params=pltpu.CompilerParams(
            dimension_semantics=("parallel",),
            vmem_limit_bytes=32 * 1024 * 1024),
    )(xf, w2, csel, psel)

    # Only reshapes below; with b_blk | N and K_n % 8 == 0 the slices are
    # identity, so there is no extra HBM pass over the outputs.
    conv_x = conv_f[:N, :K_n].reshape(N, K_n, OH, OW)
    act_x = act_f[:N, :K_n].reshape(N, K_n, OH, OW)
    pooled_x = pool_f[:N, :K_n].reshape(N, K_n, PH, PW)
    return conv_x, act_x, pooled_x


if __name__ == "__main__":
    key = jax.random.PRNGKey(0)
    kx, kw = jax.random.split(key)

    # Small shapes consistent with the module: NCHW input, (N, C, kH, kW) weights.
    N, C, H, W = 2, 4, 16, 16
    K_n, k_h, k_w = 8, 3, 3
    max_pool_size = 2

    x = jax.random.normal(kx, (N, C, H, W), dtype=jnp.float32)
    weights = jax.random.normal(kw, (K_n, C, k_h, k_w), dtype=jnp.float32)

    conv_x, act_x, pool_x = jax.block_until_ready(
        initialized_net_forward(x, weights, filter_stride=1,
                                max_pool_size=max_pool_size))

    # Plain-JAX reference (full-precision conv) for a sanity check.
    ref_conv = lax.conv_general_dilated(
        x, weights, window_strides=(1, 1), padding="VALID",
        dimension_numbers=("NCHW", "OIHW", "NCHW"),
        precision=lax.Precision.HIGHEST)
    ref_act = jnp.maximum(ref_conv, 0.0)
    ref_pool = lax.reduce_window(
        ref_act, -jnp.inf, lax.max,
        window_dimensions=(1, 1, max_pool_size, max_pool_size),
        window_strides=(1, 1, max_pool_size, max_pool_size),
        padding="VALID")

    assert conv_x.shape == (N, K_n, H - k_h + 1, W - k_w + 1)
    assert act_x.shape == conv_x.shape
    assert pool_x.shape == (N, K_n, (H - k_h + 1) // max_pool_size,
                            (W - k_w + 1) // max_pool_size)
    assert jnp.allclose(conv_x, ref_conv, atol=1e-4, rtol=1e-4)
    assert jnp.allclose(act_x, ref_act, atol=1e-4, rtol=1e-4)
    assert jnp.allclose(pool_x, ref_pool, atol=1e-4, rtol=1e-4)

    print("KERNEL_OK")
</pallas_src>

<mosaic_0001>
module attributes {stable_mosaic.version = 11 : i64} {
  func.func @_initialized_net_kernel(%arg0: i32, %arg1: memref<1x8x640xf32, #tpu.memory_space<vmem>>, %arg2: memref<8x72xf32, #tpu.memory_space<vmem>>, %arg3: memref<224x196xf32, #tpu.memory_space<vmem>>, %arg4: memref<181x49xf32, #tpu.memory_space<vmem>>, %arg5: memref<2x8x196xf32, #tpu.memory_space<vmem>>, %arg6: memref<2x8x196xf32, #tpu.memory_space<vmem>>, %arg7: memref<2x8x49xf32, #tpu.memory_space<vmem>>, %arg8: memref<72x512xf32, #tpu.memory_space<vmem>>, %arg9: memref<8x512xf32, #tpu.memory_space<vmem>>) attributes {dimension_semantics = [#tpu.dimension_semantics<parallel>], iteration_bounds = array<i64: 1>, scalar_prefetch = 0 : i64, scratch_operands = 2 : i64, tpu.core_type = #tpu.core_type<tc>, window_params = [{transform_indices = @transform_0, window_bounds = array<i64: 1, 8, 640>}, {pipeline_mode = #tpu.pipeline_mode<synchronous>, transform_indices = @transform_1, window_bounds = array<i64: 8, 72>}, {pipeline_mode = #tpu.pipeline_mode<synchronous>, transform_indices = @transform_2, window_bounds = array<i64: 224, 196>}, {pipeline_mode = #tpu.pipeline_mode<synchronous>, transform_indices = @transform_3, window_bounds = array<i64: 181, 49>}, {transform_indices = @transform_4, window_bounds = array<i64: 2, 8, 196>}, {transform_indices = @transform_5, window_bounds = array<i64: 2, 8, 196>}, {transform_indices = @transform_6, window_bounds = array<i64: 2, 8, 49>}]} {
    %c0 = arith.constant 0 : index
    %c0_0 = arith.constant 0 : index
    %c0_1 = arith.constant 0 : index
    %0 = vector.load %arg1[%c0, %c0_0, %c0_1] : memref<1x8x640xf32, #tpu.memory_space<vmem>>, vector<1x8x512xf32>
    %1 = vector.shape_cast %0 : vector<1x8x512xf32> to vector<8x512xf32>
    %c0_2 = arith.constant 0 : index
    %c0_3 = arith.constant 0 : index
    %2 = vector.load %arg8[%c0_2, %c0_3] : memref<72x512xf32, #tpu.memory_space<vmem>>, vector<8x512xf32>
    tpu.vector_store %arg8[%c0_2, %c0_3], %1 {strides = array<i32>} : memref<72x512xf32, #tpu.memory_space<vmem>>, vector<8x512xf32>,
    %c0_4 = arith.constant 0 : index
    %c0_5 = arith.constant 0 : index
    %c1 = arith.constant 1 : index
    %3 = vector.load %arg1[%c0_4, %c0_5, %c1] : memref<1x8x640xf32, #tpu.memory_space<vmem>>, vector<1x8x512xf32>
    %4 = vector.shape_cast %3 : vector<1x8x512xf32> to vector<8x512xf32>
    %c8 = arith.constant 8 : index
    %c0_6 = arith.constant 0 : index
    %5 = vector.load %arg8[%c8, %c0_6] : memref<72x512xf32, #tpu.memory_space<vmem>>, vector<8x512xf32>
    tpu.vector_store %arg8[%c8, %c0_6], %4 {strides = array<i32>} : memref<72x512xf32, #tpu.memory_space<vmem>>, vector<8x512xf32>,
    %c0_7 = arith.constant 0 : index
    %c0_8 = arith.constant 0 : index
    %c2 = arith.constant 2 : index
    %6 = vector.load %arg1[%c0_7, %c0_8, %c2] : memref<1x8x640xf32, #tpu.memory_space<vmem>>, vector<1x8x512xf32>
    %7 = vector.shape_cast %6 : vector<1x8x512xf32> to vector<8x512xf32>
    %c16 = arith.constant 16 : index
    %c0_9 = arith.constant 0 : index
    %8 = vector.load %arg8[%c16, %c0_9] : memref<72x512xf32, #tpu.memory_space<vmem>>, vector<8x512xf32>
    tpu.vector_store %arg8[%c16, %c0_9], %7 {strides = array<i32>} : memref<72x512xf32, #tpu.memory_space<vmem>>, vector<8x512xf32>,
    %c0_10 = arith.constant 0 : index
    %c0_11 = arith.constant 0 : index
    %c16_12 = arith.constant 16 : index
    %9 = vector.load %arg1[%c0_10, %c0_11, %c16_12] : memref<1x8x640xf32, #tpu.memory_space<vmem>>, vector<1x8x512xf32>
    %10 = vector.shape_cast %9 : vector<1x8x512xf32> to vector<8x512xf32>
    %c24 = arith.constant 24 : index
    %c0_13 = arith.constant 0 : index
    %11 = vector.load %arg8[%c24, %c0_13] : memref<72x512xf32, #tpu.memory_space<vmem>>, vector<8x512xf32>
    tpu.vector_store %arg8[%c24, %c0_13], %10 {strides = array<i32>} : memref<72x512xf32, #tpu.memory_space<vmem>>, vector<8x512xf32>,
    %c0_14 = arith.constant 0 : index
    %c0_15 = arith.constant 0 : index
    %c17 = arith.constant 17 : index
    %12 = vector.load %arg1[%c0_14, %c0_15, %c17] : memref<1x8x640xf32, #tpu.memory_space<vmem>>, vector<1x8x512xf32>
    %13 = vector.shape_cast %12 : vector<1x8x512xf32> to vector<8x512xf32>
    %c32 = arith.constant 32 : index
    %c0_16 = arith.constant 0 : index
    %14 = vector.load %arg8[%c32, %c0_16] : memref<72x512xf32, #tpu.memory_space<vmem>>, vector<8x512xf32>
    tpu.vector_store %arg8[%c32, %c0_16], %13 {strides = array<i32>} : memref<72x512xf32, #tpu.memory_space<vmem>>, vector<8x512xf32>,
    %c0_17 = arith.constant 0 : index
    %c0_18 = arith.constant 0 : index
    %c18 = arith.constant 18 : index
    %15 = vector.load %arg1[%c0_17, %c0_18, %c18] : memref<1x8x640xf32, #tpu.memory_space<vmem>>, vector<1x8x512xf32>
    %16 = vector.shape_cast %15 : vector<1x8x512xf32> to vector<8x512xf32>
    %c40 = arith.constant 40 : index
    %c0_19 = arith.constant 0 : index
    %17 = vector.load %arg8[%c40, %c0_19] : memref<72x512xf32, #tpu.memory_space<vmem>>, vector<8x512xf32>
    tpu.vector_store %arg8[%c40, %c0_19], %16 {strides = array<i32>} : memref<72x512xf32, #tpu.memory_space<vmem>>, vector<8x512xf32>,
    %c0_20 = arith.constant 0 : index
    %c0_21 = arith.constant 0 : index
    %c32_22 = arith.constant 32 : index
    %18 = vector.load %arg1[%c0_20, %c0_21, %c32_22] : memref<1x8x640xf32, #tpu.memory_space<vmem>>, vector<1x8x512xf32>
    %19 = vector.shape_cast %18 : vector<1x8x512xf32> to vector<8x512xf32>
    %c48 = arith.constant 48 : index
    %c0_23 = arith.constant 0 : index
    %20 = vector.load %arg8[%c48, %c0_23] : memref<72x512xf32, #tpu.memory_space<vmem>>, vector<8x512xf32>
    tpu.vector_store %arg8[%c48, %c0_23], %19 {strides = array<i32>} : memref<72x512xf32, #tpu.memory_space<vmem>>, vector<8x512xf32>,
    %c0_24 = arith.constant 0 : index
    %c0_25 = arith.constant 0 : index
    %c33 = arith.constant 33 : index
    %21 = vector.load %arg1[%c0_24, %c0_25, %c33] : memref<1x8x640xf32, #tpu.memory_space<vmem>>, vector<1x8x512xf32>
    %22 = vector.shape_cast %21 : vector<1x8x512xf32> to vector<8x512xf32>
    %c56 = arith.constant 56 : index
    %c0_26 = arith.constant 0 : index
    %23 = vector.load %arg8[%c56, %c0_26] : memref<72x512xf32, #tpu.memory_space<vmem>>, vector<8x512xf32>
    tpu.vector_store %arg8[%c56, %c0_26], %22 {strides = array<i32>} : memref<72x512xf32, #tpu.memory_space<vmem>>, vector<8x512xf32>,
    %c0_27 = arith.constant 0 : index
    %c0_28 = arith.constant 0 : index
    %c34 = arith.constant 34 : index
    %24 = vector.load %arg1[%c0_27, %c0_28, %c34] : memref<1x8x640xf32, #tpu.memory_space<vmem>>, vector<1x8x512xf32>
    %25 = vector.shape_cast %24 : vector<1x8x512xf32> to vector<8x512xf32>
    %c64 = arith.constant 64 : index
    %c0_29 = arith.constant 0 : index
    %26 = vector.load %arg8[%c64, %c0_29] : memref<72x512xf32, #tpu.memory_space<vmem>>, vector<8x512xf32>
    tpu.vector_store %arg8[%c64, %c0_29], %25 {strides = array<i32>} : memref<72x512xf32, #tpu.memory_space<vmem>>, vector<8x512xf32>,
    %c0_30 = arith.constant 0 : index
    %c0_31 = arith.constant 0 : index
    %27 = vector.load %arg2[%c0_30, %c0_31] : memref<8x72xf32, #tpu.memory_space<vmem>>, vector<8x72xf32>
    %c0_32 = arith.constant 0 : index
    %c0_33 = arith.constant 0 : index
    %28 = vector.load %arg8[%c0_32, %c0_33] : memref<72x512xf32, #tpu.memory_space<vmem>>, vector<72x512xf32>
    %cst = arith.constant dense<0.000000e+00> : vector<8x512xf32>
    %29 = tpu.matmul %27, %28, %cst {dimension_numbers = #tpu.dot_dimension_numbers<[1], [0], [0], [1], [0, 0, 1, 1], [], []>, precision = #tpu.contract_precision<fp32>} : vector<8x72xf32>, vector<72x512xf32>, vector<8x512xf32> -> vector<8x512xf32>
    %c0_34 = arith.constant 0 : index
    %c0_35 = arith.constant 0 : index
    %30 = vector.load %arg9[%c0_34, %c0_35] : memref<8x512xf32, #tpu.memory_space<vmem>>, vector<8x512xf32>
    tpu.vector_store %arg9[%c0_34, %c0_35], %29 {strides = array<i32>} : memref<8x512xf32, #tpu.memory_space<vmem>>, vector<8x512xf32>,
    %c0_36 = arith.constant 0 : index
    %c0_37 = arith.constant 0 : index
    %31 = vector.load %arg9[%c0_36, %c0_37] : memref<8x512xf32, #tpu.memory_space<vmem>>, vector<8x224xf32>
    %c0_38 = arith.constant 0 : index
    %c0_39 = arith.constant 0 : index
    %32 = vector.load %arg3[%c0_38, %c0_39] : memref<224x196xf32, #tpu.memory_space<vmem>>, vector<224x196xf32>
    %cst_40 = arith.constant dense<0.000000e+00> : vector<8x196xf32>
    %33 = tpu.matmul %31, %32, %cst_40 {dimension_numbers = #tpu.dot_dimension_numbers<[1], [0], [0], [1], [0, 0, 1, 1], [], []>, precision = #tpu.contract_precision<fp32>} : vector<8x224xf32>, vector<224x196xf32>, vector<8x196xf32> -> vector<8x196xf32>
    %cst_41 = arith.constant 0.000000e+00 : f32
    %34 = vector.broadcast %cst_41 : f32 to vector<8x196xf32>
    %35 = arith.maximumf %33, %34 : vector<8x196xf32>
    %c0_42 = arith.constant 0 : index
    %c0_43 = arith.constant 0 : index
    %c0_44 = arith.constant 0 : index
    %36 = vector.load %arg5[%c0_42, %c0_43, %c0_44] : memref<2x8x196xf32, #tpu.memory_space<vmem>>, vector<1x8x196xf32>
    %37 = vector.shape_cast %36 : vector<1x8x196xf32> to vector<8x196xf32>
    %38 = vector.shape_cast %33 : vector<8x196xf32> to vector<1x8x196xf32>
    tpu.vector_store %arg5[%c0_42, %c0_43, %c0_44], %38 {strides = array<i32>} : memref<2x8x196xf32, #tpu.memory_space<vmem>>, vector<1x8x196xf32>,
    %c0_45 = arith.constant 0 : index
    %c0_46 = arith.constant 0 : index
    %c0_47 = arith.constant 0 : index
    %39 = vector.load %arg6[%c0_45, %c0_46, %c0_47] : memref<2x8x196xf32, #tpu.memory_space<vmem>>, vector<1x8x196xf32>
    %40 = vector.shape_cast %39 : vector<1x8x196xf32> to vector<8x196xf32>
    %41 = vector.shape_cast %35 : vector<8x196xf32> to vector<1x8x196xf32>
    tpu.vector_store %arg6[%c0_45, %c0_46, %c0_47], %41 {strides = array<i32>} : memref<2x8x196xf32, #tpu.memory_space<vmem>>, vector<1x8x196xf32>,
    %42 = vector.extract_strided_slice %35 {offsets = [0, 0], sizes = [8, 182], strides = [1, 1]} : vector<8x196xf32> to vector<8x182xf32>
    %43 = vector.extract_strided_slice %35 {offsets = [0, 14], sizes = [8, 182], strides = [1, 1]} : vector<8x196xf32> to vector<8x182xf32>
    %44 = arith.maximumf %42, %43 : vector<8x182xf32>
    %45 = vector.extract_strided_slice %44 {offsets = [0, 0], sizes = [8, 181], strides = [1, 1]} : vector<8x182xf32> to vector<8x181xf32>
    %46 = vector.extract_strided_slice %44 {offsets = [0, 1], sizes = [8, 181], strides = [1, 1]} : vector<8x182xf32> to vector<8x181xf32>
    %47 = arith.maximumf %45, %46 : vector<8x181xf32>
    %c0_48 = arith.constant 0 : index
    %c0_49 = arith.constant 0 : index
    %48 = vector.load %arg4[%c0_48, %c0_49] : memref<181x49xf32, #tpu.memory_space<vmem>>, vector<181x49xf32>
    %cst_50 = arith.constant dense<0.000000e+00> : vector<8x49xf32>
    %49 = tpu.matmul %47, %48, %cst_50 {dimension_numbers = #tpu.dot_dimension_numbers<[1], [0], [0], [1], [0, 0, 1, 1], [], []>, precision = #tpu.contract_precision<fp32>} : vector<8x181xf32>, vector<181x49xf32>, vector<8x49xf32> -> vector<8x49xf32>
    %c0_51 = arith.constant 0 : index
    %c0_52 = arith.constant 0 : index
    %c0_53 = arith.constant 0 : index
    %50 = vector.load %arg7[%c0_51, %c0_52, %c0_53] : memref<2x8x49xf32, #tpu.memory_space<vmem>>, vector<1x8x49xf32>
    %51 = vector.shape_cast %50 : vector<1x8x49xf32> to vector<8x49xf32>
    %52 = vector.shape_cast %49 : vector<8x49xf32> to vector<1x8x49xf32>
    tpu.vector_store %arg7[%c0_51, %c0_52, %c0_53], %52 {strides = array<i32>} : memref<2x8x49xf32, #tpu.memory_space<vmem>>, vector<1x8x49xf32>,
    %c0_54 = arith.constant 0 : index
    %c256 = arith.constant 256 : index
    %53 = vector.load %arg9[%c0_54, %c256] : memref<8x512xf32, #tpu.memory_space<vmem>>, vector<8x224xf32>
    %c0_55 = arith.constant 0 : index
    %c0_56 = arith.constant 0 : index
    %54 = vector.load %arg3[%c0_55, %c0_56] : memref<224x196xf32, #tpu.memory_space<vmem>>, vector<224x196xf32>
    %cst_57 = arith.constant dense<0.000000e+00> : vector<8x196xf32>
    %55 = tpu.matmul %53, %54, %cst_57 {dimension_numbers = #tpu.dot_dimension_numbers<[1], [0], [0], [1], [0, 0, 1, 1], [], []>, precision = #tpu.contract_precision<fp32>} : vector<8x224xf32>, vector<224x196xf32>, vector<8x196xf32> -> vector<8x196xf32>
    %cst_58 = arith.constant 0.000000e+00 : f32
    %56 = vector.broadcast %cst_58 : f32 to vector<8x196xf32>
    %57 = arith.maximumf %55, %56 : vector<8x196xf32>
    %c1_59 = arith.constant 1 : index
    %c0_60 = arith.constant 0 : index
    %c0_61 = arith.constant 0 : index
    %58 = vector.load %arg5[%c1_59, %c0_60, %c0_61] : memref<2x8x196xf32, #tpu.memory_space<vmem>>, vector<1x8x196xf32>
    %59 = vector.shape_cast %58 : vector<1x8x196xf32> to vector<8x196xf32>
    %60 = vector.shape_cast %55 : vector<8x196xf32> to vector<1x8x196xf32>
    tpu.vector_store %arg5[%c1_59, %c0_60, %c0_61], %60 {strides = array<i32>} : memref<2x8x196xf32, #tpu.memory_space<vmem>>, vector<1x8x196xf32>,
    %c1_62 = arith.constant 1 : index
    %c0_63 = arith.constant 0 : index
    %c0_64 = arith.constant 0 : index
    %61 = vector.load %arg6[%c1_62, %c0_63, %c0_64] : memref<2x8x196xf32, #tpu.memory_space<vmem>>, vector<1x8x196xf32>
    %62 = vector.shape_cast %61 : vector<1x8x196xf32> to vector<8x196xf32>
    %63 = vector.shape_cast %57 : vector<8x196xf32> to vector<1x8x196xf32>
    tpu.vector_store %arg6[%c1_62, %c0_63, %c0_64], %63 {strides = array<i32>} : memref<2x8x196xf32, #tpu.memory_space<vmem>>, vector<1x8x196xf32>,
    %64 = vector.extract_strided_slice %57 {offsets = [0, 0], sizes = [8, 182], strides = [1, 1]} : vector<8x196xf32> to vector<8x182xf32>
    %65 = vector.extract_strided_slice %57 {offsets = [0, 14], sizes = [8, 182], strides = [1, 1]} : vector<8x196xf32> to vector<8x182xf32>
    %66 = arith.maximumf %64, %65 : vector<8x182xf32>
    %67 = vector.extract_strided_slice %66 {offsets = [0, 0], sizes = [8, 181], strides = [1, 1]} : vector<8x182xf32> to vector<8x181xf32>
    %68 = vector.extract_strided_slice %66 {offsets = [0, 1], sizes = [8, 181], strides = [1, 1]} : vector<8x182xf32> to vector<8x181xf32>
    %69 = arith.maximumf %67, %68 : vector<8x181xf32>
    %c0_65 = arith.constant 0 : index
    %c0_66 = arith.constant 0 : index
    %70 = vector.load %arg4[%c0_65, %c0_66] : memref<181x49xf32, #tpu.memory_space<vmem>>, vector<181x49xf32>
    %cst_67 = arith.constant dense<0.000000e+00> : vector<8x49xf32>
    %71 = tpu.matmul %69, %70, %cst_67 {dimension_numbers = #tpu.dot_dimension_numbers<[1], [0], [0], [1], [0, 0, 1, 1], [], []>, precision = #tpu.contract_precision<fp32>} : vector<8x181xf32>, vector<181x49xf32>, vector<8x49xf32> -> vector<8x49xf32>
    %c1_68 = arith.constant 1 : index
    %c0_69 = arith.constant 0 : index
    %c0_70 = arith.constant 0 : index
    %72 = vector.load %arg7[%c1_68, %c0_69, %c0_70] : memref<2x8x49xf32, #tpu.memory_space<vmem>>, vector<1x8x49xf32>
    %73 = vector.shape_cast %72 : vector<1x8x49xf32> to vector<8x49xf32>
    %74 = vector.shape_cast %71 : vector<8x49xf32> to vector<1x8x49xf32>
    tpu.vector_store %arg7[%c1_68, %c0_69, %c0_70], %74 {strides = array<i32>} : memref<2x8x49xf32, #tpu.memory_space<vmem>>, vector<1x8x49xf32>,
    return
  }
  func.func @transform_0(%arg0: i32) -> (i32, i32, i32) {
    %c0_i32 = arith.constant 0 : i32
    %c0_i32_0 = arith.constant 0 : i32
    %c0_i32_1 = arith.constant 0 : i32
    return %arg0, %c0_i32, %c0_i32_0 : i32, i32, i32
  }
  func.func @transform_1(%arg0: i32) -> (i32, i32) {
    %c0_i32 = arith.constant 0 : i32
    %c0_i32_0 = arith.constant 0 : i32
    %c0_i32_1 = arith.constant 0 : i32
    return %c0_i32, %c0_i32_0 : i32, i32
  }
  func.func @transform_2(%arg0: i32) -> (i32, i32) {
    %c0_i32 = arith.constant 0 : i32
    %c0_i32_0 = arith.constant 0 : i32
    %c0_i32_1 = arith.constant 0 : i32
    return %c0_i32, %c0_i32_0 : i32, i32
  }
  func.func @transform_3(%arg0: i32) -> (i32, i32) {
    %c0_i32 = arith.constant 0 : i32
    %c0_i32_0 = arith.constant 0 : i32
    %c0_i32_1 = arith.constant 0 : i32
    return %c0_i32, %c0_i32_0 : i32, i32
  }
  func.func @transform_4(%arg0: i32) -> (i32, i32, i32) {
    %c0_i32 = arith.constant 0 : i32
    %c0_i32_0 = arith.constant 0 : i32
    %c0_i32_1 = arith.constant 0 : i32
    return %arg0, %c0_i32, %c0_i32_0 : i32, i32, i32
  }
  func.func @transform_5(%arg0: i32) -> (i32, i32, i32) {
    %c0_i32 = arith.constant 0 : i32
    %c0_i32_0 = arith.constant 0 : i32
    %c0_i32_1 = arith.constant 0 : i32
    return %arg0, %c0_i32, %c0_i32_0 : i32, i32, i32
  }
  func.func @transform_6(%arg0: i32) -> (i32, i32, i32) {
    %c0_i32 = arith.constant 0 : i32
    %c0_i32_0 = arith.constant 0 : i32
    %c0_i32_1 = arith.constant 0 : i32
    return %arg0, %c0_i32, %c0_i32_0 : i32, i32, i32
  }
}

</mosaic_0001>

<bundles_post_ra>
// kernel: tpu_custom_call.1
= control target key start
LH: loop header
LB: loop body
LE: loop exit
PB: predicated region body
PF: predicated region fallthrough
CT: control target
= control target key end

     0   :  { %12 = vsyncpa [#allocation5], 0  ;;  %s7236_s25 = smov 127   ;;  %s11732_s0 = inlined_call_operand.vmem [shape: f32[1,8,640], index: 0, kind: input, shape index: {}]   ;;  %s11733_s1 = inlined_call_operand.vmem [shape: f32[8,72], index: 1, kind: input, shape index: {}]   ;;  %s11734_s2 = inlined_call_operand.vmem [shape: f32[224,196], index: 2, kind: input, shape index: {}]   ;;  %s11735_s3 = inlined_call_operand.vmem [shape: f32[181,49], index: 3, kind: input, shape index: {}]   ;;  %s11736_s4 = inlined_call_operand.hbm [shape: f32[2,8,196], index: 4, kind: output, shape index: {0}]   ;;  %s11737_s5 = inlined_call_operand.hbm [shape: f32[2,8,196], index: 5, kind: output, shape index: {1}]   ;;  %s11738_s6 = inlined_call_operand.hbm [shape: f32[2,8,49], index: 6, kind: output, shape index: {2}]  }
   0x1   :  { %v7292_v0 = vld [vmem:[%s11732_s0 + $0x8] sm:$0xff]  ;;  %v7297_v1 = vld [vmem:[%s11732_s0] sm:$0xff]  ;;  %v7306_v2 = vld [vmem:[%s11732_s0 + $0x10] sm:$0xff] }
   0x2   :  { %42 = vrot.lane.b32.xlu0 %v7292_v0, %s7236_s25  ;;  %40 = vrot.lane.b32.xlu1 %v7297_v1, %s7236_s25 }
   0x3   :  { %13 = vsyncpa [#allocation7], 0  ;;  %s7237_s28 = smov 126   ;;  %s7238_s29 = smov 112   ;;  %v11742_v3 = vmov 0.0   ;;  %v7348_v4 = vld [vmem:[%s11732_s0 + $0x18] sm:$0xff] }
   0x4   :  { %s7239_s30 = smov 111   ;;  %s7240_s7 = smov 110   ;;  %417 = vmatprep.mubr.f32.mxu0 %v11742_v3  ;;  %1090 = vmatprep.mubr.f32.mxu1 %v11742_v3  ;;  %v34_v5 = vld [vmem:[%s11732_s0 + $0x20] sm:$0xff]  ;;  %vm50_vm0 = vcmask 1039360   ;;  %v335_v11 = vand.u32 4294901760, %v7292_v0  ;;  %v337_v14 = vand.u32 4294901760, %v7297_v1 }
   0x5   :  { %s7241_s8 = smov 96   ;;  %s7242_s9 = smov 95   ;;  %vm83_vm1 = vcmask 1031168   ;;  %vm116_vm2 = vcmask 916480   ;;  %v294_v24 = vld [vmem:[%s11733_s1] sm:$0xff]  ;;  %vm331_vm3 = vcmask 588800  }
   0x6   :  { %44 = vrot.lane.b32.xlu0 %v7306_v2, %s7236_s25  ;;  %75 = vrot.lane.b32.xlu1 %v7292_v0, %s7237_s28  ;;  %s7244_s10 = smov 94   ;;  %v333_v31 = vsel %vm331_vm3, %v294_v24, 0  ;;  %vm149_vm4 = vcmask 908288   ;;  %v11748_v39 = vand.u32 4294901760, %v7306_v2  ;;  %v7408_v40 = vsub.f32 %v7292_v0, %v335_v11  ;;  %s7246_s11 = smov 114  }
   0x7   :  { %v7400_v35 = vand.u32 4294901760, %v333_v31  ;;  %v7411_v41 = vsub.f32 %v7297_v1, %v337_v14  ;;  %vm182_vm5 = vcmask 900096   ;;  %v11749_v53 = vand.u32 4294901760, %v7348_v4  ;;  %s7248_s13 = smov [#allocation4]  }
   0x8   :  { %v7424_v46 = vsub.f32 %v7306_v2, %v11748_v39  ;;  %v11741_v49 = vand.u32 4294901760, %v7408_v40  ;;  %vm215_vm6 = vcmask 785408   ;;  %vm248_vm7 = vcmask 777216   ;;  %s5786_s14 = sshll.u32 %s7248_s13, 4  ;;  %s11688_s14 = int_to_ptr.vmem [resolvable:$true] %s5786_s14 }
   0x9   :  { %v7417_v43 = vsub.f32 %v333_v31, %v7400_v35  ;;  %v11746_v52 = vand.u32 4294901760, %v7411_v41  ;;  %v7442_v59 = vsub.f32 %v7348_v4, %v11749_v53  ;;  %vm281_vm8 = vcmask 769024  }
   0xa   :  { %77 = vrot.lane.b32.xlu0 %v7306_v2, %s7237_s28  ;;  %108 = vrot.lane.b32.xlu1 %v7292_v0, %s7238_s29  ;;  %12248 = vst [vmem:[#allocation11_spill] sm:$0xff] %v7424_v46  ;;  %v11739_v60 = vand.u32 4294901760, %v7424_v46  ;;  %vm2929_vm9 = vcmask 556032   ;;  %vm2939_vm10 = vcmask 932864   ;;  %vm2983_vm11 = vcmask 1044480  }
   0xb   :  { %v7435_v55 = vand.u32 4294901760, %v7417_v43  ;;  %12250 = vst [vmem:[#allocation13_spill] sm:$0xff] %v7442_v59  ;;  %vm2979_vm12 = vcmask 433152   ;;  %vm3732_vm13 = vcmask 400384  }
   0xd   :  { %12249 = vst [vmem:[#allocation12_spill] sm:$0xff] %v7435_v55 }
   0xe   :  { %110 = vrot.lane.b32.xlu0 %v7306_v2, %s7238_s29  ;;  %73 = vrot.lane.b32.xlu1 %v7297_v1, %s7237_s28 }
  0x12   :  { %106 = vrot.lane.b32.xlu0 %v7297_v1, %s7238_s29  ;;  %141 = vrot.lane.b32.xlu1 %v7292_v0, %s7239_s30 }
  0x16   :  { %143 = vrot.lane.b32.xlu0 %v7306_v2, %s7239_s30  ;;  %174 = vrot.lane.b32.xlu1 %v7292_v0, %s7240_s7 }
  0x1a   :  { %176 = vrot.lane.b32.xlu0 %v7306_v2, %s7240_s7  ;;  %139 = vrot.lane.b32.xlu1 %v7297_v1, %s7239_s30 }
  0x1e   :  { %172 = vrot.lane.b32.xlu0 %v7297_v1, %s7240_s7  ;;  %207 = vrot.lane.b32.xlu1 %v7292_v0, %s7241_s8 }
  0x22   :  { %209 = vrot.lane.b32.xlu0 %v7306_v2, %s7241_s8  ;;  %240 = vrot.lane.b32.xlu1 %v7292_v0, %s7242_s9 }
  0x26   :  { %242 = vrot.lane.b32.xlu0 %v7306_v2, %s7242_s9  ;;  %205 = vrot.lane.b32.xlu1 %v7297_v1, %s7241_s8 }
  0x2a   :  { %238 = vrot.lane.b32.xlu0 %v7297_v1, %s7242_s9  ;;  %273 = vrot.lane.b32.xlu1 %v7292_v0, %s7244_s10  ;;  %v7452_v0 = vsub.f32 %v7408_v40, %v11741_v49 }
  0x2e   :  { %275 = vrot.lane.b32.xlu0 %v7306_v2, %s7244_s10  ;;  %271 = vrot.lane.b32.xlu1 %v7297_v1, %s7244_s10 }
  0x32   :  { %46 = vrot.lane.b32.xlu0 %v7348_v4, %s7236_s25  ;;  %48 = vrot.lane.b32.xlu1 %v34_v5, %s7236_s25 }
  0x36   :  { %79 = vrot.lane.b32.xlu0 %v7348_v4, %s7237_s28  ;;  %81 = vrot.lane.b32.xlu1 %v34_v5, %s7237_s28 }
  0x3a   :  { %112 = vrot.lane.b32.xlu0 %v7348_v4, %s7238_s29  ;;  %114 = vrot.lane.b32.xlu1 %v34_v5, %s7238_s29 }
  0x3e   :  { %145 = vrot.lane.b32.xlu0 %v7348_v4, %s7239_s30  ;;  %147 = vrot.lane.b32.xlu1 %v34_v5, %s7239_s30 }
  0x42   :  { %178 = vrot.lane.b32.xlu0 %v7348_v4, %s7240_s7  ;;  %180 = vrot.lane.b32.xlu1 %v34_v5, %s7240_s7 }
  0x46   :  { %211 = vrot.lane.b32.xlu0 %v7348_v4, %s7241_s8  ;;  %213 = vrot.lane.b32.xlu1 %v34_v5, %s7241_s8 }
  0x4a   :  { %244 = vrot.lane.b32.xlu0 %v7348_v4, %s7242_s9  ;;  %246 = vrot.lane.b32.xlu1 %v34_v5, %s7242_s9 }
  0x4e   :  { %277 = vrot.lane.b32.xlu0 %v7348_v4, %s7244_s10  ;;  %279 = vrot.lane.b32.xlu1 %v34_v5, %s7244_s10 }
  0x74   :  { %v43_v6 = vpop.permute.xlu0 %42  ;;  %v41_v7 = vpop.permute.xlu1 %40 }
  0x75   :  { %v51_v8 = vsel %vm50_vm0, %v41_v7, %v43_v6  ;;  %v438_v7 = vsub.f32 %v7411_v41, %v11746_v52 }
  0x76   :  { %v341_v12 = vand.u32 4294901760, %v51_v8 }
  0x78   :  { %v7372_v9 = vpop.permute.xlu0 %44  ;;  %v76_v10 = vpop.permute.xlu1 %75  ;;  %v7382_v19 = vpack.c.bf16 %v341_v12, %v337_v14  ;;  %v7426_v47 = vsub.f32 %v51_v8, %v341_v12  ;;  %v421_v8 = vsub.f32 %v7417_v43, %v7435_v55  ;;  %v11740_v14 = vand.u32 4294901760, %v7442_v59 }
  0x79   :  { %v52_v13 = vsel %vm50_vm0, %v43_v6, %v7372_v9 }
  0x7a   :  { %v339_v15 = vand.u32 4294901760, %v52_v13  ;;  %v11745_v61 = vand.u32 4294901760, %v7426_v47  ;;  %v7489_v31 = vand.u32 4294901760, %v421_v8 }
  0x7c   :  { %v7378_v16 = vpop.permute.xlu0 %77  ;;  %v109_v17 = vpop.permute.xlu1 %108  ;;  %v7380_v18 = vpack.c.bf16 %v339_v15, %v335_v11  ;;  %v7446_v62 = vsub.f32 %v52_v13, %v339_v15  ;;  %v7472_v15 = vsub.f32 %v7424_v46, %v11739_v60 }
  0x7d   :  { %v85_v20 = vsel %vm83_vm1, %v76_v10, %v7378_v16 }
  0x7e   :  { %5829 = vmatprep.subr.bf16.mxu0 %v7380_v18  ;;  %v343_v25 = vand.u32 4294901760, %v85_v20 }
  0x7f   :  { %5831 = vmatpush1.bf16.msra.mxu0 %v7382_v19 }
  0x80   :  { %v7388_v21 = vpop.permute.xlu0 %110  ;;  %v74_v22 = vpop.permute.xlu1 %73 }
  0x81   :  { %v118_v23 = vsel %vm116_vm2, %v109_v17, %v7388_v21  ;;  %v84_v27 = vsel %vm83_vm1, %v74_v22, %v76_v10  ;;  %v7462_v10 = vsub.f32 %v85_v20, %v343_v25  ;;  %v11744_v22 = vand.u32 4294901760, %v7446_v62 }
  0x82   :  { %v347_v26 = vand.u32 4294901760, %v118_v23  ;;  %v345_v33 = vand.u32 4294901760, %v84_v27 }
  0x84   :  { %v107_v28 = vpop.permute.xlu0 %106  ;;  %v142_v29 = vpop.permute.xlu1 %141  ;;  %v7396_v30 = vpack.c.bf16 %v347_v26, %v343_v25  ;;  %v7454_v1 = vsub.f32 %v118_v23, %v347_v26  ;;  %v7478_v20 = vsub.f32 %v84_v27, %v345_v33  ;;  %v433_v23 = vand.u32 4294901760, %v7452_v0 }
  0x85   :  { %v117_v32 = vsel %vm116_vm2, %v107_v28, %v109_v17  ;;  %v450_v17 = vsub.f32 %v7426_v47, %v11745_v61  ;;  %v439_v26 = vand.u32 4294901760, %v438_v7  ;;  %v11750_v27 = vand.u32 4294901760, %v7462_v10 }
  0x86   :  { %v349_v34 = vand.u32 4294901760, %v117_v32  ;;  %5833 = vmatprep.subr.bf16.mxu0 %v7396_v30  ;;  %v11747_v24 = vand.u32 4294901760, %v7454_v1 }
  0x87   :  { %v456_v52 = vsub.f32 %v7462_v10, %v11750_v27 }
  0x88   :  { %v7402_v36 = vpop.permute.xlu0 %143  ;;  %v175_v37 = vpop.permute.xlu1 %174  ;;  %v7404_v38 = vpack.c.bf16 %v349_v34, %v345_v33  ;;  %v7482_v25 = vsub.f32 %v117_v32, %v349_v34  ;;  %v7499_v34 = vsub.f32 %v7442_v59, %v11740_v14  ;;  %v468_v8 = vsub.f32 %v7454_v1, %v11747_v24 }
  0x89   :  { %v151_v42 = vsel %vm149_vm4, %v142_v29, %v7402_v36 }
  0x8a   :  { %5835 = vmatpush1.bf16.msra.mxu0 %v7404_v38  ;;  %v351_v50 = vand.u32 4294901760, %v151_v42  ;;  %v469_v53 = vand.u32 4294901760, %v468_v8 }
  0x8c   :  { %v7419_v44 = vpop.permute.xlu0 %176  ;;  %v140_v45 = vpop.permute.xlu1 %139  ;;  %v7485_v28 = vsub.f32 %v151_v42, %v351_v50 }
  0x8d   :  { %v184_v48 = vsel %vm182_vm5, %v175_v37, %v7419_v44  ;;  %v150_v54 = vsel %vm149_vm4, %v140_v45, %v142_v29  ;;  %v451_v45 = vand.u32 4294901760, %v450_v17 }
  0x8e   :  { %v355_v51 = vand.u32 4294901760, %v184_v48  ;;  %v353_v5 = vand.u32 4294901760, %v150_v54  ;;  %v11753_v60 = vand.u32 4294901760, %v7485_v28 }
  0x90   :  { %v173_v56 = vpop.permute.xlu0 %172  ;;  %v208_v57 = vpop.permute.xlu1 %207  ;;  %v7437_v58 = vpack.c.bf16 %v355_v51, %v351_v50  ;;  %v7492_v33 = vsub.f32 %v184_v48, %v355_v51  ;;  %v11751_v50 = vand.u32 4294901760, %v7478_v20  ;;  %v444_v48 = vsub.f32 %v7446_v62, %v11744_v22 }
  0x91   :  { %v183_v63 = vsel %vm182_vm5, %v173_v56, %v175_v37  ;;  %v11752_v51 = vand.u32 4294901760, %v7482_v25  ;;  %v7513_v17 = vsub.f32 %v150_v54, %v353_v5 }
  0x92   :  { %v357_v6 = vand.u32 4294901760, %v183_v63  ;;  %5837 = vmatprep.subr.bf16.mxu0 %v7437_v58  ;;  %12252 = vst [vmem:[#allocation15_spill] sm:$0xff] %v7492_v33  ;;  %v11754_v42 = vand.u32 4294901760, %v7492_v33  ;;  %v7528_v54 = vsub.f32 %v7478_v20, %v11751_v50 }
  0x93   :  { %v474_v27 = vsub.f32 %v7482_v25, %v11752_v51 }
  0x94   :  { %v7464_v11 = vpop.permute.xlu0 %209  ;;  %v241_v12 = vpop.permute.xlu1 %240  ;;  %v7466_v13 = vpack.c.bf16 %v357_v6, %v353_v5  ;;  %v7515_v14 = vsub.f32 %v183_v63, %v357_v6  ;;  %v5846_v5 = vpack.c.bf16 %v451_v45, %v439_v26  ;;  %v463_v8 = vand.u32 4294901760, %v7528_v54  ;;  %v7569_v54 = vld [vmem:[%s11734_s2 + $0x18] sm:$0xff] }
  0x95   :  { %v217_v29 = vsel %vm215_vm6, %v208_v57, %v7464_v11  ;;  %12259 = vst [vmem:[#allocation22_spill] sm:$0xff] %v7569_v54 }
  0x96   :  { %12251 = vst [vmem:[#allocation14_spill] sm:$0xff] %v7466_v13  ;;  %5839 = vmatpush1.bf16.msra.mxu0 %v7466_v13  ;;  %v359_v0 = vand.u32 4294901760, %v217_v29  ;;  %12253 = vst [vmem:[#allocation16_spill] sm:$0xff] %v7515_v14 }
  0x98   :  { %v7494_v37 = vpop.permute.xlu0 %242  ;;  %v206_v32 = vpop.permute.xlu1 %205 }
  0x99   :  { %v250_v56 = vsel %vm248_vm7, %v241_v12, %v7494_v37  ;;  %v216_v49 = vsel %vm215_vm6, %v206_v32, %v208_v57  ;;  %v445_v57 = vand.u32 4294901760, %v444_v48  ;;  %v457_v48 = vand.u32 4294901760, %v456_v52 }
  0x9a   :  { %v363_v7 = vand.u32 4294901760, %v250_v56  ;;  %v361_v32 = vand.u32 4294901760, %v216_v49 }
  0x9b   :  { %v5848_v52 = vpack.c.bf16 %v469_v53, %v457_v48 }
  0x9c   :  { %v239_v3 = vpop.permute.xlu0 %238  ;;  %v274_v22 = vpop.permute.xlu1 %273  ;;  %v7519_v61 = vpack.c.bf16 %v363_v7, %v359_v0  ;;  %v7531_v6 = vsub.f32 %v250_v56, %v363_v7  ;;  %v492_v7 = vsub.f32 %v7492_v33, %v11754_v42  ;;  %v7564_v42 = vld [vmem:[%s11734_s2 + $0x8] sm:$0xff]  ;;  %v7578_v48 = vsub.f32 %v216_v49, %v361_v32 }
  0x9d   :  { %v249_v63 = vsel %vm248_vm7, %v239_v3, %v241_v12  ;;  %v480_v3 = vsub.f32 %v7485_v28, %v11753_v60  ;;  %v7542_v12 = vsub.f32 %v217_v29, %v359_v0  ;;  %v5844_v60 = vpack.c.bf16 %v445_v57, %v433_v23  ;;  %12258 = vst [vmem:[#allocation21_spill] sm:$0xff] %v7564_v42 }
  0x9e   :  { %12254 = vst [vmem:[#allocation17_spill] sm:$0xff] %v7519_v61  ;;  %12255 = vst [vmem:[#allocation18_spill] sm:$0xff] %v7531_v6  ;;  %v365_v39 = vand.u32 4294901760, %v249_v63  ;;  %5841 = vmatprep.subr.bf16.mxu0 %v7519_v61  ;;  %v12260_v23 = vand.u32 4294901760, %v7513_v17  ;;  %v11769_v59 = vand.u32 4294901760, %v7564_v42 }
  0x9f   :  { %v481_v53 = vand.u32 4294901760, %v480_v3  ;;  %v11771_v3 = vand.u32 4294901760, %v7569_v54 }
  0xa0   :  { %v7544_v26 = vpop.permute.xlu0 %275  ;;  %v272_v45 = vpop.permute.xlu1 %271  ;;  %v7546_v56 = vpack.c.bf16 %v365_v39, %v361_v32  ;;  %v7556_v0 = vsub.f32 %v249_v63, %v365_v39  ;;  %v486_v39 = vsub.f32 %v7513_v17, %v12260_v23  ;;  %v12261_v63 = vand.u32 4294901760, %v7515_v14 }
  0xa1   :  { %v283_v51 = vsel %vm281_vm8, %v274_v22, %v7544_v26  ;;  %v282_v50 = vsel %vm281_vm8, %v272_v45, %v274_v22  ;;  %v475_v22 = vand.u32 4294901760, %v474_v27  ;;  %v493_v27 = vand.u32 4294901760, %v492_v7 }
  0xa2   :  { %12256 = vst [vmem:[#allocation19_spill] sm:$0xff] %v7546_v56  ;;  %v7558_v24 = vand.u32 4294901760, %v283_v51  ;;  %5843 = vmatpush1.bf16.msra.mxu0 %v7546_v56  ;;  %v498_v57 = vsub.f32 %v7515_v14, %v12261_v63  ;;  %v7580_v29 = vand.u32 4294901760, %v282_v50  ;;  %v12263_v45 = vand.u32 4294901760, %v7531_v6 }
  0xa3   :  { %v12268_v63 = vand.u32 4294901760, %v7306_v2  ;;  %v487_v2 = vand.u32 4294901760, %v486_v39 }
  0xa4   :  { %12257 = vst [vmem:[#allocation20_spill] sm:$0xff] %v7558_v24  ;;  %12262 = vst [vmem:[#allocation23_spill] sm:$0xff] %v7580_v29  ;;  %v47_v55 = vpop.permute.xlu0 %46  ;;  %v49_v56 = vpop.permute.xlu1 %48  ;;  %368 = vmatprep.subr.mxu0 %v7558_v24  ;;  %v516_v61 = vsub.f32 %v7531_v6, %v12263_v45  ;;  %v499_v7 = vand.u32 4294901760, %v498_v57  ;;  %v7594_v13 = vsub.f32 %v283_v51, %v7558_v24  ;;  %v12266_v51 = vand.u32 4294901760, %v7348_v4 }
  0xa5   :  { %v53_v46 = vsel %vm50_vm0, %v7372_v9, %v47_v55  ;;  %v54_v23 = vsel %vm50_vm0, %v47_v55, %v49_v56  ;;  %v7600_v9 = vsub.f32 %v7564_v42, %v11769_v59  ;;  %v7605_v55 = vsub.f32 %v7569_v54, %v11771_v3 }
  0xa6   :  { %v1014_v49 = vand.u32 4294901760, %v53_v46  ;;  %v1012_v32 = vand.u32 4294901760, %v54_v23  ;;  %370 = vmatpush1.msra.mxu0 %v7580_v29  ;;  %v12270_v59 = vand.u32 4294901760, %v7542_v12  ;;  %v7620_v3 = vsub.f32 %v282_v50, %v7580_v29 }
  0xa7   :  { %5845 = vmatprep.subr.bf16.mxu0 %v5844_v60  ;;  %423 = vmatmul.mubr.f32.vlgmr.msra.gmra.mrb[0].mxu0 %v7489_v31  ;;  %12264 = vst [vmem:[#allocation24_spill] sm:$0xff] %v7600_v9  ;;  %12265 = vst [vmem:[#allocation25_spill] sm:$0xff] %v7605_v55  ;;  %v5850_v56 = vpack.c.bf16 %v475_v22, %v463_v8  ;;  %v12271_v4 = vand.u32 4294901760, %v7411_v41  ;;  %v5852_v50 = vpack.c.bf16 %v493_v27, %v481_v53  ;;  %v12275_v8 = vmov 0.0  }
  0xa8   :  { %v80_v45 = vpop.permute.xlu0 %79  ;;  %v82_v57 = vpop.permute.xlu1 %81  ;;  %5847 = vmatpush1.bf16.msra.mxu0 %v5846_v5  ;;  %v7610_v60 = vpack.c.bf16 %v1012_v32, %v12266_v51  ;;  %v7614_v24 = vpack.c.bf16 %v1014_v49, %v12268_v63  ;;  %v504_v9 = vsub.f32 %v7542_v12, %v12270_v59  ;;  %v12272_v51 = vand.u32 4294901760, %v7426_v47  ;;  %583 = vmatprep.mubr.f32.mxu0 %v12275_v8 }
  0xa9   :  { %5849 = vmatprep.subr.bf16.mxu0 %v5848_v52  ;;  %v12274_v63 = vand.u32 4294901760, %v7556_v0  ;;  %v87_v59 = vsel %vm83_vm1, %v80_v45, %v82_v57  ;;  %v7636_v52 = vsub.f32 %v53_v46, %v1014_v49  ;;  %v86_v22 = vsel %vm83_vm1, %v7378_v16, %v80_v45 }
  0xaa   :  { %12267 = vst [vmem:[#allocation26_spill] sm:$0xff] %v7610_v60  ;;  %12269 = vst [vmem:[#allocation27_spill] sm:$0xff] %v7614_v24  ;;  %v7628_v55 = vpack.c.bf16 %v12272_v51, %v12271_v4  ;;  %5925 = vmatprep.subr.bf16.mxu1 %v7610_v60  ;;  %v517_v4 = vand.u32 4294901760, %v516_v61  ;;  %v12276_v51 = vand.u32 4294901760, %v7578_v48  ;;  %v5854_v53 = vpack.c.bf16 %v499_v7, %v487_v2 }
  0xab   :  { %v522_v54 = vsub.f32 %v7556_v0, %v12274_v63  ;;  %5927 = vmatpush1.bf16.msra.mxu1 %v7614_v24  ;;  %v505_v27 = vand.u32 4294901760, %v504_v9  ;;  %v1016_v16 = vand.u32 4294901760, %v87_v59  ;;  %v7651_v42 = vsub.f32 %v54_v23, %v1012_v32 }
  0xac   :  { %12273 = vst [vmem:[#allocation28_spill] sm:$0xff] %v7628_v55  ;;  %v510_v63 = vsub.f32 %v7578_v48, %v12276_v51  ;;  %v113_v57 = vpop.permute.xlu0 %112  ;;  %v115_v5 = vpop.permute.xlu1 %114  ;;  %5851 = vmatpush1.bf16.msra.mxu0 %v5850_v56  ;;  %v1018_v51 = vand.u32 4294901760, %v86_v22  ;;  %v11779_v7 = vand.u32 4294901760, %v7636_v52  ;;  %v12277_v2 = vand.u32 4294901760, %v7594_v13 }
  0xad   :  { %v119_v61 = vsel %vm116_vm2, %v7388_v21, %v113_v57  ;;  %v120_v45 = vsel %vm116_vm2, %v113_v57, %v115_v5  ;;  %5853 = vmatprep.subr.bf16.mxu0 %v5852_v50  ;;  %v523_v39 = vand.u32 4294901760, %v522_v54  ;;  %v5856_v56 = vpack.c.bf16 %v517_v4, %v505_v27 }
  0xae   :  { %v1022_v24 = vand.u32 4294901760, %v119_v61  ;;  %v1020_v9 = vand.u32 4294901760, %v120_v45  ;;  %v528_v46 = vsub.f32 %v7594_v13, %v12277_v2  ;;  %v511_v49 = vand.u32 4294901760, %v510_v63 }
  0xaf   :  { %v7657_v60 = vsub.f32 %v87_v59, %v1016_v16  ;;  %v5864_v54 = vpack.c.bf16 %v7454_v1, %v7462_v10  ;;  %v12279_v32 = vand.u32 4294901760, %v7620_v3  ;;  %v11780_v63 = vand.u32 4294901760, %v7651_v42 }
  0xb0   :  { %v146_v21 = vpop.permute.xlu0 %145  ;;  %v148_v55 = vpop.permute.xlu1 %147  ;;  %5855 = vmatpush1.bf16.msra.mxu0 %v5854_v53  ;;  %v7659_v5 = vpack.c.bf16 %v1022_v24, %v1018_v51  ;;  %v7669_v59 = vpack.c.bf16 %v1020_v9, %v1016_v16  ;;  %v7672_v57 = vsub.f32 %v119_v61, %v1022_v24  ;;  %v5858_v53 = vpack.c.bf16 %v523_v39, %v511_v49 }
  0xb1   :  { %v534_v50 = vsub.f32 %v7620_v3, %v12279_v32  ;;  %v153_v4 = vsel %vm149_vm4, %v146_v21, %v148_v55  ;;  %5857 = vmatprep.subr.bf16.mxu0 %v5856_v56  ;;  %v1123_v32 = vsub.f32 %v7636_v52, %v11779_v7  ;;  %v529_v55 = vand.u32 4294901760, %v528_v46  ;;  %v7693_v46 = vld [vmem:[%s11734_s2] sm:$0xff] }
  0xb2   :  { %12278 = vst [vmem:[#allocation29_spill] sm:$0xff] %v7659_v5  ;;  %12280 = vst [vmem:[#allocation30_spill] sm:$0xff] %v7669_v59  ;;  %5929 = vmatprep.subr.bf16.mxu1 %v7669_v59  ;;  %v7684_v56 = vsub.f32 %v86_v22, %v1018_v51  ;;  %v11783_v24 = vand.u32 4294901760, %v7657_v60  ;;  %v152_v39 = vsel %vm149_vm4, %v7402_v36, %v146_v21  ;;  %v1024_v49 = vand.u32 4294901760, %v153_v4 }
  0xb3   :  { %5931 = vmatpush1.bf16.msra.mxu1 %v7659_v5  ;;  %v7695_v7 = vsub.f32 %v120_v45, %v1020_v9  ;;  %v535_v36 = vand.u32 4294901760, %v534_v50  ;;  %v1124_v9 = vand.u32 4294901760, %v1123_v32  ;;  %v1026_v23 = vand.u32 4294901760, %v152_v39 }
  0xb4   :  { %v179_v61 = vpop.permute.xlu0 %178  ;;  %v181_v2 = vpop.permute.xlu1 %180  ;;  %5859 = vmatpush1.bf16.msra.mxu0 %v5858_v53  ;;  %v7704_v53 = vsub.f32 %v7651_v42, %v11780_v63  ;;  %v7722_v32 = vsub.f32 %v7657_v60, %v11783_v24 }
  0xb5   :  { %v185_v22 = vsel %vm182_vm5, %v7419_v44, %v179_v61  ;;  %v186_v51 = vsel %vm182_vm5, %v179_v61, %v181_v2  ;;  %530 = vmatprep.subr.mxu0 %v529_v55  ;;  %v7711_v44 = vld [vmem:[%s11734_s2 + $0x10] sm:$0xff]  ;;  %v7715_v55 = vsub.f32 %v153_v4, %v1024_v49  ;;  %v12282_v4 = vpack.c.bf16 %v7446_v62, %v7408_v40 }
  0xb6   :  { %v1030_v16 = vand.u32 4294901760, %v185_v22  ;;  %v1028_v27 = vand.u32 4294901760, %v186_v51 }
  0xb8   :  { %v212_v61 = vpop.permute.xlu0 %211  ;;  %v214_v21 = vpop.permute.xlu1 %213  ;;  %536 = vmatpush1.msra.mxu0 %v535_v36  ;;  %v7717_v63 = vpack.c.bf16 %v1028_v27, %v1024_v49  ;;  %v7732_v49 = vpack.c.bf16 %v1030_v16, %v1026_v23  ;;  %v12284_v36 = vand.u32 4294901760, %v7672_v57  ;;  %v7739_v2 = vsub.f32 %v186_v51, %v1028_v27 }
  0xb9   :  { %v218_v5 = vsel %vm215_vm6, %v7464_v11, %v212_v61  ;;  %v219_v50 = vsel %vm215_vm6, %v212_v61, %v214_v21  ;;  %5861 = vmatprep.subr.bf16.mxu0 %v12282_v4  ;;  %585 = vmatmul.mubr.f32.vlgmr.msra.gmra.mrb[0].mxu0 %v7400_v35  ;;  %v12285_v11 = vpack.c.bf16 %v7426_v47, %v7411_v41  ;;  %v1118_v21 = vand.u32 4294901760, %v7704_v53 }
  0xba   :  { %12281 = vst [vmem:[#allocation31_spill] sm:$0xff] %v7717_v63  ;;  %12283 = vst [vmem:[#allocation32_spill] sm:$0xff] %v7732_v49  ;;  %v7737_v24 = vsub.f32 %v7672_v57, %v12284_v36  ;;  %5933 = vmatprep.subr.bf16.mxu1 %v7717_v63  ;;  %v7747_v4 = vsub.f32 %v152_v39, %v1026_v23  ;;  %v7749_v45 = vsub.f32 %v185_v22, %v1030_v16 }
  0xbb   :  { %5863 = vmatpush1.bf16.msra.mxu0 %v12285_v11  ;;  %v1034_v59 = vand.u32 4294901760, %v218_v5  ;;  %v1032_v29 = vand.u32 4294901760, %v219_v50  ;;  %5935 = vmatpush1.bf16.msra.mxu1 %v7732_v49  ;;  %v12286_v27 = vand.u32 4294901760, %v7684_v56  ;;  %v12287_v53 = vand.u32 4294901760, %v7472_v15 }
  0xbc   :  { %5865 = vmatprep.subr.bf16.mxu0 %v5864_v54  ;;  %v245_v51 = vpop.permute.xlu0 %244  ;;  %v247_v36 = vpop.permute.xlu1 %246  ;;  %691 = vmatprep.mubr.f32.mxu0 %v12275_v8  ;;  %v1130_v23 = vand.u32 4294901760, %v7722_v32  ;;  %v12288_v22 = vand.u32 4294901760, %v7695_v7  ;;  %v12289_v32 = vpack.c.bf16 %v7482_v25, %v7478_v20 }
  0xbd   :  { %v1135_v41 = vsub.f32 %v7684_v56, %v12286_v27  ;;  %v7758_v11 = vpack.c.bf16 %v1124_v9, %v12287_v53  ;;  %v7762_v16 = vsub.f32 %v219_v50, %v1032_v29  ;;  %v251_v54 = vsel %vm248_vm7, %v7494_v37, %v245_v51 }
  0xbe   :  { %v252_v39 = vsel %vm248_vm7, %v245_v51, %v247_v36  ;;  %v1141_v27 = vsub.f32 %v7695_v7, %v12288_v22  ;;  %v7771_v15 = vsub.f32 %v218_v5, %v1034_v59  ;;  %v1038_v9 = vand.u32 4294901760, %v251_v54 }
  0xbf   :  { %v1036_v53 = vand.u32 4294901760, %v252_v39  ;;  %5867 = vmatpush1.bf16.msra.mxu0 %v12289_v32  ;;  %v1148_v50 = vand.u32 4294901760, %v7737_v24  ;;  %v12290_v22 = vpack.c.bf16 %v7492_v33, %v7485_v28  ;;  %v12293_v37 = vand.u32 4294901760, %v7715_v55 }
  0xc0   :  { %v7783_v5 = vsub.f32 %v251_v54, %v1038_v9  ;;  %v278_v47 = vpop.permute.xlu0 %277  ;;  %v280_v49 = vpop.permute.xlu1 %279  ;;  %v7789_v32 = vpack.c.bf16 %v1038_v9, %v1034_v59  ;;  %v1142_v36 = vand.u32 4294901760, %v1141_v27  ;;  %v12297_v27 = vand.u32 4294901760, %v7747_v4 }
  0xc1   :  { %5869 = vmatprep.subr.bf16.mxu0 %v12290_v22  ;;  %v7785_v61 = vsub.f32 %v252_v39, %v1036_v53  ;;  %v7787_v63 = vpack.c.bf16 %v1036_v53, %v1032_v29  ;;  %v284_v24 = vsel %vm281_vm8, %v7544_v26, %v278_v47  ;;  %v285_v51 = vsel %vm281_vm8, %v278_v47, %v280_v49  ;;  %v7810_v49 = vld [vmem:[%s11734_s2 + $0x28] sm:$0xff] }
  0xc2   :  { %12292 = vst [vmem:[#allocation34_spill] sm:$0xff] %v7789_v32  ;;  %v1153_v22 = vsub.f32 %v7715_v55, %v12293_v37  ;;  %v12294_v29 = vpack.c.bf16 %v7515_v14, %v7513_v17  ;;  %v12295_v26 = vand.u32 4294901760, %v7739_v2  ;;  %12296 = vst [vmem:[#allocation35_spill] sm:$0xff] %v7810_v49  ;;  %v1136_v47 = vand.u32 4294901760, %v1135_v41 }
  0xc3   :  { %12291 = vst [vmem:[#allocation33_spill] sm:$0xff] %v7787_v63  ;;  %5937 = vmatprep.subr.bf16.mxu1 %v7787_v63  ;;  %v7815_v9 = vsub.f32 %v7747_v4, %v12297_v27  ;;  %v7817_v53 = vand.u32 4294901760, %v284_v24  ;;  %v7819_v37 = vand.u32 4294901760, %v285_v51  ;;  %v12302_v41 = vand.u32 4294901760, %v7499_v34  ;;  %v7845_v34 = vld [vmem:[%s11734_s2 + $0x38] sm:$0xff] }
  0xc4   :  { %5871 = vmatpush1.bf16.msra.mxu0 %v12294_v29  ;;  %v1165_v59 = vsub.f32 %v7739_v2, %v12295_v26  ;;  %v12300_v29 = vpack.c.bf16 %v7531_v6, %v7542_v12  ;;  %5939 = vmatpush1.bf16.msra.mxu1 %v7789_v32  ;;  %v12301_v26 = vand.u32 4294901760, %v7749_v45  ;;  %v12303_v27 = vand.u32 4294901760, %v7762_v16  ;;  %12305 = vst [vmem:[#allocation38_spill] sm:$0xff] %v7845_v34 }
  0xc5   :  { %12298 = vst [vmem:[#allocation36_spill] sm:$0xff] %v7817_v53  ;;  %12299 = vst [vmem:[#allocation37_spill] sm:$0xff] %v7819_v37  ;;  %v5940_v54 = vpack.c.bf16 %v1118_v21, %v12302_v41  ;;  %v12304_v63 = vand.u32 4294901760, %v7785_v61  ;;  %1041 = vmatprep.subr.mxu1 %v7819_v37  ;;  %v5944_v32 = vpack.c.bf16 %v1142_v36, %v1130_v23 }
  0xc6   :  { %5873 = vmatprep.subr.bf16.mxu0 %v12300_v29  ;;  %v7828_v39 = vsub.f32 %v7749_v45, %v12301_v26  ;;  %v1177_v33 = vsub.f32 %v7762_v16, %v12303_v27  ;;  %v7839_v29 = vsub.f32 %v285_v51, %v7819_v37  ;;  %v5946_v6 = vpack.c.bf16 %v1148_v50, %v1136_v47  ;;  %v7864_v47 = vld [vmem:[%s11734_s2 + $0x20] sm:$0xff]  ;;  %v7869_v27 = vld [vmem:[%s11734_s2 + $0x30] sm:$0xff] }
  0xc7   :  { %v1189_v14 = vsub.f32 %v7785_v61, %v12304_v63  ;;  %v12306_v26 = vand.u32 4294901760, %v7771_v15  ;;  %v12307_v63 = vand.u32 4294901760, %v7783_v5  ;;  %v12308_v23 = vpack.c.bf16 %v7556_v0, %v7578_v48  ;;  %12309 = vst [vmem:[#allocation39_spill] sm:$0xff] %v7864_v47  ;;  %12310 = vst [vmem:[#allocation40_spill] sm:$0xff] %v7869_v27 }
  0xc8   :  { %v1154_v50 = vand.u32 4294901760, %v1153_v22  ;;  %v1166_v36 = vand.u32 4294901760, %v1165_v59  ;;  %1043 = vmatpush1.msra.mxu1 %v7817_v53  ;;  %v12311_v22 = vand.u32 4294901760, %v7693_v46 }
  0xc9   :  { %v7851_v41 = vsub.f32 %v7771_v15, %v12306_v26  ;;  %v7856_v51 = vsub.f32 %v7783_v5, %v12307_v63  ;;  %5875 = vmatpush1.bf16.msra.mxu0 %v12308_v23  ;;  %v1160_v26 = vand.u32 4294901760, %v7815_v9  ;;  %v7873_v63 = vsub.f32 %v284_v24, %v7817_v53  ;;  %v7890_v9 = vld [vmem:[%s11734_s2 + $0x48] sm:$0xff]  ;;  %5941 = vmatprep.subr.bf16.mxu1 %v5940_v54  ;;  %v7926_v54 = vld [vmem:[%s11734_s2 + $0x50] sm:$0xff] }
  0xca   :  { %641 = vmatprep.subr.mxu0 %v7594_v13  ;;  %v7880_v59 = vsub.f32 %v7693_v46, %v12311_v22  ;;  %v12313_v23 = vand.u32 4294901760, %v7711_v44  ;;  %12315 = vst [vmem:[#allocation43_spill] sm:$0xff] %v7890_v9  ;;  %v1172_v24 = vand.u32 4294901760, %v7828_v39  ;;  %1096 = vmatmul.mubr.f32.vlgmr.msra.gmra.mrb[0].mxu1 %v7489_v31  ;;  %v1178_v53 = vand.u32 4294901760, %v1177_v33  ;;  %v7913_v31 = vld [vmem:[%s11734_s2 + $0x40] sm:$0xff]  ;;  %12321 = vst [vmem:[#allocation48_spill] sm:$0xff] %v7926_v54 }
  0xcb   :  { %v1190_v37 = vand.u32 4294901760, %v1189_v14  ;;  %v11805_v22 = vand.u32 4294901760, %v7845_v34  ;;  %5943 = vmatpush1.bf16.msra.mxu1 %v7758_v11  ;;  %1256 = vmatprep.mubr.f32.mxu1 %v12275_v8  ;;  %v11808_v39 = vand.u32 4294901760, %v7864_v47  ;;  %v7908_v14 = vld [vmem:[%s11734_s2 + $0x58] sm:$0xff]  ;;  %12319 = vst [vmem:[#allocation46_spill] sm:$0xff] %v7913_v31  ;;  %v1184_v33 = vand.u32 4294901760, %v7851_v41 }
  0xcc   :  { %12312 = vst [vmem:[#allocation41_spill] sm:$0xff] %v7880_v59  ;;  %v7885_v21 = vsub.f32 %v7711_v44, %v12313_v23  ;;  %v12316_v23 = vand.u32 4294901760, %v7810_v49  ;;  %12318 = vst [vmem:[#allocation45_spill] sm:$0xff] %v7908_v14  ;;  %5945 = vmatprep.subr.bf16.mxu1 %v5944_v32  ;;  %v5948_v11 = vpack.c.bf16 %v1166_v36, %v1154_v50  ;;  %v7931_v41 = vld [vmem:[%s11734_s2 + $0x68] sm:$0xff]  ;;  %v7936_v32 = vld [vmem:[%s11734_s2 + $0x78] sm:$0xff]  ;;  %v1196_v50 = vand.u32 4294901760, %v7856_v51 }
  0xcd   :  { %644 = vmatpush1.msra.mxu0 %v7620_v3  ;;  %12322 = vst [vmem:[#allocation49_spill] sm:$0xff] %v7931_v41  ;;  %12323 = vst [vmem:[#allocation50_spill] sm:$0xff] %v7936_v32  ;;  %v12325_v59 = vand.u32 4294901760, %v7869_v27  ;;  %v7955_v51 = vld [vmem:[%s11734_s2 + $0x60] sm:$0xff]  ;;  %v7960_v36 = vld [vmem:[%s11734_s2 + $0x70] sm:$0xff] }
  0xce   :  { %12314 = vst [vmem:[#allocation42_spill] sm:$0xff] %v7885_v21  ;;  %v7901_v21 = vsub.f32 %v7810_v49, %v12316_v23  ;;  %v7920_v23 = vsub.f32 %v7845_v34, %v11805_v22  ;;  %5877 = vmatprep.subr.bf16.mxu0 %v7380_v18  ;;  %694 = vmatmul.mubr.f32.vlgmr.msra.gmra.mrb[0].mxu0 %v7417_v43  ;;  %12327 = vst [vmem:[#allocation53_spill] sm:$0xff] %v7955_v51 }
  0xcf   :  { %v7945_v22 = vsub.f32 %v7864_v47, %v11808_v39  ;;  %12328 = vst [vmem:[#allocation54_spill] sm:$0xff] %v7960_v36  ;;  %5879 = vmatpush1.bf16.msra.mxu0 %v7382_v19  ;;  %782 = vmatprep.mubr.f32.mxu0 %v12275_v8 }
  0xd0   :  { %12317 = vst [vmem:[#allocation44_spill] sm:$0xff] %v7901_v21  ;;  %12320 = vst [vmem:[#allocation47_spill] sm:$0xff] %v7920_v23  ;;  %v7950_v23 = vsub.f32 %v7869_v27, %v12325_v59  ;;  %v5952_v21 = vpack.c.bf16 %v1190_v37, %v1178_v53  ;;  %v12329_v59 = vand.u32 4294901760, %v7890_v9  ;;  %5881 = vmatprep.subr.bf16.mxu0 %v7396_v30  ;;  %5947 = vmatpush1.bf16.msra.mxu1 %v5946_v6  ;;  %v7998_v53 = vld [vmem:[%s11734_s2 + $0x98] sm:$0xff] }
  0xd1   :  { %12324 = vst [vmem:[#allocation51_spill] sm:$0xff] %v7945_v22  ;;  %v12331_v27 = vand.u32 4294901760, %v7839_v29  ;;  %5949 = vmatprep.subr.bf16.mxu1 %v5948_v11  ;;  %v12333_v22 = vand.u32 4294901760, %v7908_v14  ;;  %12337 = vst [vmem:[#allocation59_spill] sm:$0xff] %v7998_v53  ;;  %v8003_v11 = vld [vmem:[%s11734_s2 + $0x80] sm:$0xff]  ;;  %v12341_v37 = vand.u32 4294901760, %v7931_v41 }
  0xd2   :  { %12326 = vst [vmem:[#allocation52_spill] sm:$0xff] %v7950_v23  ;;  %v7968_v23 = vsub.f32 %v7890_v9, %v12329_v59  ;;  %v7981_v59 = vld [vmem:[%s11734_s2 + $0x88] sm:$0xff]  ;;  %12338 = vst [vmem:[#allocation60_spill] sm:$0xff] %v8003_v11  ;;  %v8096_v9 = vld [vmem:[%s11734_s2 + $0xc0] sm:$0xff] }
  0xd3   :  { %v1201_v47 = vsub.f32 %v7839_v29, %v12331_v27  ;;  %12332 = vst [vmem:[#allocation56_spill] sm:$0xff] %v7981_v59  ;;  %v7986_v6 = vsub.f32 %v7908_v14, %v12333_v22  ;;  %v5950_v22 = vpack.c.bf16 %v1172_v24, %v1160_v26  ;;  %v8013_v39 = vsub.f32 %v7931_v41, %v12341_v37  ;;  %v8023_v14 = vld [vmem:[%s11734_s2 + $0x90] sm:$0xff]  ;;  %v8028_v26 = vld [vmem:[%s11734_s2 + $0xa8] sm:$0xff]  ;;  %v8033_v24 = vld [vmem:[%s11734_s2 + $0xb8] sm:$0xff] }
  0xd4   :  { %12330 = vst [vmem:[#allocation55_spill] sm:$0xff] %v7968_v23  ;;  %v12335_v23 = vand.u32 4294901760, %v7913_v31  ;;  %12345 = vst [vmem:[#allocation64_spill] sm:$0xff] %v8023_v14  ;;  %v12348_v37 = vand.u32 4294901760, %v7873_v63  ;;  %5883 = vmatpush1.bf16.msra.mxu0 %v7404_v38  ;;  %v8053_v41 = vld [vmem:[%s11734_s2 + $0xa0] sm:$0xff]  ;;  %v12389_v49 = vand.u32 4294901760, %v8096_v9 }
  0xd5   :  { %12334 = vst [vmem:[#allocation57_spill] sm:$0xff] %v7986_v6  ;;  %v12339_v6 = vand.u32 4294901760, %v7926_v54  ;;  %12342 = vst [vmem:[#allocation62_spill] sm:$0xff] %v8013_v39  ;;  %v12351_v39 = vand.u32 4294901760, %v7960_v36  ;;  %5885 = vmatprep.subr.bf16.mxu0 %v7437_v58  ;;  %5951 = vmatpush1.bf16.msra.mxu1 %v5950_v22  ;;  %v12364_v22 = vand.u32 4294901760, %v8023_v14 }
  0xd6   :  { %v7991_v27 = vsub.f32 %v7913_v31, %v12335_v23  ;;  %12346 = vst [vmem:[#allocation65_spill] sm:$0xff] %v8028_v26  ;;  %12347 = vst [vmem:[#allocation66_spill] sm:$0xff] %v8033_v24  ;;  %5953 = vmatprep.subr.bf16.mxu1 %v5952_v21 }
  0xd7   :  { %v8008_v23 = vsub.f32 %v7926_v54, %v12339_v6  ;;  %v1207_v6 = vsub.f32 %v7873_v63, %v12348_v37  ;;  %12353 = vst [vmem:[#allocation69_spill] sm:$0xff] %v8053_v41  ;;  %v8058_v37 = vld [vmem:[%s11734_s2 + $0xb0] sm:$0xff]  ;;  %12360 = vst [vmem:[#allocation76_spill] sm:$0xff] %v8096_v9  ;;  %v12362_v54 = vand.u32 4294901760, %v7408_v40 }
  0xd8   :  { %12336 = vst [vmem:[#allocation58_spill] sm:$0xff] %v7991_v27  ;;  %v12343_v27 = vand.u32 4294901760, %v7936_v32  ;;  %12354 = vst [vmem:[#allocation70_spill] sm:$0xff] %v8058_v37  ;;  %v8123_v40 = vld [vmem:[%s11734_s2 + $0xd0] sm:$0xff] }
  0xd9   :  { %12340 = vst [vmem:[#allocation61_spill] sm:$0xff] %v8008_v23  ;;  %v8047_v23 = vsub.f32 %v7960_v36, %v12351_v39  ;;  %v11830_v39 = vand.u32 4294901760, %v7998_v53  ;;  %12370 = vst [vmem:[#allocation79_spill] sm:$0xff] %v8123_v40 }
  0xda   :  { %v8018_v31 = vsub.f32 %v7936_v32, %v12343_v27  ;;  %v12349_v27 = vand.u32 4294901760, %v7955_v51  ;;  %v11829_v32 = vand.u32 4294901760, %v7981_v59 }
  0xdb   :  { %12352 = vst [vmem:[#allocation68_spill] sm:$0xff] %v8047_v23  ;;  %v11831_v23 = vand.u32 4294901760, %v8003_v11  ;;  %v8079_v21 = vsub.f32 %v7998_v53, %v11830_v39  ;;  %v12361_v39 = vld [vmem:[#allocation14_spill] sm:$0xff]  ;;  %v8180_v53 = vld [vmem:[%s11734_s2 + $0x118] sm:$0xff] }
  0xdc   :  { %12344 = vst [vmem:[#allocation63_spill] sm:$0xff] %v8018_v31  ;;  %v8042_v31 = vsub.f32 %v7955_v51, %v12349_v27  ;;  %v5954_v27 = vpack.c.bf16 %v1196_v50, %v1184_v33  ;;  %v8066_v36 = vsub.f32 %v7981_v59, %v11829_v32  ;;  %v8091_v32 = vld [vmem:[%s11734_s2 + $0xd8] sm:$0xff]  ;;  %5887 = vmatpush1.bf16.msra.mxu0 %v12361_v39  ;;  %12385 = vst [vmem:[#allocation85_spill] sm:$0xff] %v8180_v53  ;;  %v12386_v59 = vld [vmem:[#allocation19_spill] sm:$0xff] }
  0xdd   :  { %12357 = vst [vmem:[#allocation73_spill] sm:$0xff] %v8079_v21  ;;  %v8084_v33 = vsub.f32 %v8003_v11, %v11831_v23  ;;  %12359 = vst [vmem:[#allocation75_spill] sm:$0xff] %v8091_v32  ;;  %v12363_v23 = vand.u32 4294901760, %v7446_v62  ;;  %v8108_v50 = vsub.f32 %v8023_v14, %v12364_v22  ;;  %v8128_v62 = vld [vmem:[%s11734_s2 + $0xe8] sm:$0xff]  ;;  %v12374_v22 = vand.u32 4294901760, %v8053_v41 }
  0xde   :  { %12350 = vst [vmem:[#allocation67_spill] sm:$0xff] %v8042_v31  ;;  %v1202_v31 = vand.u32 4294901760, %v1201_v47  ;;  %12355 = vst [vmem:[#allocation71_spill] sm:$0xff] %v8066_v36  ;;  %v8074_v47 = vld [vmem:[%s11734_s2 + $0xc8] sm:$0xff]  ;;  %v12368_v36 = vand.u32 4294901760, %v8033_v24  ;;  %5955 = vmatpush1.bf16.msra.mxu1 %v5954_v27  ;;  %v8152_v27 = vld [vmem:[%s11734_s2 + $0xe0] sm:$0xff] }
  0xdf   :  { %12356 = vst [vmem:[#allocation72_spill] sm:$0xff] %v8074_v47  ;;  %12358 = vst [vmem:[#allocation74_spill] sm:$0xff] %v8084_v33  ;;  %v8103_v51 = vpack.c.bf16 %v12363_v23, %v12362_v54  ;;  %v12366_v33 = vand.u32 4294901760, %v8028_v26  ;;  %v12372_v54 = vld [vmem:[#allocation17_spill] sm:$0xff]  ;;  %v12387_v34 = vand.u32 4294901760, %v8091_v32 }
  0xe0   :  { %12365 = vst [vmem:[#allocation14_spill] sm:$0xff] %v8108_v50  ;;  %v8118_v11 = vsub.f32 %v8033_v24, %v12368_v36  ;;  %12371 = vst [vmem:[#allocation80_spill] sm:$0xff] %v8128_v62  ;;  %5889 = vmatprep.subr.bf16.mxu0 %v12372_v54  ;;  %v12373_v23 = vld [vmem:[#allocation13_spill] sm:$0xff]  ;;  %v8136_v36 = vsub.f32 %v8053_v41, %v12374_v22  ;;  %v8147_v24 = vld [vmem:[%s11734_s2 + $0xf8] sm:$0xff]  ;;  %1203 = vmatprep.subr.mxu1 %v1202_v31  ;;  %v1208_v31 = vand.u32 4294901760, %v1207_v6 }
  0xe1   :  { %v8113_v21 = vsub.f32 %v8028_v26, %v12366_v33  ;;  %v5956_v33 = vpack.c.bf16 %v7651_v42, %v12373_v23  ;;  %12378 = vst [vmem:[#allocation81_spill] sm:$0xff] %v8147_v24  ;;  %12379 = vst [vmem:[#allocation82_spill] sm:$0xff] %v8152_v27  ;;  %v12380_v22 = vld [vmem:[#allocation11_spill] sm:$0xff]  ;;  %v8168_v41 = vld [vmem:[%s11734_s2 + $0x108] sm:$0xff]  ;;  %v12383_v26 = vand.u32 4294901760, %v8074_v47  ;;  %5891 = vmatpush1.bf16.msra.mxu0 %v12386_v59  ;;  %v12395_v50 = vand.u32 4294901760, %v8128_v62 }
  0xe2   :  { %12369 = vst [vmem:[#allocation78_spill] sm:$0xff] %v8118_v11  ;;  %12375 = vst [vmem:[#allocation17_spill] sm:$0xff] %v8136_v36  ;;  %v12376_v11 = vand.u32 4294901760, %v8058_v37  ;;  %v5958_v36 = vpack.c.bf16 %v7636_v52, %v12380_v22  ;;  %v8186_v6 = vsub.f32 %v8091_v32, %v12387_v34  ;;  %v12392_v34 = vld [vmem:[#allocation20_spill] sm:$0xff]  ;;  %1209 = vmatpush1.msra.mxu1 %v1208_v31  ;;  %v8221_v32 = vld [vmem:[%s11734_s2 + $0x128] sm:$0xff] }
  0xe3   :  { %12367 = vst [vmem:[#allocation77_spill] sm:$0xff] %v8113_v21  ;;  %12382 = vst [vmem:[#allocation83_spill] sm:$0xff] %v8168_v41  ;;  %v8173_v14 = vsub.f32 %v8074_v47, %v12383_v26  ;;  %v8191_v26 = vsub.f32 %v8096_v9, %v12389_v49  ;;  %v8203_v47 = vld [vmem:[%s11734_s2 + $0x110] sm:$0xff]  ;;  %733 = vmatprep.subr.mxu0 %v12392_v34  ;;  %v12393_v49 = vand.u32 4294901760, %v8123_v40  ;;  %v8226_v31 = vld [vmem:[%s11734_s2 + $0x138] sm:$0xff]  ;;  %5957 = vmatprep.subr.bf16.mxu1 %v5956_v33 }
  0xe4   :  { %v8141_v21 = vsub.f32 %v8058_v37, %v12376_v11  ;;  %v5960_v11 = vpack.c.bf16 %v7695_v7, %v7657_v60  ;;  %v8163_v37 = vld [vmem:[%s11734_s2 + $0xf0] sm:$0xff]  ;;  %12388 = vst [vmem:[#allocation19_spill] sm:$0xff] %v8186_v6  ;;  %12391 = vst [vmem:[#allocation87_spill] sm:$0xff] %v8203_v47  ;;  %1258 = vmatmul.mubr.f32.vlgmr.msra.gmra.mrb[0].mxu1 %v7400_v35  ;;  %v12399_v9 = vand.u32 4294901760, %v8147_v24  ;;  %v8247_v33 = vld [vmem:[%s11734_s2 + $0x120] sm:$0xff] }
  0xe5   :  { %12381 = vst [vmem:[#allocation11_spill] sm:$0xff] %v8163_v37  ;;  %12384 = vst [vmem:[#allocation84_spill] sm:$0xff] %v8173_v14  ;;  %v8198_v14 = vld [vmem:[%s11734_s2 + $0x100] sm:$0xff]  ;;  %5959 = vmatpush1.bf16.msra.mxu1 %v5958_v36  ;;  %1364 = vmatprep.mubr.f32.mxu1 %v12275_v8  ;;  %v8265_v36 = vld [vmem:[%s11734_s2 + $0x130] sm:$0xff] }
  0xe6   :  { %12377 = vst [vmem:[#allocation13_spill] sm:$0xff] %v8141_v21  ;;  %12390 = vst [vmem:[#allocation86_spill] sm:$0xff] %v8191_v26  ;;  %v8209_v26 = vsub.f32 %v8123_v40, %v12393_v49  ;;  %v8214_v21 = vsub.f32 %v8128_v62, %v12395_v50  ;;  %v12397_v50 = vand.u32 4294901760, %v7462_v10  ;;  %v12398_v49 = vand.u32 4294901760, %v7454_v1  ;;  %v12407_v40 = vld [vmem:[#allocation23_spill] sm:$0xff]  ;;  %5961 = vmatprep.subr.bf16.mxu1 %v5960_v11  ;;  %v8285_v11 = vld [vmem:[%s11734_s2 + $0x158] sm:$0xff] }
  0xe7   :  { %v12403_v1 = vand.u32 4294901760, %v8163_v37  ;;  %735 = vmatpush1.msra.mxu0 %v12407_v40 }
  0xe8   :  { %12394 = vst [vmem:[#allocation20_spill] sm:$0xff] %v8209_v26  ;;  %12396 = vst [vmem:[#allocation88_spill] sm:$0xff] %v8214_v21  ;;  %v5896_v6 = vpack.c.bf16 %v12398_v49, %v12397_v50  ;;  %v8236_v21 = vsub.f32 %v8147_v24, %v12399_v9  ;;  %v12401_v26 = vand.u32 4294901760, %v8152_v27  ;;  %v12405_v9 = vand.u32 4294901760, %v8168_v41  ;;  %5893 = vmatprep.subr.bf16.mxu0 %v8103_v51  ;;  %v12410_v49 = vld [vmem:[#allocation12_spill] sm:$0xff] }
  0xe9   :  { %v8253_v10 = vsub.f32 %v8163_v37, %v12403_v1  ;;  %v5964_v1 = vpack.c.bf16 %v7739_v2, %v7715_v55  ;;  %786 = vmatmul.mubr.f32.vlgmr.msra.gmra.mrb[0].mxu0 %v12410_v49  ;;  %v12411_v50 = vand.u32 4294901760, %v8198_v14  ;;  %v8310_v37 = vld [vmem:[%s11734_s2 + $0x150] sm:$0xff]  ;;  %v12415_v51 = vld [vmem:[#allocation28_spill] sm:$0xff]  ;;  %v12417_v24 = vand.u32 4294901760, %v7482_v25 }
  0xea   :  { %12400 = vst [vmem:[#allocation89_spill] sm:$0xff] %v8236_v21  ;;  %v8241_v62 = vsub.f32 %v8152_v27, %v12401_v26  ;;  %v8258_v26 = vsub.f32 %v8168_v41, %v12405_v9  ;;  %v12413_v21 = vand.u32 4294901760, %v8203_v47  ;;  %5895 = vmatpush1.bf16.msra.mxu0 %v12415_v51  ;;  %v12416_v27 = vand.u32 4294901760, %v7478_v20  ;;  %910 = vmatprep.mubr.f32.mxu0 %v12275_v8 }
  0xeb   :  { %12404 = vst [vmem:[#allocation91_spill] sm:$0xff] %v8253_v10  ;;  %v12408_v10 = vand.u32 4294901760, %v8180_v53  ;;  %v12420_v41 = vand.u32 4294901760, %v8226_v31  ;;  %5897 = vmatprep.subr.bf16.mxu0 %v5896_v6  ;;  %v12422_v20 = vand.u32 4294901760, %v8247_v33  ;;  %v12423_v51 = vand.u32 4294901760, %v7485_v28 }
  0xec   :  { %12402 = vst [vmem:[#allocation90_spill] sm:$0xff] %v8241_v62  ;;  %12406 = vst [vmem:[#allocation92_spill] sm:$0xff] %v8258_v26  ;;  %v8280_v26 = vld [vmem:[%s11734_s2 + $0x148] sm:$0xff]  ;;  %v8290_v62 = vld [vmem:[%s11734_s2 + $0x140] sm:$0xff]  ;;  %v5968_v6 = vpack.c.bf16 %v7785_v61, %v7762_v16 }
  0xed   :  { %v8273_v9 = vsub.f32 %v8180_v53, %v12408_v10  ;;  %v5962_v10 = vpack.c.bf16 %v7672_v57, %v7684_v56  ;;  %v8304_v53 = vsub.f32 %v8203_v47, %v12413_v21  ;;  %v11876_v47 = vand.u32 4294901760, %v8265_v36 }
  0xee   :  { %v8332_v25 = vsub.f32 %v8247_v33, %v12422_v20  ;;  %v1832_v20 = vand.u32 4294901760, %v8310_v37 }
  0xef   :  { %12409 = vst [vmem:[#allocation23_spill] sm:$0xff] %v8273_v9  ;;  %v8299_v9 = vsub.f32 %v8198_v14, %v12411_v50  ;;  %12414 = vst [vmem:[#allocation93_spill] sm:$0xff] %v8304_v53  ;;  %v5898_v50 = vpack.c.bf16 %v12417_v24, %v12416_v27  ;;  %v8326_v53 = vsub.f32 %v8226_v31, %v12420_v41  ;;  %5963 = vmatpush1.bf16.msra.mxu1 %v5962_v10  ;;  %v12424_v41 = vld [vmem:[#allocation15_spill] sm:$0xff] }
  0xf0   :  { %v11875_v24 = vand.u32 4294901760, %v8280_v26  ;;  %5965 = vmatprep.subr.bf16.mxu1 %v5964_v1  ;;  %v8346_v10 = vsub.f32 %v8265_v36, %v11876_v47  ;;  %v5966_v27 = vpack.c.bf16 %v7749_v45, %v7747_v4  ;;  %v12432_v47 = vld [vmem:[#allocation16_spill] sm:$0xff] }
  0xf1   :  { %12412 = vst [vmem:[#allocation12_spill] sm:$0xff] %v8299_v9  ;;  %v12418_v9 = vand.u32 4294901760, %v8221_v32  ;;  %12421 = vst [vmem:[#allocation94_spill] sm:$0xff] %v8326_v53  ;;  %v12425_v53 = vand.u32 4294901760, %v12424_v41  ;;  %5899 = vmatpush1.bf16.msra.mxu0 %v5898_v50  ;;  %v8369_v41 = vsub.f32 %v8310_v37, %v1832_v20  ;;  %v1731_v37 = vld [vmem:[%s11734_s2 + $0x160] sm:$0xff] }
  0xf2   :  { %12426 = vst [vmem:[#allocation15_spill] sm:$0xff] %v8346_v10  ;;  %v8354_v28 = vsub.f32 %v8280_v26, %v11875_v24  ;;  %v12431_v24 = vand.u32 4294901760, %v7513_v17 }
  0xf3   :  { %v8321_v21 = vsub.f32 %v8221_v32, %v12418_v9  ;;  %v11879_v9 = vand.u32 4294901760, %v8290_v62  ;;  %5967 = vmatpush1.bf16.msra.mxu1 %v5966_v27  ;;  %v12438_v27 = vand.u32 4294901760, %v7556_v0  ;;  %v12443_v0 = vld [vmem:[#allocation30_spill] sm:$0xff] }
  0xf4   :  { %12427 = vst [vmem:[#allocation95_spill] sm:$0xff] %v8354_v28  ;;  %v12433_v28 = vand.u32 4294901760, %v12432_v47  ;;  %5969 = vmatprep.subr.bf16.mxu1 %v5968_v6  ;;  %v12439_v47 = vand.u32 4294901760, %v7594_v13  ;;  %v12445_v13 = vld [vmem:[#allocation31_spill] sm:$0xff]  ;;  %v12451_v6 = vand.u32 4294901760, %v7651_v42  ;;  %v12459_v42 = vld [vmem:[#allocation22_spill] sm:$0xff] }
  0xf5   :  { %12419 = vst [vmem:[#allocation28_spill] sm:$0xff] %v8321_v21  ;;  %v5900_v21 = vpack.c.bf16 %v12425_v53, %v12423_v51  ;;  %v12428_v53 = vand.u32 4294901760, %v8285_v11  ;;  %v8364_v51 = vsub.f32 %v8290_v62, %v11879_v9  ;;  %v12434_v9 = vand.u32 4294901760, %v7542_v12  ;;  %v12440_v12 = vld [vmem:[#allocation26_spill] sm:$0xff] }
  0xf6   :  { %v5902_v10 = vpack.c.bf16 %v12433_v28, %v12431_v24  ;;  %v12441_v24 = vld [vmem:[#allocation27_spill] sm:$0xff] }
  0xf7   :  { %v8359_v1 = vsub.f32 %v8285_v11, %v12428_v53  ;;  %12430 = vst [vmem:[#allocation97_spill] sm:$0xff] %v8364_v51  ;;  %5901 = vmatprep.subr.bf16.mxu0 %v5900_v21  ;;  %v5970_v53 = vpack.c.bf16 %v7783_v5, %v7771_v15  ;;  %v12435_v51 = vld [vmem:[#allocation18_spill] sm:$0xff]  ;;  %v12437_v21 = vand.u32 4294901760, %v7578_v48  ;;  %v12442_v48 = vand.u32 4294901760, %v7620_v3  ;;  %v12446_v3 = vld [vmem:[#allocation32_spill] sm:$0xff] }
  0xf8   :  { %v12436_v50 = vand.u32 4294901760, %v12435_v51  ;;  %5903 = vmatpush1.bf16.msra.mxu0 %v5902_v10 }
  0xf9   :  { %12429 = vst [vmem:[#allocation96_spill] sm:$0xff] %v8359_v1  ;;  %5971 = vmatpush1.bf16.msra.mxu1 %v5970_v53  ;;  %v5906_v17 = vpack.c.bf16 %v12438_v27, %v12437_v21 }
  0xfa   :  { %v5904_v1 = vpack.c.bf16 %v12436_v50, %v12434_v9  ;;  %1314 = vmatprep.subr.mxu1 %v7839_v29  ;;  %v12447_v9 = vld [vmem:[#allocation33_spill] sm:$0xff]  ;;  %v12460_v50 = vand.u32 4294901760, %v12459_v42 }
  0xfc   :  { %5905 = vmatprep.subr.bf16.mxu0 %v5904_v1  ;;  %v12456_v1 = vand.u32 4294901760, %v7636_v52  ;;  %v12465_v52 = vld [vmem:[#allocation35_spill] sm:$0xff] }
  0xfd   :  { %5907 = vmatpush1.bf16.msra.mxu0 %v5906_v17  ;;  %1317 = vmatpush1.msra.mxu1 %v7873_v63 }
  0xfe   :  { %859 = vmatprep.subr.mxu0 %v12439_v47  ;;  %5973 = vmatprep.subr.bf16.mxu1 %v12440_v12 }
  0xff   :  { %1367 = vmatmul.mubr.f32.vlgmr.msra.gmra.mrb[0].mxu1 %v7417_v43  ;;  %v12444_v43 = vld [vmem:[#allocation29_spill] sm:$0xff] }
 0x100   :  { %5975 = vmatpush1.bf16.msra.mxu1 %v12441_v24  ;;  %1455 = vmatprep.mubr.f32.mxu1 %v12275_v8 }
 0x101   :  { %863 = vmatpush1.msra.mxu0 %v12442_v48  ;;  %5977 = vmatprep.subr.bf16.mxu1 %v12443_v0  ;;  %v12473_v48 = vand.u32 4294901760, %v7672_v57  ;;  %v12484_v57 = vand.u32 4294901760, %v7762_v16  ;;  %v12493_v16 = vld [vmem:[#allocation49_spill] sm:$0xff] }
 0x102   :  { %5909 = vmatprep.subr.bf16.mxu0 %v7380_v18  ;;  %912 = vmatmul.mubr.f32.vlgmr.msra.gmra.mrb[0].mxu0 %v7400_v35  ;;  %v12448_v18 = vld [vmem:[#allocation34_spill] sm:$0xff] }
 0x103   :  { %5911 = vmatpush1.bf16.msra.mxu0 %v7382_v19  ;;  %1000 = vmatprep.mubr.f32.mxu0 %v12275_v8  ;;  %v12449_v19 = vld [vmem:[#allocation37_spill] sm:$0xff] }
 0x104   :  { %5913 = vmatprep.subr.bf16.mxu0 %v7396_v30  ;;  %5979 = vmatpush1.bf16.msra.mxu1 %v12444_v43  ;;  %v12450_v30 = vand.u32 4294901760, %v12373_v23  ;;  %v12457_v23 = vld [vmem:[#allocation21_spill] sm:$0xff] }
 0x105   :  { %5981 = vmatprep.subr.bf16.mxu1 %v12445_v13  ;;  %v12458_v53 = vand.u32 4294901760, %v12457_v23  ;;  %v12486_v23 = vand.u32 4294901760, %v7747_v4  ;;  %v12499_v4 = vand.u32 4294901760, %v7783_v5  ;;  %v12511_v5 = vld [vmem:[#allocation60_spill] sm:$0xff] }
 0x106   :  { %v5988_v10 = vpack.c.bf16 %v12451_v6, %v12450_v30  ;;  %v12474_v6 = vld [vmem:[#allocation39_spill] sm:$0xff] }
 0x107   :  { %5915 = vmatpush1.bf16.msra.mxu0 %v7404_v38  ;;  %v12452_v38 = vand.u32 4294901760, %v7657_v60  ;;  %v8430_v21 = vpack.c.bf16 %v12460_v50, %v12458_v53  ;;  %v12462_v60 = vand.u32 4294901760, %v7693_v46  ;;  %v12471_v46 = vand.u32 4294901760, %v7739_v2  ;;  %v12479_v2 = vld [vmem:[#allocation43_spill] sm:$0xff]  ;;  %v12488_v50 = vld [vmem:[#allocation46_spill] sm:$0xff] }
 0x108   :  { %5917 = vmatprep.subr.bf16.mxu0 %v7437_v58  ;;  %5983 = vmatpush1.bf16.msra.mxu1 %v12446_v3  ;;  %v12453_v58 = vand.u32 4294901760, %v7695_v7  ;;  %v12463_v7 = vand.u32 4294901760, %v7711_v44  ;;  %v12472_v44 = vand.u32 4294901760, %v7684_v56  ;;  %v12487_v53 = vand.u32 4294901760, %v7749_v45 }
 0x109   :  { %5985 = vmatprep.subr.bf16.mxu1 %v12447_v9  ;;  %12461 = vst [vmem:[#allocation16_spill] sm:$0xff] %v8430_v21  ;;  %v12498_v45 = vand.u32 4294901760, %v7771_v15  ;;  %v12510_v15 = vand.u32 4294901760, %v7839_v29  ;;  %v12522_v29 = vld [vmem:[#allocation69_spill] sm:$0xff] }
 0x10a   :  { %v5992_v28 = vpack.c.bf16 %v12453_v58, %v12452_v38  ;;  %v5994_v30 = vpack.c.bf16 %v12473_v48, %v12472_v44  ;;  %v5998_v42 = vpack.c.bf16 %v12487_v53, %v12486_v23  ;;  %v12502_v48 = vld [vmem:[#allocation54_spill] sm:$0xff]  ;;  %v12517_v23 = vld [vmem:[#allocation65_spill] sm:$0xff] }
 0x10b   :  { %5919 = vmatpush1.bf16.msra.mxu0 %v12361_v39  ;;  %v12454_v39 = vld [vmem:[#allocation36_spill] sm:$0xff]  ;;  %v12518_v53 = vand.u32 4294901760, %v12517_v23 }
 0x10c   :  { %5921 = vmatprep.subr.bf16.mxu0 %v12372_v54  ;;  %5987 = vmatpush1.bf16.msra.mxu1 %v12448_v18  ;;  %v12455_v54 = vand.u32 4294901760, %v12380_v22  ;;  %v12466_v22 = vand.u32 4294901760, %v12465_v52 }
 0x10d   :  { %1406 = vmatprep.subr.mxu1 %v12449_v19 }
 0x10e   :  { %v5990_v51 = vpack.c.bf16 %v12456_v1, %v12455_v54  ;;  %v12485_v1 = vand.u32 4294901760, %v7785_v61  ;;  %v12495_v61 = vld [vmem:[#allocation50_spill] sm:$0xff] }
 0x10f   :  { %5923 = vmatpush1.bf16.msra.mxu0 %v12386_v59  ;;  %v8437_v59 = vpack.c.bf16 %v12463_v7, %v12462_v60  ;;  %v12489_v60 = vand.u32 4294901760, %v12488_v50  ;;  %v12490_v7 = vld [vmem:[#allocation48_spill] sm:$0xff] }
 0x110   :  { %951 = vmatprep.subr.mxu0 %v12392_v34  ;;  %1408 = vmatpush1.msra.mxu1 %v12454_v39  ;;  %v12467_v34 = vld [vmem:[#allocation38_spill] sm:$0xff]  ;;  %v12491_v52 = vand.u32 4294901760, %v12490_v7 }
 0x111   :  { %5989 = vmatprep.subr.bf16.mxu1 %v5988_v10  ;;  %1459 = vmatmul.mubr.f32.vlgmr.msra.gmra.mrb[0].mxu1 %v12410_v49  ;;  %12464 = vst [vmem:[#allocation18_spill] sm:$0xff] %v8437_v59  ;;  %v12468_v27 = vand.u32 4294901760, %v12467_v34  ;;  %v12470_v49 = vand.u32 4294901760, %v7715_v55  ;;  %v12475_v10 = vand.u32 4294901760, %v12474_v6  ;;  %v12480_v55 = vand.u32 4294901760, %v12479_v2  ;;  %v12524_v7 = vld [vmem:[#allocation70_spill] sm:$0xff] }
 0x112   :  { %5991 = vmatpush1.bf16.msra.mxu1 %v5990_v51  ;;  %1583 = vmatprep.mubr.f32.mxu1 %v12275_v8  ;;  %v6000_v51 = vpack.c.bf16 %v12485_v1, %v12484_v57  ;;  %v12494_v34 = vand.u32 4294901760, %v12493_v16 }
 0x113   :  { %v8444_v17 = vpack.c.bf16 %v12468_v27, %v12466_v22  ;;  %953 = vmatpush1.msra.mxu0 %v12407_v40  ;;  %5993 = vmatprep.subr.bf16.mxu1 %v5992_v28  ;;  %v5996_v47 = vpack.c.bf16 %v12471_v46, %v12470_v49  ;;  %v12476_v40 = vld [vmem:[#allocation40_spill] sm:$0xff]  ;;  %v12481_v28 = vld [vmem:[#allocation45_spill] sm:$0xff]  ;;  %v8484_v22 = vpack.c.bf16 %v12491_v52, %v12489_v60  ;;  %v12496_v27 = vand.u32 4294901760, %v12495_v61  ;;  %v12529_v61 = vld [vmem:[#allocation75_spill] sm:$0xff] }
 0x114   :  { %1002 = vmatmul.mubr.f32.vlgmr.msra.gmra.mrb[0].mxu0 %v7400_v35  ;;  %6021 = vmatprep.subr.bf16.mxu0 %v8430_v21  ;;  %v12477_v38 = vand.u32 4294901760, %v12476_v40  ;;  %v12482_v56 = vand.u32 4294901760, %v12481_v28  ;;  %v6002_v46 = vpack.c.bf16 %v12499_v4, %v12498_v45  ;;  %v12512_v28 = vand.u32 4294901760, %v12511_v5  ;;  %v12534_v4 = vld [vmem:[#allocation79_spill] sm:$0xff]  ;;  %v12617_v21 = vld [vmem:[#allocation86_spill] sm:$0xff] }
 0x115   :  { %12469 = vst [vmem:[#allocation26_spill] sm:$0xff] %v8444_v17  ;;  %6023 = vmatpush1.bf16.msra.mxu0 %v8437_v59  ;;  %12492 = vst [vmem:[#allocation29_spill] sm:$0xff] %v8484_v22  ;;  %v8491_v49 = vpack.c.bf16 %v12496_v27, %v12494_v34  ;;  %v12525_v52 = vand.u32 4294901760, %v12524_v7  ;;  %v12527_v34 = vld [vmem:[#allocation72_spill] sm:$0xff]  ;;  %v12530_v27 = vand.u32 4294901760, %v12529_v61  ;;  %v12547_v5 = vld [vmem:[#allocation83_spill] sm:$0xff] }
 0x116   :  { %v8462_v58 = vpack.c.bf16 %v12477_v38, %v12475_v10  ;;  %5995 = vmatpush1.bf16.msra.mxu1 %v5994_v30  ;;  %6025 = vmatprep.subr.bf16.mxu0 %v8444_v17  ;;  %v8469_v54 = vpack.c.bf16 %v12482_v56, %v12480_v55  ;;  %v12503_v30 = vand.u32 4294901760, %v12502_v48  ;;  %v12505_v10 = vld [vmem:[#allocation56_spill] sm:$0xff]  ;;  %v12507_v38 = vld [vmem:[#allocation59_spill] sm:$0xff] }
 0x117   :  { %5997 = vmatprep.subr.bf16.mxu1 %v5996_v47  ;;  %12497 = vst [vmem:[#allocation31_spill] sm:$0xff] %v8491_v49  ;;  %v12500_v47 = vld [vmem:[#allocation53_spill] sm:$0xff]  ;;  %v12506_v40 = vand.u32 4294901760, %v12505_v10  ;;  %v12508_v2 = vand.u32 4294901760, %v12507_v38  ;;  %v12513_v56 = vld [vmem:[#allocation64_spill] sm:$0xff]  ;;  %v12544_v38 = vld [vmem:[#allocation11_spill] sm:$0xff] }
 0x118   :  { %12478 = vst [vmem:[#allocation27_spill] sm:$0xff] %v8462_v58  ;;  %12483 = vst [vmem:[#allocation30_spill] sm:$0xff] %v8469_v54  ;;  %v12501_v44 = vand.u32 4294901760, %v12500_v47  ;;  %v12514_v57 = vand.u32 4294901760, %v12513_v56  ;;  %v12549_v56 = vld [vmem:[#allocation85_spill] sm:$0xff] }
 0x119   :  { %6027 = vmatpush1.bf16.msra.mxu0 %v8462_v58  ;;  %v8509_v55 = vpack.c.bf16 %v12508_v2, %v12506_v40  ;;  %v12545_v2 = vand.u32 4294901760, %v12544_v38 }
 0x11a   :  { %5999 = vmatpush1.bf16.msra.mxu1 %v5998_v42  ;;  %6029 = vmatprep.subr.bf16.mxu0 %v8469_v54  ;;  %v8502_v6 = vpack.c.bf16 %v12503_v30, %v12501_v44  ;;  %v8518_v1 = vpack.c.bf16 %v12514_v57, %v12512_v28  ;;  %v12519_v42 = vld [vmem:[#allocation66_spill] sm:$0xff]  ;;  %v12537_v44 = vld [vmem:[#allocation80_spill] sm:$0xff]  ;;  %v12539_v30 = vld [vmem:[#allocation81_spill] sm:$0xff]  ;;  %v12548_v28 = vand.u32 4294901760, %v12547_v5  ;;  %v12550_v57 = vand.u32 4294901760, %v12549_v56 }
 0x11b   :  { %6001 = vmatprep.subr.bf16.mxu1 %v6000_v51  ;;  %12509 = vst [vmem:[#allocation33_spill] sm:$0xff] %v8509_v55  ;;  %v12516_v51 = vand.u32 4294901760, %v7873_v63  ;;  %v12520_v50 = vand.u32 4294901760, %v12519_v42  ;;  %v12523_v63 = vand.u32 4294901760, %v12522_v29  ;;  %v12538_v48 = vand.u32 4294901760, %v12537_v44  ;;  %v1741_v56 = vld [vmem:[%s11734_s2 + $0x1b0] sm:$0xff] }
 0x11c   :  { %12504 = vst [vmem:[#allocation32_spill] sm:$0xff] %v8502_v6  ;;  %12515 = vst [vmem:[#allocation34_spill] sm:$0xff] %v8518_v1  ;;  %v12540_v10 = vand.u32 4294901760, %v12539_v30  ;;  %v12556_v42 = vand.u32 4294901760, %v8221_v32  ;;  %v12562_v32 = vand.u32 4294901760, %v8280_v26  ;;  %v1734_v26 = vld [vmem:[%s11734_s2 + $0x178] sm:$0xff] }
 0x11d   :  { %6031 = vmatpush1.bf16.msra.mxu0 %v8484_v22  ;;  %v8527_v60 = vpack.c.bf16 %v12520_v50, %v12518_v53  ;;  %v8539_v16 = vpack.c.bf16 %v12525_v52, %v12523_v63  ;;  %v12557_v50 = vand.u32 4294901760, %v8226_v31  ;;  %v12563_v31 = vand.u32 4294901760, %v8285_v11  ;;  %v1737_v30 = vld [vmem:[%s11734_s2 + $0x190] sm:$0xff] }
 0x11e   :  { %6003 = vmatpush1.bf16.msra.mxu1 %v6002_v46  ;;  %6033 = vmatprep.subr.bf16.mxu0 %v8491_v49  ;;  %v12535_v46 = vand.u32 4294901760, %v12534_v4  ;;  %v8562_v40 = vpack.c.bf16 %v12540_v10, %v12538_v48  ;;  %v1838_v11 = vand.u32 4294901760, %v1734_v26  ;;  %v1735_v4 = vld [vmem:[%s11734_s2 + $0x180] sm:$0xff]  ;;  %v1848_v38 = vand.u32 4294901760, %v1737_v30 }
 0x11f   :  { %1532 = vmatprep.subr.mxu1 %v12510_v15  ;;  %12521 = vst [vmem:[#allocation37_spill] sm:$0xff] %v8527_v60  ;;  %12526 = vst [vmem:[#allocation36_spill] sm:$0xff] %v8539_v16  ;;  %v8594_v29 = vpack.c.bf16 %v12557_v50, %v12556_v42  ;;  %v8610_v63 = vpack.c.bf16 %v12563_v31, %v12562_v32  ;;  %v1844_v10 = vand.u32 4294901760, %v1735_v4 }
 0x120   :  { %12541 = vst [vmem:[#allocation35_spill] sm:$0xff] %v8562_v40  ;;  %v8681_v50 = vsub.f32 %v1737_v30, %v1848_v38 }
 0x121   :  { %6035 = vmatpush1.bf16.msra.mxu0 %v8502_v6  ;;  %12558 = vst [vmem:[#allocation43_spill] sm:$0xff] %v8594_v29  ;;  %12564 = vst [vmem:[#allocation46_spill] sm:$0xff] %v8610_v63  ;;  %v8679_v42 = vpack.c.bf16 %v1848_v38, %v1844_v10 }
 0x122   :  { %1536 = vmatpush1.msra.mxu1 %v12516_v51  ;;  %6037 = vmatprep.subr.bf16.mxu0 %v8509_v55  ;;  %v8578_v51 = vpack.c.bf16 %v12550_v57, %v12548_v28  ;;  %v1739_v28 = vld [vmem:[%s11734_s2 + $0x1a0] sm:$0xff]  ;;  %12575 = vst [vmem:[#allocation65_spill] sm:$0xff] %v8681_v50 }
 0x123   :  { %6005 = vmatprep.subr.bf16.mxu1 %v12440_v12  ;;  %1585 = vmatmul.mubr.f32.vlgmr.msra.gmra.mrb[0].mxu1 %v7400_v35  ;;  %v12528_v12 = vand.u32 4294901760, %v12527_v34  ;;  %12574 = vst [vmem:[#allocation64_spill] sm:$0xff] %v8679_v42  ;;  %v1852_v31 = vand.u32 4294901760, %v1739_v28 }
 0x124   :  { %6007 = vmatpush1.bf16.msra.mxu1 %v12441_v24  ;;  %1673 = vmatprep.mubr.f32.mxu1 %v12275_v8  ;;  %v12532_v24 = vld [vmem:[#allocation76_spill] sm:$0xff]  ;;  %12551 = vst [vmem:[#allocation39_spill] sm:$0xff] %v8578_v51 }
 0x125   :  { %6009 = vmatprep.subr.bf16.mxu1 %v12443_v0  ;;  %6039 = vmatpush1.bf16.msra.mxu0 %v8518_v1  ;;  %v8546_v45 = vpack.c.bf16 %v12530_v27, %v12528_v12  ;;  %v12533_v0 = vand.u32 4294901760, %v12532_v24  ;;  %v8637_v12 = vsub.f32 %v1734_v26, %v1838_v11  ;;  %v1736_v24 = vld [vmem:[%s11734_s2 + $0x188] sm:$0xff] }
 0x126   :  { %6041 = vmatprep.subr.bf16.mxu0 %v8527_v60  ;;  %v1842_v44 = vand.u32 4294901760, %v1736_v24 }
 0x127   :  { %12531 = vst [vmem:[#allocation21_spill] sm:$0xff] %v8546_v45  ;;  %v8555_v47 = vpack.c.bf16 %v12535_v46, %v12533_v0  ;;  %v1738_v0 = vld [vmem:[%s11734_s2 + $0x198] sm:$0xff] }
 0x128   :  { %6011 = vmatpush1.bf16.msra.mxu1 %v12444_v43  ;;  %v12542_v43 = vld [vmem:[#allocation82_spill] sm:$0xff]  ;;  %v1846_v48 = vand.u32 4294901760, %v1738_v0 }
 0x129   :  { %6013 = vmatprep.subr.bf16.mxu1 %v12445_v13  ;;  %6043 = vmatpush1.bf16.msra.mxu0 %v8539_v16  ;;  %12536 = vst [vmem:[#allocation22_spill] sm:$0xff] %v8555_v47  ;;  %v12543_v13 = vand.u32 4294901760, %v12542_v43  ;;  %v1740_v43 = vld [vmem:[%s11734_s2 + $0x1a8] sm:$0xff] }
 0x12a   :  { %6045 = vmatprep.subr.bf16.mxu0 %v8546_v45  ;;  %v8671_v57 = vpack.c.bf16 %v1846_v48, %v1842_v44 }
 0x12b   :  { %v8571_v15 = vpack.c.bf16 %v12545_v2, %v12543_v13  ;;  %v1742_v13 = vld [vmem:[%s11734_s2 + $0x1b8] sm:$0xff]  ;;  %v1850_v2 = vand.u32 4294901760, %v1740_v43 }
 0x12c   :  { %6015 = vmatpush1.bf16.msra.mxu1 %v12446_v3  ;;  %v12552_v3 = vand.u32 4294901760, %v8198_v14  ;;  %v12560_v14 = vand.u32 4294901760, %v8265_v36  ;;  %v1854_v5 = vand.u32 4294901760, %v1742_v13  ;;  %12571 = vst [vmem:[#allocation56_spill] sm:$0xff] %v8671_v57 }
 0x12d   :  { %6017 = vmatprep.subr.bf16.mxu1 %v12447_v9  ;;  %6047 = vmatpush1.bf16.msra.mxu0 %v8555_v47  ;;  %12546 = vst [vmem:[#allocation38_spill] sm:$0xff] %v8571_v15  ;;  %v12553_v9 = vld [vmem:[#allocation87_spill] sm:$0xff] }
 0x12e   :  { %6049 = vmatprep.subr.bf16.mxu0 %v8562_v40  ;;  %v12554_v23 = vand.u32 4294901760, %v12553_v9  ;;  %v8675_v9 = vsub.f32 %v1738_v0, %v1846_v48  ;;  %v8688_v32 = vsub.f32 %v1742_v13, %v1854_v5 }
 0x130   :  { %6019 = vmatpush1.bf16.msra.mxu1 %v12448_v18  ;;  %v8587_v53 = vpack.c.bf16 %v12554_v23, %v12552_v3  ;;  %v12559_v18 = vand.u32 4294901760, %v8247_v33  ;;  %v8673_v3 = vsub.f32 %v1736_v24, %v1842_v44  ;;  %12572 = vst [vmem:[#allocation59_spill] sm:$0xff] %v8675_v9  ;;  %v8677_v23 = vsub.f32 %v1735_v4, %v1844_v10  ;;  %v12583_v24 = vld [vmem:[#allocation44_spill] sm:$0xff] }
 0x131   :  { %1624 = vmatprep.subr.mxu1 %v12449_v19  ;;  %6051 = vmatpush1.bf16.msra.mxu0 %v8571_v15  ;;  %12578 = vst [vmem:[#allocation70_spill] sm:$0xff] %v8688_v32  ;;  %v11889_v0 = vand.u32 4294901760, %v12583_v24  ;;  %v8699_v44 = vsub.f32 %v1739_v28, %v1852_v31 }
 0x132   :  { %12555 = vst [vmem:[#allocation40_spill] sm:$0xff] %v8587_v53  ;;  %6053 = vmatprep.subr.bf16.mxu0 %v8578_v51  ;;  %v8602_v19 = vpack.c.bf16 %v12560_v14, %v12559_v18  ;;  %12573 = vst [vmem:[#allocation60_spill] sm:$0xff] %v8677_v23  ;;  %v8683_v18 = vpack.c.bf16 %v1854_v5, %v1850_v2  ;;  %v8685_v14 = vsub.f32 %v1740_v43, %v1850_v2  ;;  %v12587_v5 = vld [vmem:[#allocation47_spill] sm:$0xff] }
 0x133   :  { %12585 = vst [vmem:[#allocation75_spill] sm:$0xff] %v8699_v44  ;;  %v1910_v38 = vsub.f32 %v12583_v24, %v11889_v0  ;;  %v11902_v28 = vand.u32 4294901760, %v12587_v5  ;;  %v12602_v51 = vld [vmem:[#allocation71_spill] sm:$0xff] }
 0x134   :  { %1626 = vmatpush1.msra.mxu1 %v12454_v39  ;;  %12561 = vst [vmem:[#allocation45_spill] sm:$0xff] %v8602_v19  ;;  %v12565_v39 = vand.u32 4294901760, %v8290_v62  ;;  %v1733_v62 = vld [vmem:[%s11734_s2 + $0x170] sm:$0xff]  ;;  %12576 = vst [vmem:[#allocation66_spill] sm:$0xff] %v8683_v18  ;;  %v11937_v15 = vand.u32 4294901760, %v12602_v51 }
 0x135   :  { %6055 = vmatpush1.bf16.msra.mxu0 %v8587_v53  ;;  %1675 = vmatmul.mubr.f32.vlgmr.msra.gmra.mrb[0].mxu1 %v7400_v35  ;;  %v1732_v35 = vld [vmem:[%s11734_s2 + $0x168] sm:$0xff]  ;;  %v1840_v7 = vand.u32 4294901760, %v1733_v62  ;;  %12577 = vst [vmem:[#allocation69_spill] sm:$0xff] %v8685_v14 }
 0x136   :  { %6057 = vmatprep.subr.bf16.mxu0 %v8594_v29  ;;  %v8617_v33 = vpack.c.bf16 %v1832_v20, %v12565_v39  ;;  %v1834_v36 = vand.u32 4294901760, %v1732_v35  ;;  %v1836_v20 = vand.u32 4294901760, %v1731_v37  ;;  %v1856_v39 = vand.u32 4294901760, %v1741_v56 }
 0x137   :  { %v8653_v46 = vsub.f32 %v1733_v62, %v1840_v7 }
 0x138   :  { %12566 = vst [vmem:[#allocation48_spill] sm:$0xff] %v8617_v33  ;;  %v8633_v52 = vpack.c.bf16 %v1838_v11, %v1834_v36  ;;  %v8635_v34 = vsub.f32 %v1732_v35, %v1834_v36  ;;  %v8639_v61 = vpack.c.bf16 %v1840_v7, %v1836_v20  ;;  %v8641_v27 = vsub.f32 %v1731_v37, %v1836_v20  ;;  %v12579_v35 = vld [vmem:[#allocation24_spill] sm:$0xff]  ;;  %v12580_v36 = vld [vmem:[#allocation25_spill] sm:$0xff]  ;;  %v12582_v20 = vld [vmem:[#allocation42_spill] sm:$0xff] }
 0x139   :  { %6059 = vmatpush1.bf16.msra.mxu0 %v8602_v19  ;;  %12570 = vst [vmem:[#allocation54_spill] sm:$0xff] %v8653_v46  ;;  %v11882_v26 = vand.u32 4294901760, %v12579_v35  ;;  %v11883_v11 = vand.u32 4294901760, %v12580_v36  ;;  %v12581_v37 = vld [vmem:[#allocation41_spill] sm:$0xff]  ;;  %v11888_v7 = vand.u32 4294901760, %v12582_v20  ;;  %v8697_v4 = vpack.c.bf16 %v1856_v39, %v1852_v31  ;;  %v12598_v19 = vld [vmem:[#allocation63_spill] sm:$0xff] }
 0x13a   :  { %6061 = vmatprep.subr.bf16.mxu0 %v8610_v63  ;;  %12567 = vst [vmem:[#allocation49_spill] sm:$0xff] %v8633_v52  ;;  %12568 = vst [vmem:[#allocation50_spill] sm:$0xff] %v8639_v61  ;;  %v11885_v62 = vand.u32 4294901760, %v12581_v37  ;;  %v8701_v48 = vsub.f32 %v1741_v56, %v1856_v39  ;;  %v12588_v56 = vld [vmem:[#allocation51_spill] sm:$0xff]  ;;  %v12589_v39 = vld [vmem:[#allocation52_spill] sm:$0xff] }
 0x13b   :  { %12569 = vst [vmem:[#allocation53_spill] sm:$0xff] %v8641_v27  ;;  %12584 = vst [vmem:[#allocation72_spill] sm:$0xff] %v8697_v4  ;;  %v1886_v30 = vsub.f32 %v12579_v35, %v11882_v26  ;;  %v1898_v10 = vsub.f32 %v12580_v36, %v11883_v11  ;;  %v1904_v13 = vsub.f32 %v12582_v20, %v11888_v7  ;;  %v11903_v31 = vand.u32 4294901760, %v12588_v56 }
 0x13c   :  { %12586 = vst [vmem:[#allocation76_spill] sm:$0xff] %v8701_v48  ;;  %v1892_v43 = vsub.f32 %v12581_v37, %v11885_v62  ;;  %v11904_v26 = vand.u32 4294901760, %v12589_v39  ;;  %v1922_v7 = vsub.f32 %v12587_v5, %v11902_v28 }
 0x13d   :  { %6063 = vmatpush1.bf16.msra.mxu0 %v8617_v33  ;;  %v1887_v2 = vand.u32 4294901760, %v1886_v30  ;;  %v1899_v11 = vand.u32 4294901760, %v1898_v10  ;;  %v1905_v62 = vand.u32 4294901760, %v1904_v13  ;;  %v1916_v30 = vsub.f32 %v12588_v56, %v11903_v31  ;;  %v12592_v10 = vld [vmem:[#allocation57_spill] sm:$0xff]  ;;  %v12593_v13 = vld [vmem:[#allocation58_spill] sm:$0xff] }
 0x13e   :  { %6065 = vmatprep.subr.bf16.mxu0 %v8633_v52  ;;  %v1893_v8 = vand.u32 4294901760, %v1892_v43  ;;  %v1928_v0 = vsub.f32 %v12589_v39, %v11904_v26  ;;  %v11912_v43 = vand.u32 4294901760, %v12592_v10  ;;  %v1923_v52 = vand.u32 4294901760, %v1922_v7 }
 0x13f   :  { %v1917_v33 = vand.u32 4294901760, %v1916_v30 }
 0x140   :  { %v1929_v28 = vand.u32 4294901760, %v1928_v0  ;;  %v1946_v26 = vsub.f32 %v12592_v10, %v11912_v43 }
 0x141   :  { %6067 = vmatpush1.bf16.msra.mxu0 %v8639_v61  ;;  %v6076_v61 = vpack.c.bf16 %v1899_v11, %v1887_v2  ;;  %v12594_v11 = vld [vmem:[#allocation61_spill] sm:$0xff]  ;;  %v12595_v2 = vld [vmem:[#allocation62_spill] sm:$0xff] }
 0x142   :  { %6069 = vmatprep.subr.bf16.mxu0 %v8671_v57  ;;  %v11923_v63 = vand.u32 4294901760, %v12595_v2  ;;  %v8749_v0 = vpack.c.bf16 %v1929_v28, %v1917_v33  ;;  %v12600_v28 = vld [vmem:[#allocation68_spill] sm:$0xff] }
 0x144   :  { %12597 = vst [vmem:[#allocation81_spill] sm:$0xff] %v8749_v0 }
 0x145   :  { %6071 = vmatpush1.bf16.msra.mxu0 %v8679_v42  ;;  %v12590_v42 = vld [vmem:[#allocation55_spill] sm:$0xff] }
 0x146   :  { %6073 = vmatprep.subr.bf16.mxu0 %v8683_v18  ;;  %v1911_v18 = vand.u32 4294901760, %v1910_v38  ;;  %v11909_v57 = vand.u32 4294901760, %v12590_v42  ;;  %v11913_v38 = vand.u32 4294901760, %v12593_v13 }
 0x148   :  { %v1934_v31 = vsub.f32 %v12590_v42, %v11909_v57  ;;  %v8747_v7 = vpack.c.bf16 %v1923_v52, %v1911_v18  ;;  %v11924_v57 = vand.u32 4294901760, %v12598_v19  ;;  %v12599_v18 = vld [vmem:[#allocation67_spill] sm:$0xff] }
 0x149   :  { %6075 = vmatpush1.bf16.msra.mxu0 %v8697_v4  ;;  %v8732_v4 = vpack.c.bf16 %v1905_v62, %v1893_v8  ;;  %v1940_v8 = vsub.f32 %v12593_v13, %v11913_v38  ;;  %v11922_v62 = vand.u32 4294901760, %v12594_v11  ;;  %v1958_v38 = vsub.f32 %v12595_v2, %v11923_v63 }
 0x14a   :  { %6077 = vmatprep.subr.bf16.mxu0 %v6076_v61  ;;  %12596 = vst [vmem:[#allocation80_spill] sm:$0xff] %v8747_v7  ;;  %v1935_v30 = vand.u32 4294901760, %v1934_v31  ;;  %v1947_v61 = vand.u32 4294901760, %v1946_v26  ;;  %v1970_v52 = vsub.f32 %v12598_v19, %v11924_v57  ;;  %v11933_v33 = vand.u32 4294901760, %v12599_v18  ;;  %v12603_v57 = vld [vmem:[#allocation73_spill] sm:$0xff] }
 0x14b   :  { %12591 = vst [vmem:[#allocation79_spill] sm:$0xff] %v8732_v4  ;;  %v1941_v29 = vand.u32 4294901760, %v1940_v8  ;;  %v1952_v43 = vsub.f32 %v12594_v11, %v11922_v62  ;;  %v11934_v31 = vand.u32 4294901760, %v12600_v28  ;;  %v1959_v8 = vand.u32 4294901760, %v1958_v38  ;;  %v12605_v38 = vld [vmem:[#allocation74_spill] sm:$0xff]  ;;  %v12629_v4 = vld [vmem:[#allocation12_spill] sm:$0xff] }
 0x14c   :  { %v8763_v53 = vpack.c.bf16 %v1947_v61, %v1935_v30  ;;  %v1971_v40 = vand.u32 4294901760, %v1970_v52  ;;  %v1964_v62 = vsub.f32 %v12599_v18, %v11933_v33  ;;  %v11946_v47 = vand.u32 4294901760, %v12603_v57  ;;  %v12606_v61 = vld [vmem:[#allocation14_spill] sm:$0xff] }
 0x14d   :  { %v1953_v26 = vand.u32 4294901760, %v1952_v43  ;;  %v1976_v63 = vsub.f32 %v12600_v28, %v11934_v31  ;;  %v1982_v43 = vsub.f32 %v12602_v51, %v11937_v15  ;;  %v11947_v30 = vand.u32 4294901760, %v12605_v38  ;;  %v12608_v15 = vld [vmem:[#allocation77_spill] sm:$0xff] }
 0x14e   :  { %12601 = vst [vmem:[#allocation82_spill] sm:$0xff] %v8763_v53  ;;  %v11953_v52 = vand.u32 4294901760, %v12606_v61  ;;  %v8780_v16 = vpack.c.bf16 %v1971_v40, %v1959_v8  ;;  %v1965_v60 = vand.u32 4294901760, %v1964_v62  ;;  %v1994_v31 = vsub.f32 %v12603_v57, %v11946_v47  ;;  %v12610_v62 = vld [vmem:[#allocation78_spill] sm:$0xff]  ;;  %v12611_v8 = vld [vmem:[#allocation17_spill] sm:$0xff] }
 0x14f   :  { %v8773_v45 = vpack.c.bf16 %v1953_v26, %v1941_v29  ;;  %v1977_v33 = vand.u32 4294901760, %v1976_v63  ;;  %v1983_v1 = vand.u32 4294901760, %v1982_v43  ;;  %v1988_v29 = vsub.f32 %v12605_v38, %v11947_v30  ;;  %v12612_v30 = vld [vmem:[#allocation13_spill] sm:$0xff] }
 0x150   :  { %12607 = vst [vmem:[#allocation83_spill] sm:$0xff] %v8780_v16  ;;  %v2000_v26 = vsub.f32 %v12606_v61, %v11953_v52  ;;  %v11952_v55 = vand.u32 4294901760, %v12608_v15  ;;  %v1995_v40 = vand.u32 4294901760, %v1994_v31  ;;  %v11960_v63 = vand.u32 4294901760, %v12610_v62 }
 0x151   :  { %12604 = vst [vmem:[#allocation11_spill] sm:$0xff] %v8773_v45  ;;  %v8792_v6 = vpack.c.bf16 %v1977_v33, %v1965_v60  ;;  %v11961_v49 = vand.u32 4294901760, %v12611_v8  ;;  %v1989_v22 = vand.u32 4294901760, %v1988_v29  ;;  %v11962_v54 = vand.u32 4294901760, %v12612_v30  ;;  %v12623_v45 = vld [vmem:[#allocation90_spill] sm:$0xff] }
 0x152   :  { %v2001_v47 = vand.u32 4294901760, %v2000_v26  ;;  %v2006_v43 = vsub.f32 %v12608_v15, %v11952_v55  ;;  %v8800_v58 = vpack.c.bf16 %v1995_v40, %v1983_v1  ;;  %v2018_v60 = vsub.f32 %v12610_v62, %v11960_v63  ;;  %v12615_v55 = vld [vmem:[#allocation84_spill] sm:$0xff]  ;;  %v12616_v40 = vld [vmem:[#allocation19_spill] sm:$0xff]  ;;  %v12661_v15 = vld [vmem:[#allocation81_spill] sm:$0xff] }
 0x153   :  { %12609 = vst [vmem:[#allocation85_spill] sm:$0xff] %v8792_v6  ;;  %v2012_v33 = vsub.f32 %v12611_v8, %v11961_v49  ;;  %v2024_v26 = vsub.f32 %v12612_v30, %v11962_v54  ;;  %v11963_v52 = vand.u32 4294901760, %v12615_v55  ;;  %v11964_v59 = vand.u32 4294901760, %v12616_v40 }
 0x154   :  { %12613 = vst [vmem:[#allocation87_spill] sm:$0xff] %v8800_v58  ;;  %v8808_v31 = vpack.c.bf16 %v2001_v47, %v1989_v22  ;;  %v2007_v29 = vand.u32 4294901760, %v2006_v43  ;;  %v2019_v17 = vand.u32 4294901760, %v2018_v60  ;;  %v11965_v58 = vand.u32 4294901760, %v12617_v21  ;;  %v12618_v22 = vld [vmem:[#allocation20_spill] sm:$0xff] }
 0x155   :  { %v2013_v1 = vand.u32 4294901760, %v2012_v33  ;;  %v2025_v63 = vand.u32 4294901760, %v2024_v26  ;;  %v2030_v49 = vsub.f32 %v12615_v55, %v11963_v52  ;;  %v11966_v47 = vand.u32 4294901760, %v12618_v22  ;;  %v12621_v52 = vld [vmem:[#allocation88_spill] sm:$0xff] }
 0x156   :  { %12614 = vst [vmem:[#allocation24_spill] sm:$0xff] %v8808_v31  ;;  %v8820_v43 = vpack.c.bf16 %v2019_v17, %v2007_v29  ;;  %v2042_v54 = vsub.f32 %v12616_v40, %v11964_v59  ;;  %v2036_v60 = vsub.f32 %v12617_v21, %v11965_v58  ;;  %v11967_v6 = vand.u32 4294901760, %v12621_v52  ;;  %v12622_v29 = vld [vmem:[#allocation89_spill] sm:$0xff] }
 0x157   :  { %v8828_v33 = vpack.c.bf16 %v2025_v63, %v2013_v1  ;;  %v2031_v31 = vand.u32 4294901760, %v2030_v49  ;;  %v2048_v26 = vsub.f32 %v12618_v22, %v11966_v47  ;;  %v11970_v53 = vand.u32 4294901760, %v12623_v45  ;;  %v12624_v63 = vld [vmem:[#allocation91_spill] sm:$0xff] }
 0x158   :  { %12619 = vst [vmem:[#allocation25_spill] sm:$0xff] %v8820_v43  ;;  %v2043_v16 = vand.u32 4294901760, %v2042_v54  ;;  %v2037_v17 = vand.u32 4294901760, %v2036_v60  ;;  %v11969_v43 = vand.u32 4294901760, %v12622_v29  ;;  %v2054_v58 = vsub.f32 %v12621_v52, %v11967_v6  ;;  %v12627_v6 = vld [vmem:[#allocation92_spill] sm:$0xff] }
 0x159   :  { %12620 = vst [vmem:[#allocation41_spill] sm:$0xff] %v8828_v33  ;;  %v2049_v59 = vand.u32 4294901760, %v2048_v26  ;;  %v11971_v1 = vand.u32 4294901760, %v12624_v63  ;;  %v2060_v54 = vsub.f32 %v12623_v45, %v11970_v53  ;;  %v11972_v0 = vand.u32 4294901760, %v12627_v6 }
 0x15a   :  { %v8840_v49 = vpack.c.bf16 %v2043_v16, %v2031_v31  ;;  %v2066_v47 = vsub.f32 %v12622_v29, %v11969_v43  ;;  %v2055_v33 = vand.u32 4294901760, %v2054_v58  ;;  %v12628_v31 = vld [vmem:[#allocation23_spill] sm:$0xff]  ;;  %v11977_v52 = vand.u32 4294901760, %v12629_v4 }
 0x15b   :  { %v8848_v60 = vpack.c.bf16 %v2049_v59, %v2037_v17  ;;  %v2072_v26 = vsub.f32 %v12624_v63, %v11971_v1  ;;  %v2061_v16 = vand.u32 4294901760, %v2060_v54  ;;  %v2078_v53 = vsub.f32 %v12627_v6, %v11972_v0  ;;  %v12630_v59 = vld [vmem:[#allocation93_spill] sm:$0xff]  ;;  %v12633_v0 = vld [vmem:[#allocation28_spill] sm:$0xff] }
 0x15c   :  { %12625 = vst [vmem:[#allocation42_spill] sm:$0xff] %v8840_v49  ;;  %v2067_v7 = vand.u32 4294901760, %v2066_v47  ;;  %v11976_v49 = vand.u32 4294901760, %v12628_v31  ;;  %v11978_v17 = vand.u32 4294901760, %v12630_v59  ;;  %v2084_v47 = vsub.f32 %v12629_v4, %v11977_v52  ;;  %v12640_v4 = vld [vmem:[#allocation97_spill] sm:$0xff] }
 0x15d   :  { %12626 = vst [vmem:[#allocation44_spill] sm:$0xff] %v8848_v60  ;;  %v2073_v43 = vand.u32 4294901760, %v2072_v26  ;;  %v2079_v60 = vand.u32 4294901760, %v2078_v53  ;;  %v11979_v6 = vand.u32 4294901760, %v12633_v0  ;;  %v11985_v45 = vand.u32 4294901760, %v8332_v25 }
 0x15e   :  { %v8860_v58 = vpack.c.bf16 %v2067_v7, %v2055_v33  ;;  %v2090_v1 = vsub.f32 %v12628_v31, %v11976_v49  ;;  %v2096_v26 = vsub.f32 %v12630_v59, %v11978_v17  ;;  %v2085_v7 = vand.u32 4294901760, %v2084_v47  ;;  %v12634_v33 = vld [vmem:[#allocation94_spill] sm:$0xff] }
 0x15f   :  { %v8868_v54 = vpack.c.bf16 %v2073_v43, %v2061_v16  ;;  %v2102_v52 = vsub.f32 %v12633_v0, %v11979_v6  ;;  %v12635_v43 = vld [vmem:[#allocation15_spill] sm:$0xff]  ;;  %v11989_v31 = vand.u32 4294901760, %v12640_v4 }
 0x160   :  { %12631 = vst [vmem:[#allocation47_spill] sm:$0xff] %v8860_v58  ;;  %v2091_v63 = vand.u32 4294901760, %v2090_v1  ;;  %v11984_v58 = vand.u32 4294901760, %v12634_v33  ;;  %v2097_v49 = vand.u32 4294901760, %v2096_v26  ;;  %v11986_v16 = vand.u32 4294901760, %v12635_v43  ;;  %v12638_v6 = vld [vmem:[#allocation95_spill] sm:$0xff] }
 0x161   :  { %12632 = vst [vmem:[#allocation51_spill] sm:$0xff] %v8868_v54  ;;  %v2108_v1 = vsub.f32 %v8332_v25, %v11985_v45  ;;  %v2103_v54 = vand.u32 4294901760, %v2102_v52  ;;  %v11987_v0 = vand.u32 4294901760, %v12638_v6 }
 0x162   :  { %v8880_v53 = vpack.c.bf16 %v2091_v63, %v2079_v60  ;;  %v2114_v17 = vsub.f32 %v12634_v33, %v11984_v58  ;;  %v8888_v47 = vpack.c.bf16 %v2097_v49, %v2085_v7  ;;  %v2120_v26 = vsub.f32 %v12635_v43, %v11986_v16  ;;  %v12639_v60 = vld [vmem:[#allocation96_spill] sm:$0xff] }
 0x163   :  { %v2109_v63 = vand.u32 4294901760, %v2108_v1  ;;  %v2126_v45 = vsub.f32 %v12638_v6, %v11987_v0  ;;  %v11990_v49 = vand.u32 4294901760, %v8369_v41  ;;  %v11991_v0 = vand.u32 4294901760, %v8635_v34 }
 0x164   :  { %12636 = vst [vmem:[#allocation52_spill] sm:$0xff] %v8880_v53  ;;  %12637 = vst [vmem:[#allocation55_spill] sm:$0xff] %v8888_v47  ;;  %v2115_v59 = vand.u32 4294901760, %v2114_v17  ;;  %v11988_v53 = vand.u32 4294901760, %v12639_v60  ;;  %v2121_v58 = vand.u32 4294901760, %v2120_v26  ;;  %v2132_v17 = vsub.f32 %v12640_v4, %v11989_v31 }
 0x165   :  { %v2127_v16 = vand.u32 4294901760, %v2126_v45  ;;  %v2144_v26 = vsub.f32 %v8369_v41, %v11990_v49  ;;  %v2150_v31 = vsub.f32 %v8635_v34, %v11991_v0  ;;  %v11995_v0 = vand.u32 4294901760, %v8673_v3 }
 0x166   :  { %v8900_v52 = vpack.c.bf16 %v2115_v59, %v2103_v54  ;;  %v2138_v7 = vsub.f32 %v12639_v60, %v11988_v53  ;;  %v8908_v1 = vpack.c.bf16 %v2121_v58, %v2109_v63  ;;  %v2133_v59 = vand.u32 4294901760, %v2132_v17 }
 0x167   :  { %v11992_v54 = vand.u32 4294901760, %v8637_v12  ;;  %v2145_v53 = vand.u32 4294901760, %v2144_v26  ;;  %v11994_v58 = vand.u32 4294901760, %v8653_v46  ;;  %v2151_v49 = vand.u32 4294901760, %v2150_v31 }
 0x168   :  { %12641 = vst [vmem:[#allocation57_spill] sm:$0xff] %v8900_v52  ;;  %12642 = vst [vmem:[#allocation58_spill] sm:$0xff] %v8908_v1  ;;  %v2139_v47 = vand.u32 4294901760, %v2138_v7  ;;  %v11993_v52 = vand.u32 4294901760, %v8641_v27 }
 0x169   :  { %v2162_v63 = vsub.f32 %v8637_v12, %v11992_v54  ;;  %v8928_v17 = vpack.c.bf16 %v2145_v53, %v2133_v59  ;;  %v2168_v26 = vsub.f32 %v8653_v46, %v11994_v58  ;;  %v11998_v53 = vand.u32 4294901760, %v8681_v50 }
 0x16a   :  { %v8920_v45 = vpack.c.bf16 %v2139_v47, %v2127_v16  ;;  %v2156_v7 = vsub.f32 %v8641_v27, %v11993_v52  ;;  %v11996_v47 = vand.u32 4294901760, %v8675_v9  ;;  %v2174_v52 = vsub.f32 %v8673_v3, %v11995_v0 }
 0x16b   :  { %12644 = vst [vmem:[#allocation62_spill] sm:$0xff] %v8928_v17  ;;  %v2163_v1 = vand.u32 4294901760, %v2162_v63  ;;  %v2169_v54 = vand.u32 4294901760, %v2168_v26  ;;  %v2192_v26 = vsub.f32 %v8681_v50, %v11998_v53  ;;  %v11999_v0 = vand.u32 4294901760, %v8685_v14 }
 0x16c   :  { %12643 = vst [vmem:[#allocation61_spill] sm:$0xff] %v8920_v45  ;;  %v2157_v16 = vand.u32 4294901760, %v2156_v7  ;;  %v11997_v45 = vand.u32 4294901760, %v8677_v23  ;;  %v2186_v59 = vsub.f32 %v8675_v9, %v11996_v47  ;;  %v2175_v58 = vand.u32 4294901760, %v2174_v52 }
 0x16d   :  { %v8940_v31 = vpack.c.bf16 %v2163_v1, %v2151_v49  ;;  %v12002_v1 = vand.u32 4294901760, %v8688_v32  ;;  %v2193_v47 = vand.u32 4294901760, %v2192_v26 }
 0x16e   :  { %v2180_v63 = vsub.f32 %v8677_v23, %v11997_v45  ;;  %v8948_v7 = vpack.c.bf16 %v2169_v54, %v2157_v16  ;;  %v2187_v17 = vand.u32 4294901760, %v2186_v59  ;;  %v2198_v45 = vsub.f32 %v8685_v14, %v11999_v0  ;;  %v12663_v23 = vld [vmem:[#allocation11_spill] sm:$0xff] }
 0x16f   :  { %12645 = vst [vmem:[#allocation63_spill] sm:$0xff] %v8940_v31  ;;  %v12004_v31 = vand.u32 4294901760, %v8699_v44  ;;  %v12003_v54 = vand.u32 4294901760, %v8701_v48  ;;  %v2210_v16 = vsub.f32 %v8688_v32, %v12002_v1  ;;  %v12653_v1 = vld [vmem:[#allocation12_spill] sm:$0xff]  ;;  %v12662_v32 = vld [vmem:[#allocation82_spill] sm:$0xff] }
 0x170   :  { %12646 = vst [vmem:[#allocation67_spill] sm:$0xff] %v8948_v7  ;;  %v2181_v49 = vand.u32 4294901760, %v2180_v63  ;;  %v8960_v52 = vpack.c.bf16 %v2187_v17, %v2175_v58  ;;  %v2199_v53 = vand.u32 4294901760, %v2198_v45 }
 0x171   :  { %v2204_v59 = vsub.f32 %v8699_v44, %v12004_v31  ;;  %v2216_v26 = vsub.f32 %v8701_v48, %v12003_v54  ;;  %v2211_v0 = vand.u32 4294901760, %v2210_v16  ;;  %v12659_v48 = vld [vmem:[#allocation79_spill] sm:$0xff] }
 0x172   :  { %12647 = vst [vmem:[#allocation68_spill] sm:$0xff] %v8960_v52  ;;  %v8968_v63 = vpack.c.bf16 %v2193_v47, %v2181_v49  ;;  %v12651_v47 = vld [vmem:[#allocation92_spill] sm:$0xff] }
 0x173   :  { %v2205_v7 = vand.u32 4294901760, %v2204_v59  ;;  %v2217_v14 = vand.u32 4294901760, %v2216_v26  ;;  %v8973_v58 = vpack.c.bf16 %v2211_v0, %v2199_v53  ;;  %v12648_v53 = vld [vmem:[#allocation88_spill] sm:$0xff]  ;;  %v12649_v0 = vld [vmem:[#allocation90_spill] sm:$0xff]  ;;  %v12654_v59 = vld [vmem:[#allocation93_spill] sm:$0xff] }
 0x175   :  { %v8979_v52 = vpack.c.bf16 %v2217_v14, %v2205_v7  ;;  %v12650_v14 = vld [vmem:[#allocation91_spill] sm:$0xff] }
 0x176   :  { %v12652_v7 = vld [vmem:[#allocation23_spill] sm:$0xff] }
 0x1e7   :  { %v1003_v6 = vpop.f32.mrb[0].mxu0 }
 0x1e8   :  { %v9033_v16 = vand.u32 4294901760, %v1003_v6  ;;  %v1005_v4 = vpop.f32.mrb[1].mxu0 }
 0x1e9   :  { %v1744_v49 = vsel %vm215_vm6, %v1005_v4, 0 }
 0x1ea   :  { %12657 = vst [vmem:[#allocation71_spill] sm:$0xff] %v9033_v16  ;;  %v9037_v45 = vsub.f32 %v1003_v6, %v9033_v16  ;;  %v9039_v27 = vand.u32 4294901760, %v1744_v49 }
 0x1ec   :  { %12658 = vst [vmem:[#allocation73_spill] sm:$0xff] %v9037_v45  ;;  %v12018_v17 = vand.u32 4294901760, %v9037_v45  ;;  %v9043_v26 = vsub.f32 %v1744_v49, %v9039_v27  ;;  %v12660_v49 = vld [vmem:[#allocation80_spill] sm:$0xff] }
 0x1ee   :  { %v12021_v54 = vand.u32 4294901760, %v9043_v26  ;;  %v1875_v31 = vsub.f32 %v9037_v45, %v12018_v17  ;;  %v12664_v17 = vld [vmem:[#allocation83_spill] sm:$0xff]  ;;  %v12665_v45 = vld [vmem:[#allocation85_spill] sm:$0xff] }
 0x1f0   :  { %v1869_v4 = vsub.f32 %v9043_v26, %v12021_v54  ;;  %v1876_v6 = vand.u32 4294901760, %v1875_v31  ;;  %v12668_v31 = vld [vmem:[#allocation25_spill] sm:$0xff]  ;;  %v12719_v54 = vld [vmem:[#allocation75_spill] sm:$0xff] }
 0x1f2   :  { %v1870_v44 = vand.u32 4294901760, %v1869_v4  ;;  %v12666_v4 = vld [vmem:[#allocation87_spill] sm:$0xff] }
 0x1f4   :  { %1871 = vmatprep.mubr.f32.mxu0 %v1870_v44  ;;  %v12667_v44 = vld [vmem:[#allocation24_spill] sm:$0xff] }
 0x1f5   :  { %1877 = vmatmul.mubr.f32.vlgmr.msra.gmra.mrb[2].mxu0 %v1876_v6  ;;  %v12670_v6 = vld [vmem:[#allocation42_spill] sm:$0xff] }
 0x1f6   :  { %6079 = vmatpush1.bf16.msra.mxu0 %v12659_v48  ;;  %2228 = vmatprep.mubr.f32.mxu0 %v9039_v27  ;;  %v12669_v48 = vld [vmem:[#allocation41_spill] sm:$0xff] }
 0x1f7   :  { %6081 = vmatprep.subr.bf16.mxu0 %v12660_v49  ;;  %v12671_v49 = vld [vmem:[#allocation44_spill] sm:$0xff] }
 0x1fa   :  { %6083 = vmatpush1.bf16.msra.mxu0 %v12661_v15  ;;  %v12672_v15 = vld [vmem:[#allocation47_spill] sm:$0xff] }
 0x1fb   :  { %6085 = vmatprep.subr.bf16.mxu0 %v12662_v32  ;;  %v12673_v32 = vld [vmem:[#allocation51_spill] sm:$0xff] }
 0x1fe   :  { %6087 = vmatpush1.bf16.msra.mxu0 %v12663_v23  ;;  %v12674_v23 = vld [vmem:[#allocation52_spill] sm:$0xff] }
 0x1ff   :  { %6089 = vmatprep.subr.bf16.mxu0 %v12664_v17  ;;  %v12675_v17 = vld [vmem:[#allocation55_spill] sm:$0xff] }
 0x202   :  { %6091 = vmatpush1.bf16.msra.mxu0 %v12665_v45  ;;  %v12676_v45 = vld [vmem:[#allocation57_spill] sm:$0xff] }
 0x203   :  { %6093 = vmatprep.subr.bf16.mxu0 %v12666_v4  ;;  %v12677_v4 = vld [vmem:[#allocation58_spill] sm:$0xff] }
 0x206   :  { %6095 = vmatpush1.bf16.msra.mxu0 %v12667_v44  ;;  %v12678_v44 = vld [vmem:[#allocation61_spill] sm:$0xff] }
 0x207   :  { %6097 = vmatprep.subr.bf16.mxu0 %v12668_v31  ;;  %v12679_v31 = vld [vmem:[#allocation62_spill] sm:$0xff] }
 0x20a   :  { %6099 = vmatpush1.bf16.msra.mxu0 %v12669_v48  ;;  %v12680_v48 = vld [vmem:[#allocation63_spill] sm:$0xff] }
 0x20b   :  { %6101 = vmatprep.subr.bf16.mxu0 %v12670_v6  ;;  %v12681_v6 = vld [vmem:[#allocation67_spill] sm:$0xff] }
 0x20e   :  { %6103 = vmatpush1.bf16.msra.mxu0 %v12671_v49  ;;  %v12682_v49 = vld [vmem:[#allocation68_spill] sm:$0xff] }
 0x20f   :  { %6105 = vmatprep.subr.bf16.mxu0 %v12672_v15  ;;  %v12683_v15 = vpack.c.bf16 %v12580_v36, %v12579_v35 }
 0x212   :  { %6107 = vmatpush1.bf16.msra.mxu0 %v12673_v32  ;;  %v12684_v32 = vpack.c.bf16 %v12582_v20, %v12581_v37 }
 0x213   :  { %6109 = vmatprep.subr.bf16.mxu0 %v12674_v23  ;;  %v12685_v23 = vpack.c.bf16 %v12587_v5, %v12583_v24 }
 0x216   :  { %6111 = vmatpush1.bf16.msra.mxu0 %v12675_v17  ;;  %v12689_v17 = vpack.c.bf16 %v12598_v19, %v12595_v2 }
 0x217   :  { %6113 = vmatprep.subr.bf16.mxu0 %v12676_v45  ;;  %v12690_v45 = vpack.c.bf16 %v12600_v28, %v12599_v18 }
 0x21a   :  { %6115 = vmatpush1.bf16.msra.mxu0 %v12677_v4  ;;  %v12691_v4 = vpack.c.bf16 %v12603_v57, %v12602_v51 }
 0x21b   :  { %6117 = vmatprep.subr.bf16.mxu0 %v12678_v44  ;;  %v12692_v44 = vpack.c.bf16 %v12606_v61, %v12605_v38 }
 0x21e   :  { %6119 = vmatpush1.bf16.msra.mxu0 %v12679_v31  ;;  %v12693_v31 = vld [vmem:[#allocation77_spill] sm:$0xff] }
 0x21f   :  { %6121 = vmatprep.subr.bf16.mxu0 %v12680_v48  ;;  %v12694_v48 = vpack.c.bf16 %v12610_v62, %v12693_v31 }
 0x222   :  { %6123 = vmatpush1.bf16.msra.mxu0 %v12681_v6  ;;  %v12695_v6 = vpack.c.bf16 %v12612_v30, %v12611_v8 }
 0x223   :  { %6125 = vmatprep.subr.bf16.mxu0 %v12682_v49  ;;  %v12696_v49 = vpack.c.bf16 %v12616_v40, %v12615_v55 }
 0x226   :  { %6127 = vmatpush1.bf16.msra.mxu0 %v8968_v63  ;;  %v12686_v63 = vpack.c.bf16 %v12589_v39, %v12588_v56 }
 0x227   :  { %6129 = vmatprep.subr.bf16.mxu0 %v8973_v58  ;;  %v12688_v58 = vpack.c.bf16 %v12594_v11, %v12593_v13 }
 0x22a   :  { %6131 = vmatpush1.bf16.msra.mxu0 %v8979_v52  ;;  %v12687_v52 = vpack.c.bf16 %v12592_v10, %v12590_v42 }
 0x22b   :  { %6133 = vmatprep.subr.bf16.mxu0 %v12683_v15  ;;  %v12697_v15 = vpack.c.bf16 %v12618_v22, %v12617_v21 }
 0x22d   :  { %2230 = vmatmul.mubr.f32.vlgmr.msra.gmra.mrb[2].mxu0 %v9033_v16 }
 0x22e   :  { %6135 = vmatpush1.bf16.msra.mxu0 %v12684_v32  ;;  %2414 = vmatprep.mubr.f32.mxu0 %v9043_v26  ;;  %v12698_v32 = vpack.c.bf16 %v12622_v29, %v12648_v53 }
 0x22f   :  { %6137 = vmatprep.subr.bf16.mxu0 %v12685_v23  ;;  %v12699_v23 = vpack.c.bf16 %v12650_v14, %v12649_v0 }
 0x232   :  { %6139 = vmatpush1.bf16.msra.mxu0 %v12686_v63  ;;  %v12700_v63 = vpack.c.bf16 %v12652_v7, %v12651_v47 }
 0x233   :  { %6141 = vmatprep.subr.bf16.mxu0 %v12687_v52  ;;  %v12701_v52 = vpack.c.bf16 %v12654_v59, %v12653_v1 }
 0x236   :  { %6143 = vmatpush1.bf16.msra.mxu0 %v12688_v58  ;;  %v12702_v58 = vld [vmem:[#allocation28_spill] sm:$0xff] }
 0x237   :  { %6145 = vmatprep.subr.bf16.mxu0 %v12689_v17  ;;  %v12703_v17 = vpack.c.bf16 %v12634_v33, %v12702_v58 }
 0x23a   :  { %6147 = vmatpush1.bf16.msra.mxu0 %v12690_v45  ;;  %v12704_v45 = vpack.c.bf16 %v12635_v43, %v8332_v25 }
 0x23b   :  { %6149 = vmatprep.subr.bf16.mxu0 %v12691_v4  ;;  %v12705_v4 = vld [vmem:[#allocation95_spill] sm:$0xff] }
 0x23e   :  { %6151 = vmatpush1.bf16.msra.mxu0 %v12692_v44  ;;  %v12706_v44 = vpack.c.bf16 %v12639_v60, %v12705_v4 }
 0x23f   :  { %6153 = vmatprep.subr.bf16.mxu0 %v12694_v48  ;;  %v12707_v48 = vld [vmem:[#allocation97_spill] sm:$0xff] }
 0x242   :  { %6155 = vmatpush1.bf16.msra.mxu0 %v12695_v6  ;;  %v12708_v6 = vpack.c.bf16 %v8369_v41, %v12707_v48 }
 0x243   :  { %6157 = vmatprep.subr.bf16.mxu0 %v12696_v49  ;;  %v12709_v49 = vpack.c.bf16 %v8637_v12, %v8635_v34 }
 0x246   :  { %6159 = vmatpush1.bf16.msra.mxu0 %v12697_v15  ;;  %v12710_v15 = vld [vmem:[#allocation53_spill] sm:$0xff] }
 0x247   :  { %6161 = vmatprep.subr.bf16.mxu0 %v12698_v32  ;;  %v12711_v32 = vpack.c.bf16 %v8653_v46, %v12710_v15  ;;  %v12722_v46 = vld [vmem:[#allocation73_spill] sm:$0xff] }
 0x24a   :  { %6163 = vmatpush1.bf16.msra.mxu0 %v12699_v23  ;;  %v12712_v23 = vpack.c.bf16 %v8675_v9, %v8673_v3  ;;  %v12725_v9 = vld [vmem:[#allocation26_spill] sm:$0xff] }
 0x24b   :  { %6165 = vmatprep.subr.bf16.mxu0 %v12700_v63  ;;  %v12713_v63 = vld [vmem:[#allocation60_spill] sm:$0xff] }
 0x24e   :  { %6167 = vmatpush1.bf16.msra.mxu0 %v12701_v52  ;;  %v12714_v52 = vpack.c.bf16 %v8681_v50, %v12713_v63  ;;  %v12727_v50 = vld [vmem:[#allocation30_spill] sm:$0xff] }
 0x24f   :  { %6169 = vmatprep.subr.bf16.mxu0 %v12703_v17  ;;  %v12715_v17 = vld [vmem:[#allocation70_spill] sm:$0xff] }
 0x252   :  { %6171 = vmatpush1.bf16.msra.mxu0 %v12704_v45  ;;  %v12716_v45 = vld [vmem:[#allocation69_spill] sm:$0xff] }
 0x253   :  { %6173 = vmatprep.subr.bf16.mxu0 %v12706_v44  ;;  %v12717_v44 = vpack.c.bf16 %v12715_v17, %v12716_v45  ;;  %v12729_v17 = vld [vmem:[#allocation31_spill] sm:$0xff] }
 0x256   :  { %6175 = vmatpush1.bf16.msra.mxu0 %v12708_v6  ;;  %v12718_v6 = vld [vmem:[#allocation76_spill] sm:$0xff] }
 0x257   :  { %6177 = vmatprep.subr.bf16.mxu0 %v12709_v49  ;;  %v12720_v16 = vpack.c.bf16 %v12718_v6, %v12719_v54  ;;  %v12721_v49 = vld [vmem:[#allocation16_spill] sm:$0xff]  ;;  %v12732_v6 = vld [vmem:[#allocation34_spill] sm:$0xff] }
 0x25a   :  { %6179 = vmatpush1.bf16.msra.mxu0 %v12711_v32  ;;  %v12723_v32 = vld [vmem:[#allocation18_spill] sm:$0xff] }
 0x25b   :  { %6181 = vmatprep.subr.bf16.mxu0 %v12712_v23  ;;  %v12724_v23 = vand.u32 4294901760, %v9043_v26  ;;  %v12734_v26 = vld [vmem:[#allocation36_spill] sm:$0xff] }
 0x25e   :  { %6183 = vmatpush1.bf16.msra.mxu0 %v12714_v52  ;;  %v12726_v52 = vld [vmem:[#allocation27_spill] sm:$0xff] }
 0x25f   :  { %6185 = vmatprep.subr.bf16.mxu0 %v12717_v44  ;;  %v12728_v44 = vld [vmem:[#allocation29_spill] sm:$0xff] }
 0x262   :  { %6187 = vmatpush1.bf16.msra.mxu0 %v12720_v16  ;;  %v12730_v16 = vld [vmem:[#allocation32_spill] sm:$0xff] }
 0x263   :  { %6189 = vmatprep.subr.bf16.mxu0 %v12721_v49  ;;  %v12731_v49 = vld [vmem:[#allocation33_spill] sm:$0xff] }
 0x265   :  { %2417 = vmatmul.mubr.f32.vlgmr.msra.gmra.mrb[2].mxu0 %v12722_v46 }
 0x266   :  { %6191 = vmatpush1.bf16.msra.mxu0 %v12723_v32  ;;  %2546 = vmatprep.mubr.f32.mxu0 %v12724_v23  ;;  %v12733_v32 = vld [vmem:[#allocation37_spill] sm:$0xff] }
 0x267   :  { %6193 = vmatprep.subr.bf16.mxu0 %v12725_v9  ;;  %v12735_v23 = vld [vmem:[#allocation21_spill] sm:$0xff]  ;;  %v12736_v9 = vld [vmem:[#allocation22_spill] sm:$0xff] }
 0x26a   :  { %6195 = vmatpush1.bf16.msra.mxu0 %v12726_v52  ;;  %v12737_v52 = vld [vmem:[#allocation35_spill] sm:$0xff] }
 0x26b   :  { %6197 = vmatprep.subr.bf16.mxu0 %v12727_v50  ;;  %v12738_v50 = vld [vmem:[#allocation38_spill] sm:$0xff] }
 0x26e   :  { %6199 = vmatpush1.bf16.msra.mxu0 %v12728_v44  ;;  %v12739_v44 = vld [vmem:[#allocation39_spill] sm:$0xff] }
 0x26f   :  { %6201 = vmatprep.subr.bf16.mxu0 %v12729_v17  ;;  %v12740_v17 = vld [vmem:[#allocation40_spill] sm:$0xff] }
 0x272   :  { %6203 = vmatpush1.bf16.msra.mxu0 %v12730_v16  ;;  %v12741_v16 = vld [vmem:[#allocation43_spill] sm:$0xff] }
 0x273   :  { %6205 = vmatprep.subr.bf16.mxu0 %v12731_v49  ;;  %v12742_v49 = vld [vmem:[#allocation45_spill] sm:$0xff] }
 0x276   :  { %6207 = vmatpush1.bf16.msra.mxu0 %v12732_v6  ;;  %v12743_v6 = vld [vmem:[#allocation46_spill] sm:$0xff] }
 0x277   :  { %6209 = vmatprep.subr.bf16.mxu0 %v12733_v32  ;;  %v12744_v32 = vld [vmem:[#allocation48_spill] sm:$0xff] }
 0x27a   :  { %6211 = vmatpush1.bf16.msra.mxu0 %v12734_v26  ;;  %v12745_v26 = vld [vmem:[#allocation49_spill] sm:$0xff] }
 0x27b   :  { %6213 = vmatprep.subr.bf16.mxu0 %v12735_v23  ;;  %v12746_v23 = vld [vmem:[#allocation50_spill] sm:$0xff] }
 0x27e   :  { %6215 = vmatpush1.bf16.msra.mxu0 %v12736_v9  ;;  %v12747_v9 = vld [vmem:[#allocation56_spill] sm:$0xff] }
 0x27f   :  { %6217 = vmatprep.subr.bf16.mxu0 %v12737_v52  ;;  %v12748_v52 = vld [vmem:[#allocation64_spill] sm:$0xff] }
 0x282   :  { %6219 = vmatpush1.bf16.msra.mxu0 %v12738_v50  ;;  %v12749_v50 = vld [vmem:[#allocation66_spill] sm:$0xff] }
 0x283   :  { %6221 = vmatprep.subr.bf16.mxu0 %v12739_v44 }
 0x286   :  { %6223 = vmatpush1.bf16.msra.mxu0 %v12740_v17  ;;  %v12750_v17 = vand.u32 4294901760, %v12579_v35  ;;  %v12758_v35 = vand.u32 4294901760, %v12588_v56  ;;  %v12765_v56 = vand.u32 4294901760, %v12598_v19  ;;  %v12772_v19 = vand.u32 4294901760, %v12693_v31 }
 0x287   :  { %6225 = vmatprep.subr.bf16.mxu0 %v12741_v16  ;;  %v12751_v16 = vand.u32 4294901760, %v12580_v36  ;;  %v12759_v36 = vand.u32 4294901760, %v12589_v39  ;;  %v12766_v39 = vand.u32 4294901760, %v12599_v18  ;;  %v12773_v18 = vand.u32 4294901760, %v12610_v62 }
 0x288   :  { %v12779_v31 = vand.u32 4294901760, %v12618_v22  ;;  %v12780_v62 = vand.u32 4294901760, %v12648_v53  ;;  %v12786_v22 = vand.u32 4294901760, %v12653_v1  ;;  %v12787_v53 = vand.u32 4294901760, %v12654_v59 }
 0x289   :  { %v6244_v44 = vpack.c.bf16 %v12751_v16, %v12750_v17  ;;  %v12761_v17 = vand.u32 4294901760, %v12592_v10  ;;  %v12768_v10 = vand.u32 4294901760, %v12602_v51  ;;  %v6264_v16 = vpack.c.bf16 %v12773_v18, %v12772_v19  ;;  %v12813_v19 = vld [vmem:[#allocation16_spill] sm:$0xff]  ;;  %v12815_v18 = vld [vmem:[#allocation18_spill] sm:$0xff] }
 0x28a   :  { %6227 = vmatpush1.bf16.msra.mxu0 %v12742_v49  ;;  %v12752_v49 = vld [vmem:[#allocation72_spill] sm:$0xff]  ;;  %v12775_v51 = vand.u32 4294901760, %v12612_v30  ;;  %v12782_v30 = vand.u32 4294901760, %v12649_v0  ;;  %v12789_v0 = vand.u32 4294901760, %v12634_v33  ;;  %v12793_v1 = vand.u32 4294901760, %v12639_v60 }
 0x28b   :  { %6229 = vmatprep.subr.bf16.mxu0 %v12743_v6  ;;  %v12753_v6 = vand.u32 4294901760, %v12581_v37  ;;  %v6250_v37 = vpack.c.bf16 %v12759_v36, %v12758_v35  ;;  %v12794_v59 = vand.u32 4294901760, %v12707_v48  ;;  %v12796_v33 = vand.u32 4294901760, %v8635_v34 }
 0x28c   :  { %v12801_v60 = vand.u32 4294901760, %v8673_v3 }
 0x28e   :  { %6231 = vmatpush1.bf16.msra.mxu0 %v12744_v32  ;;  %v12754_v32 = vand.u32 4294901760, %v12582_v20  ;;  %v12760_v20 = vand.u32 4294901760, %v12590_v42  ;;  %v12767_v42 = vand.u32 4294901760, %v12600_v28  ;;  %v12774_v28 = vand.u32 4294901760, %v12611_v8 }
 0x28f   :  { %6233 = vmatprep.subr.bf16.mxu0 %v12745_v26  ;;  %v12781_v8 = vand.u32 4294901760, %v12622_v29  ;;  %v12788_v29 = vand.u32 4294901760, %v12702_v58  ;;  %v12795_v58 = vand.u32 4294901760, %v8369_v41  ;;  %v12804_v41 = vand.u32 4294901760, %v12713_v63  ;;  %v12814_v63 = vld [vmem:[#allocation71_spill] sm:$0xff] }
 0x290   :  { %v6246_v26 = vpack.c.bf16 %v12754_v32, %v12753_v6  ;;  %v6258_v32 = vpack.c.bf16 %v12767_v42, %v12766_v39  ;;  %v12802_v39 = vld [vmem:[#allocation59_spill] sm:$0xff] }
 0x291   :  { %v6272_v36 = vpack.c.bf16 %v12781_v8, %v12780_v62  ;;  %v12803_v48 = vand.u32 4294901760, %v12802_v39  ;;  %v12829_v62 = vld [vmem:[#allocation38_spill] sm:$0xff]  ;;  %v12830_v8 = vld [vmem:[#allocation39_spill] sm:$0xff] }
 0x292   :  { %6235 = vmatpush1.bf16.msra.mxu0 %v12746_v23  ;;  %v12755_v23 = vand.u32 4294901760, %v12583_v24  ;;  %v6252_v24 = vpack.c.bf16 %v12761_v17, %v12760_v20  ;;  %v6278_v17 = vpack.c.bf16 %v12787_v53, %v12786_v22  ;;  %v12838_v22 = vld [vmem:[#allocation56_spill] sm:$0xff]  ;;  %v2966_v39 = vld [vmem:[%s11735_s3 + $0x50] sm:$0xff] }
 0x293   :  { %6237 = vmatprep.subr.bf16.mxu0 %v12747_v9  ;;  %v12756_v9 = vand.u32 4294901760, %v12587_v5  ;;  %v12764_v5 = vand.u32 4294901760, %v12595_v2  ;;  %v12771_v2 = vand.u32 4294901760, %v12606_v61  ;;  %v12778_v61 = vand.u32 4294901760, %v12617_v21  ;;  %v12839_v53 = vld [vmem:[#allocation64_spill] sm:$0xff] }
 0x294   :  { %v12785_v21 = vand.u32 4294901760, %v12652_v7  ;;  %v12792_v7 = vand.u32 4294901760, %v12705_v4  ;;  %v6292_v42 = vpack.c.bf16 %v12803_v48, %v12801_v60  ;;  %v2965_v60 = vld [vmem:[%s11735_s3 + $0x48] sm:$0xff] }
 0x295   :  { %v6256_v6 = vpack.c.bf16 %v12765_v56, %v12764_v5  ;;  %v6270_v35 = vpack.c.bf16 %v12779_v31, %v12778_v61  ;;  %v12799_v56 = vld [vmem:[#allocation54_spill] sm:$0xff]  ;;  %v12825_v61 = vld [vmem:[#allocation36_spill] sm:$0xff] }
 0x296   :  { %6239 = vmatpush1.bf16.msra.mxu0 %v12748_v52  ;;  %v6248_v52 = vpack.c.bf16 %v12756_v9, %v12755_v23  ;;  %v12762_v9 = vand.u32 4294901760, %v12593_v13  ;;  %v12769_v13 = vand.u32 4294901760, %v12603_v57  ;;  %v12776_v57 = vand.u32 4294901760, %v12615_v55  ;;  %v12827_v31 = vld [vmem:[#allocation22_spill] sm:$0xff] }
 0x297   :  { %6241 = vmatprep.subr.bf16.mxu0 %v12749_v50  ;;  %v12757_v50 = vand.u32 4294901760, %v12722_v46  ;;  %v12763_v46 = vand.u32 4294901760, %v12594_v11  ;;  %v12770_v11 = vand.u32 4294901760, %v12605_v38  ;;  %v12777_v38 = vand.u32 4294901760, %v12616_v40 }
 0x298   :  { %v12783_v55 = vand.u32 4294901760, %v12650_v14  ;;  %v12784_v40 = vand.u32 4294901760, %v12651_v47  ;;  %v12790_v14 = vand.u32 4294901760, %v8332_v25  ;;  %v12791_v47 = vand.u32 4294901760, %v12635_v43 }
 0x299   :  { %v6268_v23 = vpack.c.bf16 %v12777_v38, %v12776_v57  ;;  %v12797_v25 = vand.u32 4294901760, %v8637_v12  ;;  %v12798_v43 = vand.u32 4294901760, %v12710_v15  ;;  %v12800_v4 = vand.u32 4294901760, %v12799_v56  ;;  %v12822_v57 = vld [vmem:[#allocation33_spill] sm:$0xff]  ;;  %v12823_v38 = vld [vmem:[#allocation34_spill] sm:$0xff] }
 0x29a   :  { %6243 = vmatpush1.bf16.msra.mxu0 %v12752_v49  ;;  %v6276_v20 = vpack.c.bf16 %v12785_v21, %v12784_v40  ;;  %v12807_v12 = vand.u32 4294901760, %v12716_v45  ;;  %v12816_v45 = vld [vmem:[#allocation26_spill] sm:$0xff]  ;;  %v12835_v40 = vld [vmem:[#allocation48_spill] sm:$0xff]  ;;  %v12836_v21 = vld [vmem:[#allocation49_spill] sm:$0xff] }
 0x29b   :  { %6245 = vmatprep.subr.bf16.mxu0 %v6244_v44  ;;  %v6262_v44 = vpack.c.bf16 %v12771_v2, %v12770_v11  ;;  %v6288_v5 = vpack.c.bf16 %v12797_v25, %v12796_v33  ;;  %v12810_v11 = vand.u32 4294901760, %v12719_v54  ;;  %v12811_v2 = vld [vmem:[#allocation76_spill] sm:$0xff]  ;;  %v12819_v54 = vld [vmem:[#allocation29_spill] sm:$0xff]  ;;  %v2962_v33 = vld [vmem:[%s11735_s3 + $0x30] sm:$0xff] }
 0x29c   :  { %v12812_v3 = vand.u32 4294901760, %v12811_v2  ;;  %v2963_v25 = vld [vmem:[%s11735_s3 + $0x38] sm:$0xff]  ;;  %v3018_v2 = vand.u32 4294901760, %v2966_v39 }
 0x29d   :  { %2550 = vmatmul.mubr.f32.vlgmr.msra.gmra.mrb[2].mxu0 %v12757_v50  ;;  %v6254_v50 = vpack.c.bf16 %v12763_v46, %v12762_v9  ;;  %v6282_v9 = vpack.c.bf16 %v12791_v47, %v12790_v14  ;;  %v6284_v46 = vpack.c.bf16 %v12793_v1, %v12792_v7  ;;  %v12049_v14 = vmov 0.0|0.0   ;;  %v2960_v1 = vld [vmem:[%s11735_s3 + $0x20] sm:$0xff] }
 0x29e   :  { %6247 = vmatpush1.bf16.msra.mxu0 %v6246_v26  ;;  %2789 = vmatprep.mubr.f32.mxu0 %v9039_v27  ;;  %v6266_v26 = vpack.c.bf16 %v12775_v51, %v12774_v28  ;;  %v12818_v28 = vld [vmem:[#allocation30_spill] sm:$0xff]  ;;  %v12820_v51 = vld [vmem:[#allocation31_spill] sm:$0xff] }
 0x29f   :  { %6249 = vmatprep.subr.bf16.mxu0 %v6248_v52  ;;  %v6260_v52 = vpack.c.bf16 %v12769_v13, %v12768_v10  ;;  %v12808_v13 = vld [vmem:[#allocation70_spill] sm:$0xff]  ;;  %6356 = vmatprep.subr.bf16.mxu1 %v12049_v14 }
 0x2a0   :  { %v12809_v15 = vand.u32 4294901760, %v12808_v13  ;;  %v2968_v13 = vld [vmem:[%s11735_s3 + $0x60] sm:$0xff] }
 0x2a2   :  { %6251 = vmatpush1.bf16.msra.mxu0 %v6250_v37  ;;  %v6274_v37 = vpack.c.bf16 %v12783_v55, %v12782_v30  ;;  %v12832_v30 = vld [vmem:[#allocation43_spill] sm:$0xff]  ;;  %v12833_v55 = vld [vmem:[#allocation45_spill] sm:$0xff] }
 0x2a3   :  { %6253 = vmatprep.subr.bf16.mxu0 %v6252_v24  ;;  %v6280_v24 = vpack.c.bf16 %v12789_v0, %v12788_v29  ;;  %v2956_v29 = vld [vmem:[%s11735_s3] sm:$0xff]  ;;  %v2957_v0 = vld [vmem:[%s11735_s3 + $0x8] sm:$0xff] }
 0x2a4   :  { %v2988_v47 = vand.u32 4294901760, %v2956_v29 }
 0x2a6   :  { %6255 = vmatpush1.bf16.msra.mxu0 %v6254_v50  ;;  %v6286_v50 = vpack.c.bf16 %v12795_v58, %v12794_v59  ;;  %v3000_v58 = vand.u32 4294901760, %v2960_v1 }
 0x2a7   :  { %6257 = vmatprep.subr.bf16.mxu0 %v6256_v6  ;;  %v6290_v6 = vpack.c.bf16 %v12800_v4, %v12798_v43  ;;  %v9371_v43 = vsub.f32 %v2956_v29, %v2988_v47 }
 0x2aa   :  { %6259 = vmatpush1.bf16.msra.mxu0 %v6258_v32  ;;  %v12805_v32 = vld [vmem:[#allocation65_spill] sm:$0xff] }
 0x2ab   :  { %6261 = vmatprep.subr.bf16.mxu0 %v6260_v52  ;;  %v12806_v34 = vand.u32 4294901760, %v12805_v32  ;;  %v6296_v52 = vpack.c.bf16 %v12809_v15, %v12807_v12  ;;  %v3009_v12 = vand.u32 4294901760, %v2963_v25 }
 0x2ad   :  { %v6294_v10 = vpack.c.bf16 %v12806_v34, %v12804_v41  ;;  %v2967_v41 = vld [vmem:[%s11735_s3 + $0x58] sm:$0xff] }
 0x2ae   :  { %6263 = vmatpush1.bf16.msra.mxu0 %v6262_v44  ;;  %v6298_v44 = vpack.c.bf16 %v12812_v3, %v12810_v11  ;;  %v3015_v11 = vand.u32 4294901760, %v2965_v60  ;;  %v2969_v3 = vld [vmem:[%s11735_s3 + $0x68] sm:$0xff] }
 0x2af   :  { %6265 = vmatprep.subr.bf16.mxu0 %v6264_v16  ;;  %v12817_v16 = vld [vmem:[#allocation27_spill] sm:$0xff] }
 0x2b2   :  { %6267 = vmatpush1.bf16.msra.mxu0 %v6266_v26  ;;  %v12821_v26 = vld [vmem:[#allocation32_spill] sm:$0xff] }
 0x2b3   :  { %6269 = vmatprep.subr.bf16.mxu0 %v6268_v23  ;;  %v12824_v23 = vld [vmem:[#allocation37_spill] sm:$0xff] }
 0x2b6   :  { %6271 = vmatpush1.bf16.msra.mxu0 %v6270_v35  ;;  %v12828_v35 = vld [vmem:[#allocation35_spill] sm:$0xff] }
 0x2b7   :  { %6273 = vmatprep.subr.bf16.mxu0 %v6272_v36  ;;  %v12831_v36 = vld [vmem:[#allocation40_spill] sm:$0xff] }
 0x2ba   :  { %6275 = vmatpush1.bf16.msra.mxu0 %v6274_v37  ;;  %v12834_v37 = vld [vmem:[#allocation46_spill] sm:$0xff] }
 0x2bb   :  { %6277 = vmatprep.subr.bf16.mxu0 %v6276_v20  ;;  %v12837_v20 = vld [vmem:[#allocation50_spill] sm:$0xff] }
 0x2be   :  { %6279 = vmatpush1.bf16.msra.mxu0 %v6278_v17  ;;  %v12840_v17 = vld [vmem:[#allocation66_spill] sm:$0xff] }
 0x2bf   :  { %6281 = vmatprep.subr.bf16.mxu0 %v6280_v24  ;;  %v2958_v24 = vld [vmem:[%s11735_s3 + $0x10] sm:$0xff] }
 0x2c0   :  { %v2994_v7 = vand.u32 4294901760, %v2958_v24 }
 0x2c2   :  { %6283 = vmatpush1.bf16.msra.mxu0 %v6282_v9  ;;  %v2991_v9 = vand.u32 4294901760, %v2957_v0  ;;  %v9375_v4 = vsub.f32 %v2958_v24, %v2994_v7 }
 0x2c3   :  { %6285 = vmatprep.subr.bf16.mxu0 %v6284_v46  ;;  %v2961_v46 = vld [vmem:[%s11735_s3 + $0x28] sm:$0xff] }
 0x2c4   :  { %v9373_v56 = vsub.f32 %v2957_v0, %v2991_v9 }
 0x2c6   :  { %6287 = vmatpush1.bf16.msra.mxu0 %v6286_v50  ;;  %v3003_v50 = vand.u32 4294901760, %v2961_v46 }
 0x2c7   :  { %6289 = vmatprep.subr.bf16.mxu0 %v6288_v5  ;;  %v9369_v5 = vpack.c.bf16 %v2991_v9, %v2988_v47  ;;  %v2974_v9 = vld [vmem:[%s11735_s3 + $0x90] sm:$0xff] }
 0x2c8   :  { %v9396_v34 = vsub.f32 %v2961_v46, %v3003_v50  ;;  %v2976_v46 = vld [vmem:[%s11735_s3 + $0xa0] sm:$0xff] }
 0x2c9   :  { %6358 = vmatpush1.bf16.msra.mxu1 %v9369_v5 }
 0x2ca   :  { %6291 = vmatpush1.bf16.msra.mxu0 %v6290_v6  ;;  %v2964_v6 = vld [vmem:[%s11735_s3 + $0x40] sm:$0xff]  ;;  %6359 = vmatprep.subr.bf16.mxu1 %v12049_v14 }
 0x2cb   :  { %6293 = vmatprep.subr.bf16.mxu0 %v6292_v42  ;;  %v9388_v42 = vsub.f32 %v2960_v1, %v3000_v58 }
 0x2ce   :  { %6295 = vmatpush1.bf16.msra.mxu0 %v6294_v10  ;;  %v3006_v10 = vand.u32 4294901760, %v2962_v33 }
 0x2cf   :  { %6297 = vmatprep.subr.bf16.mxu0 %v6296_v52  ;;  %v3012_v52 = vand.u32 4294901760, %v2964_v6 }
 0x2d2   :  { %6299 = vmatpush1.bf16.msra.mxu0 %v6298_v44 }
 0x2d3   :  { %6301 = vmatprep.subr.bf16.mxu0 %v12813_v19 }
 0x2d5   :  { %2791 = vmatmul.mubr.f32.vlgmr.msra.gmra.mrb[2].mxu0 %v12814_v63 }
 0x2d6   :  { %6303 = vmatpush1.bf16.msra.mxu0 %v12815_v18  ;;  %2918 = vmatprep.mubr.f32.mxu0 %v9039_v27  ;;  %v12826_v27 = vld [vmem:[#allocation21_spill] sm:$0xff]  ;;  %v9409_v18 = vsub.f32 %v2963_v25, %v3009_v12  ;;  %v2978_v25 = vld [vmem:[%s11735_s3 + $0xb0] sm:$0x1f] }
 0x2d7   :  { %6305 = vmatprep.subr.bf16.mxu0 %v12816_v45  ;;  %v3021_v45 = vand.u32 4294901760, %v2967_v41 }
 0x2da   :  { %6307 = vmatpush1.bf16.msra.mxu0 %v12817_v16  ;;  %v2970_v16 = vld [vmem:[%s11735_s3 + $0x70] sm:$0xff] }
 0x2db   :  { %6309 = vmatprep.subr.bf16.mxu0 %v12818_v28  ;;  %v2971_v28 = vld [vmem:[%s11735_s3 + $0x78] sm:$0xff] }
 0x2de   :  { %6311 = vmatpush1.bf16.msra.mxu0 %v12819_v54 }
 0x2df   :  { %6313 = vmatprep.subr.bf16.mxu0 %v12820_v51  ;;  %v9420_v51 = vsub.f32 %v2964_v6, %v3012_v52 }
 0x2e2   :  { %6315 = vmatpush1.bf16.msra.mxu0 %v12821_v26  ;;  %v9422_v26 = vsub.f32 %v2965_v60, %v3015_v11 }
 0x2e3   :  { %6317 = vmatprep.subr.bf16.mxu0 %v12822_v57  ;;  %v3024_v57 = vand.u32 4294901760, %v2968_v13 }
 0x2e6   :  { %6319 = vmatpush1.bf16.msra.mxu0 %v12823_v38  ;;  %v9428_v38 = vpack.c.bf16 %v3003_v50, %v3000_v58  ;;  %v3048_v50 = vand.u32 4294901760, %v2976_v46 }
 0x2e7   :  { %6321 = vmatprep.subr.bf16.mxu0 %v12824_v23  ;;  %v9430_v23 = vsub.f32 %v2966_v39, %v3018_v2 }
 0x2ea   :  { %6323 = vmatpush1.bf16.msra.mxu0 %v12825_v61  ;;  %v9432_v61 = vsub.f32 %v2967_v41, %v3021_v45 }
 0x2eb   :  { %6325 = vmatprep.subr.bf16.mxu0 %v12826_v27  ;;  %v3027_v27 = vand.u32 4294901760, %v2969_v3 }
 0x2ee   :  { %6327 = vmatpush1.bf16.msra.mxu0 %v12827_v31  ;;  %v9439_v31 = vsub.f32 %v2968_v13, %v3024_v57  ;;  %v9508_v13 = vsub.f32 %v2976_v46, %v3048_v50 }
 0x2ef   :  { %6329 = vmatprep.subr.bf16.mxu0 %v12828_v35  ;;  %v3030_v35 = vand.u32 4294901760, %v2970_v16 }
 0x2f2   :  { %6331 = vmatpush1.bf16.msra.mxu0 %v12829_v62  ;;  %v3033_v62 = vand.u32 4294901760, %v2971_v28 }
 0x2f3   :  { %6333 = vmatprep.subr.bf16.mxu0 %v12830_v8  ;;  %v9441_v8 = vsub.f32 %v2969_v3, %v3027_v27  ;;  %v12048_v3 = vand.u32 4294901760, %v9371_v43 }
 0x2f6   :  { %6335 = vmatpush1.bf16.msra.mxu0 %v12831_v36  ;;  %v9443_v36 = vsub.f32 %v2970_v16, %v3030_v35 }
 0x2f7   :  { %6337 = vmatprep.subr.bf16.mxu0 %v12832_v30  ;;  %v9445_v30 = vsub.f32 %v2971_v28, %v3033_v62  ;;  %v12046_v28 = vand.u32 4294901760, %v9375_v4 }
 0x2fa   :  { %6339 = vmatpush1.bf16.msra.mxu0 %v12833_v55  ;;  %v9448_v55 = vpack.c.bf16 %v3009_v12, %v3006_v10 }
 0x2fb   :  { %6341 = vmatprep.subr.bf16.mxu0 %v12834_v37  ;;  %v9452_v37 = vpack.c.bf16 %v3015_v11, %v3012_v52 }
 0x2fe   :  { %6343 = vmatpush1.bf16.msra.mxu0 %v12835_v40  ;;  %v9456_v40 = vpack.c.bf16 %v3021_v45, %v3018_v2  ;;  %v9519_v2 = vsel %vm2983_vm11, %v2978_v25, 0  ;;  %v3094_v45 = vsub.f32 %v9371_v43, %v12048_v3 }
 0x2ff   :  { %6345 = vmatprep.subr.bf16.mxu0 %v12836_v21  ;;  %v9460_v21 = vpack.c.bf16 %v3027_v27, %v3024_v57  ;;  %v12841_v57 = vmov 0.0  }
 0x300   :  { %v3095_v27 = vand.u32 4294901760, %v3094_v45 }
 0x302   :  { %6347 = vmatpush1.bf16.msra.mxu0 %v12837_v20  ;;  %v9464_v20 = vpack.c.bf16 %v3033_v62, %v3030_v35  ;;  %v3108_v62 = vsub.f32 %v9375_v4, %v12046_v28 }
 0x303   :  { %6349 = vmatprep.subr.bf16.mxu0 %v12838_v22  ;;  %v2972_v22 = vld [vmem:[%s11735_s3 + $0x80] sm:$0xff] }
 0x306   :  { %6351 = vmatpush1.bf16.msra.mxu0 %v12839_v53  ;;  %v2973_v53 = vld [vmem:[%s11735_s3 + $0x88] sm:$0xff] }
 0x307   :  { %6353 = vmatprep.subr.bf16.mxu0 %v12840_v17  ;;  %v3036_v17 = vand.u32 4294901760, %v2972_v22  ;;  %v3039_v29 = vand.u32 4294901760, %v2973_v53 }
 0x309   :  { %v9475_v0 = vpack.c.bf16 %v3039_v29, %v3036_v17  ;;  %v9477_v24 = vsub.f32 %v2972_v22, %v3036_v17  ;;  %v9479_v47 = vsub.f32 %v2973_v53, %v3039_v29  ;;  %v3109_v17 = vand.u32 4294901760, %v3108_v62 }
 0x30a   :  { %6355 = vmatpush1.bf16.msra.mxu0 %v12752_v49  ;;  %v2959_v49 = vld [vmem:[%s11735_s3 + $0x18] sm:$0xff] }
 0x30b   :  { %6890 = vmatprep.subr.bf16.mxu0 %v12049_v14  ;;  %v2997_v59 = vand.u32 4294901760, %v2959_v49 }
 0x30d   :  { %2920 = vmatmul.mubr.f32.vlgmr.msra.gmra.mrb[2].mxu0 %v12814_v63  ;;  %v9386_v48 = vsub.f32 %v2959_v49, %v2997_v59  ;;  %v9394_v32 = vpack.c.bf16 %v2997_v59, %v2994_v7  ;;  %v9407_v63 = vsub.f32 %v2962_v33, %v3006_v10  ;;  %v2975_v49 = vld [vmem:[%s11735_s3 + $0x98] sm:$0xff]  ;;  %v3042_v7 = vand.u32 4294901760, %v2974_v9  ;;  %v2977_v59 = vld [vmem:[%s11735_s3 + $0xa8] sm:$0xff] }
 0x30e   :  { %v3045_v1 = vand.u32 4294901760, %v2975_v49  ;;  %v3051_v33 = vand.u32 4294901760, %v2977_v59 }
 0x30f   :  { %6361 = vmatpush1.bf16.msra.mxu1 %v9394_v32  ;;  %v9500_v39 = vsub.f32 %v2974_v9, %v3042_v7  ;;  %v12039_v9 = vand.u32 4294901760, %v9388_v42 }
 0x310   :  { %6362 = vmatprep.subr.bf16.mxu1 %v12049_v14  ;;  %v9498_v60 = vpack.c.bf16 %v3045_v1, %v3042_v7  ;;  %v9502_v41 = vsub.f32 %v2975_v49, %v3045_v1  ;;  %v9514_v52 = vpack.c.bf16 %v3051_v33, %v3048_v50  ;;  %v9516_v11 = vsub.f32 %v2977_v59, %v3051_v33 }
 0x311   :  { %v12038_v49 = vand.u32 4294901760, %v9396_v34  ;;  %v3122_v1 = vsub.f32 %v9388_v42, %v12039_v9  ;;  %v12032_v50 = vand.u32 4294901760, %v9409_v18  ;;  %v12043_v9 = vand.u32 4294901760, %v9508_v13 }
 0x313   :  { %6364 = vmatpush1.bf16.msra.mxu1 %v9428_v38  ;;  %v3129_v46 = vsub.f32 %v9396_v34, %v12038_v49  ;;  %v3123_v59 = vand.u32 4294901760, %v3122_v1 }
 0x314   :  { %6365 = vmatprep.subr.bf16.mxu1 %v12049_v14 }
 0x315   :  { %v3130_v33 = vand.u32 4294901760, %v3129_v46  ;;  %v12028_v46 = vand.u32 4294901760, %v9430_v23 }
 0x317   :  { %6367 = vmatpush1.bf16.msra.mxu1 %v9448_v55 }
 0x318   :  { %6368 = vmatprep.subr.bf16.mxu1 %v12049_v14 }
 0x31b   :  { %6370 = vmatpush1.bf16.msra.mxu1 %v9452_v37 }
 0x31c   :  { %6371 = vmatprep.subr.bf16.mxu1 %v12049_v14 }
 0x31f   :  { %6373 = vmatpush1.bf16.msra.mxu1 %v9456_v40 }
 0x320   :  { %6374 = vmatprep.subr.bf16.mxu1 %v12049_v14 }
 0x323   :  { %6376 = vmatpush1.bf16.msra.mxu1 %v9460_v21 }
 0x324   :  { %6377 = vmatprep.subr.bf16.mxu1 %v12049_v14 }
 0x327   :  { %6379 = vmatpush1.bf16.msra.mxu1 %v9464_v20 }
 0x328   :  { %6380 = vmatprep.subr.bf16.mxu1 %v12049_v14 }
 0x32b   :  { %6382 = vmatpush1.bf16.msra.mxu1 %v9475_v0 }
 0x32c   :  { %6383 = vmatprep.subr.bf16.mxu1 %v12049_v14 }
 0x32f   :  { %6385 = vmatpush1.bf16.msra.mxu1 %v9498_v60 }
 0x330   :  { %6386 = vmatprep.subr.bf16.mxu1 %v12049_v14 }
 0x333   :  { %6388 = vmatpush1.bf16.msra.mxu1 %v9514_v52 }
 0x334   :  { %3053 = vmatprep.subr.mxu1 %v12841_v57 }
 0x3e0   :  { %v2921_v15 = vpop.f32.mrb[2].mxu0 }
 0x3e1   :  { %v9405_v44 = vmax.f32 %v2921_v15, 0.0  ;;  %2928 = vst [vmem:[#allocation4] sm:$0xff] %v2921_v15  ;;  %v2923_v19 = vpop.f32.mrb[3].mxu0 }
 0x3e2   :  { %v9417_v54 = vmax.f32 %v2923_v19, 0.0  ;;  %2930 = vst.msk [vmem:[#allocation4 + $0x8] sm:$0xff] %vm2929_vm9, %v2923_v19  ;;  %v9529_v19 = vand.u32 4294901760, %v9519_v2 }
 0x3e3   :  { %2931 = vst [vmem:[#allocation6] sm:$0xff] %v9405_v44  ;;  %2935 = vrot.lane.b32.xlu0 %v9405_v44, %s7246_s11 }
 0x3e4   :  { %2932 = vst.msk [vmem:[#allocation6 + $0x8] sm:$0xff] %vm2929_vm9, %v9417_v54  ;;  %2937 = vrot.lane.b32.xlu1 %v9417_v54, %s7246_s11  ;;  %3055 = vmatpush1.msra.mxu1 %v9529_v19 }
 0x3e5   :  { %6389 = vmatprep.subr.bf16.mxu1 %v12049_v14 }
 0x455   :  { %v2936_v58 = vpop.permute.xlu0 %2935 }
 0x456   :  { %v2938_v6 = vpop.permute.xlu1 %2937 }
 0x457   :  { %v2940_v10 = vsel %vm2939_vm10, %v2936_v58, %v2938_v6  ;;  %v9506_v12 = vmax.f32 %v9417_v54, %v2938_v6  ;;  %v12042_v54 = vand.u32 4294901760, %v9386_v48  ;;  %v12035_v58 = vand.u32 4294901760, %v9407_v63 }
 0x458   :  { %v9511_v15 = vmax.f32 %v9405_v44, %v2940_v10  ;;  %v12047_v44 = vand.u32 4294901760, %v9373_v56  ;;  %v3143_v6 = vsub.f32 %v9409_v18, %v12032_v50  ;;  %v9569_v10 = vpack.c.bf16 %v3130_v33, %v3123_v59 }
 0x459   :  { %2949 = vrot.lane.b32.xlu0 %v9506_v12, %s7236_s25  ;;  %v3115_v22 = vsub.f32 %v9386_v48, %v12042_v54  ;;  %v3136_v25 = vsub.f32 %v9407_v63, %v12035_v58  ;;  %v12030_v59 = vand.u32 4294901760, %v9432_v61 }
 0x45a   :  { %2947 = vrot.lane.b32.xlu1 %v9511_v15, %s7236_s25  ;;  %v3101_v16 = vsub.f32 %v9373_v56, %v12047_v44 }
 0x45b   :  { %v3116_v29 = vand.u32 4294901760, %v3115_v22  ;;  %v3137_v45 = vand.u32 4294901760, %v3136_v25  ;;  %v3164_v25 = vsub.f32 %v9430_v23, %v12028_v46 }
 0x45c   :  { %v3102_v35 = vand.u32 4294901760, %v3101_v16  ;;  %v3144_v16 = vand.u32 4294901760, %v3143_v6  ;;  %v3171_v6 = vsub.f32 %v9432_v61, %v12030_v59  ;;  %v12034_v59 = vand.u32 4294901760, %v9443_v36 }
 0x45d   :  { %v9553_v7 = vpack.c.bf16 %v3116_v29, %v3109_v17 }
 0x45e   :  { %v9548_v53 = vpack.c.bf16 %v3102_v35, %v3095_v27  ;;  %v12029_v27 = vand.u32 4294901760, %v9420_v51  ;;  %v12027_v35 = vand.u32 4294901760, %v9422_v26  ;;  %v9573_v62 = vpack.c.bf16 %v3144_v16, %v3137_v45 }
 0x45f   :  { %v3165_v45 = vand.u32 4294901760, %v3164_v25  ;;  %v3172_v16 = vand.u32 4294901760, %v3171_v6  ;;  %v12036_v25 = vand.u32 4294901760, %v9445_v30 }
 0x460   :  { %v3150_v22 = vsub.f32 %v9420_v51, %v12029_v27  ;;  %v3157_v17 = vsub.f32 %v9422_v26, %v12027_v35  ;;  %v12031_v35 = vand.u32 4294901760, %v9439_v31 }
 0x462   :  { %v3151_v29 = vand.u32 4294901760, %v3150_v22  ;;  %v3158_v1 = vand.u32 4294901760, %v3157_v17  ;;  %v12033_v22 = vand.u32 4294901760, %v9441_v8  ;;  %v9593_v17 = vpack.c.bf16 %v3172_v16, %v3165_v45 }
 0x463   :  { %v3192_v45 = vsub.f32 %v9443_v36, %v12034_v59  ;;  %v3199_v16 = vsub.f32 %v9445_v30, %v12036_v25  ;;  %v12041_v25 = vand.u32 4294901760, %v9500_v39 }
 0x464   :  { %v9583_v33 = vpack.c.bf16 %v3158_v1, %v3151_v29  ;;  %v3178_v29 = vsub.f32 %v9439_v31, %v12031_v35  ;;  %v3185_v1 = vsub.f32 %v9441_v8, %v12033_v22  ;;  %v12037_v22 = vand.u32 4294901760, %v9477_v24 }
 0x465   :  { %v3193_v35 = vand.u32 4294901760, %v3192_v45  ;;  %v3200_v50 = vand.u32 4294901760, %v3199_v16  ;;  %v12045_v45 = vand.u32 4294901760, %v9502_v41 }
 0x466   :  { %v3179_v46 = vand.u32 4294901760, %v3178_v29  ;;  %v3186_v27 = vand.u32 4294901760, %v3185_v1  ;;  %v12040_v29 = vand.u32 4294901760, %v9479_v47 }
 0x467   :  { %v9613_v1 = vpack.c.bf16 %v3200_v50, %v3193_v35  ;;  %v3220_v50 = vsub.f32 %v9500_v39, %v12041_v25  ;;  %v3227_v35 = vsub.f32 %v9502_v41, %v12045_v45 }
 0x468   :  { %v9603_v6 = vpack.c.bf16 %v3186_v27, %v3179_v46  ;;  %v3206_v27 = vsub.f32 %v9477_v24, %v12037_v22  ;;  %v3213_v46 = vsub.f32 %v9479_v47, %v12040_v29  ;;  %v3234_v29 = vsub.f32 %v9508_v13, %v12043_v9 }
 0x469   :  { %v3221_v22 = vand.u32 4294901760, %v3220_v50  ;;  %v3228_v49 = vand.u32 4294901760, %v3227_v35  ;;  %v6423_v50 = vpack.c.bf16 %v9373_v56, %v9371_v43 }
 0x46a   :  { %v3207_v59 = vand.u32 4294901760, %v3206_v27  ;;  %v3214_v58 = vand.u32 4294901760, %v3213_v46  ;;  %v12044_v27 = vand.u32 4294901760, %v9516_v11 }
 0x46b   :  { %v6417_v46 = vpack.c.bf16 %v3228_v49, %v3221_v22 }
 0x46c   :  { %v6414_v16 = vpack.c.bf16 %v3214_v58, %v3207_v59  ;;  %v3241_v58 = vsub.f32 %v9516_v11, %v12044_v27  ;;  %v3235_v59 = vand.u32 4294901760, %v3234_v29 }
 0x46e   :  { %v3242_v25 = vand.u32 4294901760, %v3241_v58  ;;  %v9649_v58 = vpop.f32.mrb[0].mxu1 }
 0x470   :  { %v6420_v54 = vpack.c.bf16 %v3242_v25, %v3235_v59  ;;  %v9653_v59 = vpop.f32.mrb[1].mxu1 }
 0x4cb   :  { %v2950_v3 = vpop.permute.xlu0 %2949 }
 0x4cc   :  { %v2955_v29 = vmax.f32 %v9506_v12, %v2950_v3  ;;  %v2948_v9 = vpop.permute.xlu1 %2947 }
 0x4cd   :  { %v2951_v25 = vsel %vm50_vm0, %v2948_v9, %v2950_v3 }
 0x4ce   :  { %v2981_v22 = vsel %vm2979_vm12, %v2955_v29, 0  ;;  %v2954_v27 = vmax.f32 %v9511_v15, %v2951_v25  ;;  %v12854_v25 = vand.u32 4294901760, %v9375_v4 }
 0x4cf   :  { %v9667_v49 = vand.u32 4294901760, %v2981_v22 }
 0x4d0   :  { %v9669_v45 = vand.u32 4294901760, %v2954_v27 }
 0x4d1   :  { %v9672_v28 = vsub.f32 %v2981_v22, %v9667_v49 }
 0x4d2   :  { %v9675_v44 = vsub.f32 %v2954_v27, %v9669_v45  ;;  %v12849_v27 = vpack.c.bf16 %v9479_v47, %v9477_v24 }
 0x4d3   :  { %v3076_v35 = vand.u32 4294901760, %v9672_v28 }
 0x4d4   :  { %v3082_v12 = vand.u32 4294901760, %v9675_v44 }
 0x4d5   :  { %v3077_v3 = vsub.f32 %v9672_v28, %v3076_v35 }
 0x4d6   :  { %v3083_v15 = vsub.f32 %v9675_v44, %v3082_v12 }
 0x4d7   :  { %v3078_v9 = vand.u32 4294901760, %v3077_v3  ;;  %v12855_v3 = vand.u32 4294901760, %v9386_v48 }
 0x4d8   :  { %v3084_v29 = vand.u32 4294901760, %v3083_v15 }
 0x4d9   :  { %3079 = vmatprep.mubr.f32.mxu1 %v3078_v9  ;;  %v6492_v15 = vpack.c.bf16 %v12855_v3, %v12854_v25  ;;  %v9968_v25 = vld [vmem:[%s11734_s2 + $0x50] sm:$0xff] }
 0x4da   :  { %3085 = vmatmul.mubr.f32.vlgmr.msra.gmra.mrb[2].mxu1 %v3084_v29 }
 0x4db   :  { %6391 = vmatpush1.bf16.msra.mxu1 %v9548_v53  ;;  %3270 = vmatprep.mubr.f32.mxu1 %v9667_v49  ;;  %v9702_v53 = vsub.f32 %v9519_v2, %v9529_v19  ;;  %v12842_v2 = vpack.c.bf16 %v9386_v48, %v9375_v4  ;;  %v12860_v4 = vand.u32 4294901760, %v9420_v51  ;;  %v12861_v48 = vand.u32 4294901760, %v9422_v26 }
 0x4dc   :  { %6392 = vmatprep.subr.bf16.mxu1 %v12049_v14 }
 0x4df   :  { %6394 = vmatpush1.bf16.msra.mxu1 %v9553_v7  ;;  %v3247_v7 = vand.u32 4294901760, %v9702_v53 }
 0x4e0   :  { %6395 = vmatprep.subr.bf16.mxu1 %v12049_v14 }
 0x4e3   :  { %6397 = vmatpush1.bf16.msra.mxu1 %v9569_v10  ;;  %v3248_v10 = vsub.f32 %v9702_v53, %v3247_v7 }
 0x4e4   :  { %6398 = vmatprep.subr.bf16.mxu1 %v12049_v14 }
 0x4e7   :  { %6400 = vmatpush1.bf16.msra.mxu1 %v9573_v62  ;;  %v3249_v62 = vand.u32 4294901760, %v3248_v10  ;;  %v6501_v10 = vpack.c.bf16 %v12861_v48, %v12860_v4  ;;  %v10009_v4 = vld [vmem:[%s11734_s2 + $0x70] sm:$0xff]  ;;  %v10014_v48 = vld [vmem:[%s11734_s2 + $0x88] sm:$0xff] }
 0x4e8   :  { %6401 = vmatprep.subr.bf16.mxu1 %v12049_v14 }
 0x4eb   :  { %6403 = vmatpush1.bf16.msra.mxu1 %v9583_v33  ;;  %v12844_v33 = vpack.c.bf16 %v9409_v18, %v9407_v63 }
 0x4ec   :  { %6404 = vmatprep.subr.bf16.mxu1 %v12049_v14 }
 0x4ef   :  { %6406 = vmatpush1.bf16.msra.mxu1 %v9593_v17  ;;  %v12845_v17 = vpack.c.bf16 %v9422_v26, %v9420_v51  ;;  %v12866_v51 = vand.u32 4294901760, %v9443_v36  ;;  %v12867_v26 = vand.u32 4294901760, %v9445_v30 }
 0x4f0   :  { %6407 = vmatprep.subr.bf16.mxu1 %v12049_v14 }
 0x4f3   :  { %6409 = vmatpush1.bf16.msra.mxu1 %v9603_v6  ;;  %v12846_v6 = vpack.c.bf16 %v9432_v61, %v9430_v23 }
 0x4f4   :  { %6410 = vmatprep.subr.bf16.mxu1 %v12049_v14 }
 0x4f7   :  { %6412 = vmatpush1.bf16.msra.mxu1 %v9613_v1  ;;  %v12847_v1 = vpack.c.bf16 %v9441_v8, %v9439_v31 }
 0x4f8   :  { %6413 = vmatprep.subr.bf16.mxu1 %v12049_v14 }
 0x4fb   :  { %6415 = vmatpush1.bf16.msra.mxu1 %v6414_v16  ;;  %v12848_v16 = vpack.c.bf16 %v9445_v30, %v9443_v36  ;;  %v12872_v36 = vand.u32 4294901760, %v9508_v13  ;;  %v12873_v30 = vand.u32 4294901760, %v9516_v11 }
 0x4fc   :  { %6416 = vmatprep.subr.bf16.mxu1 %v12049_v14 }
 0x4ff   :  { %6418 = vmatpush1.bf16.msra.mxu1 %v6417_v46  ;;  %v12850_v46 = vpack.c.bf16 %v9502_v41, %v9500_v39 }
 0x500   :  { %6419 = vmatprep.subr.bf16.mxu1 %v12049_v14 }
 0x503   :  { %6421 = vmatpush1.bf16.msra.mxu1 %v6420_v54  ;;  %v12843_v54 = vpack.c.bf16 %v9396_v34, %v9388_v42 }
 0x504   :  { %3244 = vmatprep.subr.mxu1 %v12841_v57 }
 0x507   :  { %3250 = vmatpush1.msra.mxu1 %v3249_v62 }
 0x508   :  { %3272 = vmatmul.mubr.f32.vlgmr.msra.gmra.mrb[2].mxu1 %v9669_v45  ;;  %6422 = vmatprep.subr.bf16.mxu1 %v12049_v14 }
 0x509   :  { %6424 = vmatpush1.bf16.msra.mxu1 %v6423_v50  ;;  %3389 = vmatprep.mubr.f32.mxu1 %v9672_v28  ;;  %v12851_v50 = vpack.c.bf16 %v9516_v11, %v9508_v13  ;;  %v12852_v28 = vand.u32 4294901760, %v9371_v43  ;;  %v12856_v43 = vand.u32 4294901760, %v9388_v42  ;;  %v12862_v42 = vand.u32 4294901760, %v9430_v23 }
 0x50a   :  { %6425 = vmatprep.subr.bf16.mxu1 %v12049_v14  ;;  %v12868_v23 = vand.u32 4294901760, %v9477_v24  ;;  %v9904_v24 = vld [vmem:[%s11734_s2 + $0x38] sm:$0xff] }
 0x50b   :  { %v12072_v11 = vand.u32 4294901760, %v9904_v24 }
 0x50d   :  { %6427 = vmatpush1.bf16.msra.mxu1 %v12842_v2 }
 0x50e   :  { %6428 = vmatprep.subr.bf16.mxu1 %v12049_v14 }
 0x511   :  { %6430 = vmatpush1.bf16.msra.mxu1 %v12843_v54  ;;  %v6510_v54 = vpack.c.bf16 %v12867_v26, %v12866_v51  ;;  %v10042_v51 = vld [vmem:[%s11734_s2 + $0x80] sm:$0xff]  ;;  %v10047_v26 = vld [vmem:[%s11734_s2 + $0x90] sm:$0xff] }
 0x512   :  { %6431 = vmatprep.subr.bf16.mxu1 %v12049_v14 }
 0x515   :  { %6433 = vmatpush1.bf16.msra.mxu1 %v12844_v33 }
 0x516   :  { %6434 = vmatprep.subr.bf16.mxu1 %v12049_v14 }
 0x519   :  { %6436 = vmatpush1.bf16.msra.mxu1 %v12845_v17 }
 0x51a   :  { %6437 = vmatprep.subr.bf16.mxu1 %v12049_v14 }
 0x51d   :  { %6439 = vmatpush1.bf16.msra.mxu1 %v12846_v6  ;;  %v6519_v6 = vpack.c.bf16 %v12873_v30, %v12872_v36 }
 0x51e   :  { %6440 = vmatprep.subr.bf16.mxu1 %v12049_v14 }
 0x521   :  { %6442 = vmatpush1.bf16.msra.mxu1 %v12847_v1  ;;  %v9935_v1 = vld [vmem:[%s11734_s2 + $0x58] sm:$0xff] }
 0x522   :  { %6443 = vmatprep.subr.bf16.mxu1 %v12049_v14 }
 0x525   :  { %6445 = vmatpush1.bf16.msra.mxu1 %v12848_v16 }
 0x526   :  { %6446 = vmatprep.subr.bf16.mxu1 %v12049_v14 }
 0x529   :  { %6448 = vmatpush1.bf16.msra.mxu1 %v12849_v27 }
 0x52a   :  { %6449 = vmatprep.subr.bf16.mxu1 %v12049_v14 }
 0x52d   :  { %6451 = vmatpush1.bf16.msra.mxu1 %v12850_v46 }
 0x52e   :  { %6452 = vmatprep.subr.bf16.mxu1 %v12049_v14 }
 0x531   :  { %6454 = vmatpush1.bf16.msra.mxu1 %v12851_v50 }
 0x532   :  { %3365 = vmatprep.subr.mxu1 %v12841_v57 }
 0x535   :  { %3368 = vmatpush1.msra.mxu1 %v9702_v53 }
 0x536   :  { %3392 = vmatmul.mubr.f32.vlgmr.msra.gmra.mrb[2].mxu1 %v9675_v44  ;;  %6455 = vmatprep.subr.bf16.mxu1 %v12049_v14  ;;  %v12858_v44 = vand.u32 4294901760, %v9407_v63  ;;  %v12864_v63 = vand.u32 4294901760, %v9439_v31  ;;  %v12870_v31 = vand.u32 4294901760, %v9500_v39 }
 0x537   :  { %6457 = vmatpush1.bf16.msra.mxu1 %v9369_v5  ;;  %3487 = vmatprep.mubr.f32.mxu1 %v3076_v35  ;;  %v12853_v35 = vand.u32 4294901760, %v9373_v56  ;;  %v12857_v56 = vand.u32 4294901760, %v9396_v34  ;;  %v12863_v34 = vand.u32 4294901760, %v9432_v61  ;;  %v12869_v61 = vand.u32 4294901760, %v9479_v47 }
 0x538   :  { %6458 = vmatprep.subr.bf16.mxu1 %v12049_v14 }
 0x539   :  { %v6489_v22 = vpack.c.bf16 %v12853_v35, %v12852_v28  ;;  %v6495_v9 = vpack.c.bf16 %v12857_v56, %v12856_v43  ;;  %v6504_v62 = vpack.c.bf16 %v12863_v34, %v12862_v42  ;;  %v6513_v33 = vpack.c.bf16 %v12869_v61, %v12868_v23  ;;  %v9979_v43 = vld [vmem:[%s11734_s2 + $0x78] sm:$0xff] }
 0x53a   :  { %v12064_v35 = vand.u32 4294901760, %v9935_v1  ;;  %v10057_v23 = vld [vmem:[%s11734_s2 + $0xb8] sm:$0xff]  ;;  %v10060_v61 = vand.u32 4294901760, %v9649_v58 }
 0x53b   :  { %6460 = vmatpush1.bf16.msra.mxu1 %v9394_v32  ;;  %v12059_v30 = vand.u32 4294901760, %v10057_v23 }
 0x53c   :  { %6461 = vmatprep.subr.bf16.mxu1 %v12049_v14  ;;  %12883 = vst [vmem:[#allocation89_spill] sm:$0xff] %v10060_v61 }
 0x53f   :  { %6463 = vmatpush1.bf16.msra.mxu1 %v9428_v38 }
 0x540   :  { %6464 = vmatprep.subr.bf16.mxu1 %v12049_v14 }
 0x543   :  { %6466 = vmatpush1.bf16.msra.mxu1 %v9448_v55 }
 0x544   :  { %6467 = vmatprep.subr.bf16.mxu1 %v12049_v14 }
 0x547   :  { %6469 = vmatpush1.bf16.msra.mxu1 %v9452_v37 }
 0x548   :  { %6470 = vmatprep.subr.bf16.mxu1 %v12049_v14 }
 0x54b   :  { %6472 = vmatpush1.bf16.msra.mxu1 %v9456_v40 }
 0x54c   :  { %6473 = vmatprep.subr.bf16.mxu1 %v12049_v14 }
 0x54f   :  { %6475 = vmatpush1.bf16.msra.mxu1 %v9460_v21 }
 0x550   :  { %6476 = vmatprep.subr.bf16.mxu1 %v12049_v14 }
 0x553   :  { %6478 = vmatpush1.bf16.msra.mxu1 %v9464_v20 }
 0x554   :  { %6479 = vmatprep.subr.bf16.mxu1 %v12049_v14 }
 0x557   :  { %6481 = vmatpush1.bf16.msra.mxu1 %v9475_v0 }
 0x558   :  { %6482 = vmatprep.subr.bf16.mxu1 %v12049_v14 }
 0x55b   :  { %6484 = vmatpush1.bf16.msra.mxu1 %v9498_v60 }
 0x55c   :  { %6485 = vmatprep.subr.bf16.mxu1 %v12049_v14 }
 0x55f   :  { %6487 = vmatpush1.bf16.msra.mxu1 %v9514_v52 }
 0x560   :  { %3463 = vmatprep.subr.mxu1 %v12841_v57 }
 0x563   :  { %3465 = vmatpush1.msra.mxu1 %v9529_v19 }
 0x564   :  { %3491 = vmatmul.mubr.f32.vlgmr.msra.gmra.mrb[2].mxu1 %v3082_v12  ;;  %6488 = vmatprep.subr.bf16.mxu1 %v12049_v14  ;;  %v12859_v12 = vand.u32 4294901760, %v9409_v18  ;;  %v12865_v18 = vand.u32 4294901760, %v9441_v8  ;;  %v12871_v8 = vand.u32 4294901760, %v9502_v41 }
 0x565   :  { %6490 = vmatpush1.bf16.msra.mxu1 %v6489_v22  ;;  %3630 = vmatprep.mubr.f32.mxu1 %v9667_v49  ;;  %v9963_v22 = vld [vmem:[%s11734_s2 + $0x40] sm:$0xff] }
 0x566   :  { %6491 = vmatprep.subr.bf16.mxu1 %v12049_v14  ;;  %v6498_v29 = vpack.c.bf16 %v12859_v12, %v12858_v44  ;;  %v6507_v2 = vpack.c.bf16 %v12865_v18, %v12864_v63  ;;  %v6516_v17 = vpack.c.bf16 %v12871_v8, %v12870_v31  ;;  %v12063_v56 = vand.u32 4294901760, %v9963_v22 }
 0x567   :  { %v12058_v12 = vand.u32 4294901760, %v9979_v43  ;;  %v12053_v18 = vand.u32 4294901760, %v10014_v48  ;;  %v12057_v31 = vand.u32 4294901760, %v10042_v51  ;;  %v12056_v8 = vand.u32 4294901760, %v10047_v26 }
 0x569   :  { %6493 = vmatpush1.bf16.msra.mxu1 %v6492_v15  ;;  %v9974_v15 = vld [vmem:[%s11734_s2 + $0x68] sm:$0xff] }
 0x56a   :  { %6494 = vmatprep.subr.bf16.mxu1 %v12049_v14  ;;  %v12061_v44 = vand.u32 4294901760, %v9974_v15 }
 0x56c   :  { %v10035_v63 = vpack.c.bf16 %v12058_v12, %v12061_v44  ;;  %v10135_v12 = vld [vmem:[%s11734_s2 + $0xe8] sm:$0xff] }
 0x56d   :  { %6496 = vmatpush1.bf16.msra.mxu1 %v6495_v9  ;;  %v12062_v9 = vand.u32 4294901760, %v9968_v25 }
 0x56e   :  { %6497 = vmatprep.subr.bf16.mxu1 %v12049_v14  ;;  %12882 = vst [vmem:[#allocation20_spill] sm:$0xff] %v10035_v63 }
 0x56f   :  { %v10026_v42 = vpack.c.bf16 %v12062_v9, %v12063_v56 }
 0x571   :  { %6499 = vmatpush1.bf16.msra.mxu1 %v6498_v29  ;;  %v10004_v29 = vld [vmem:[%s11734_s2 + $0x60] sm:$0xff]  ;;  %12881 = vst [vmem:[#allocation86_spill] sm:$0xff] %v10026_v42 }
 0x572   :  { %6500 = vmatprep.subr.bf16.mxu1 %v12049_v14  ;;  %v12055_v34 = vand.u32 4294901760, %v10004_v29 }
 0x575   :  { %6502 = vmatpush1.bf16.msra.mxu1 %v6501_v10  ;;  %v10019_v10 = vld [vmem:[%s11734_s2 + $0x98] sm:$0xff] }
 0x576   :  { %6503 = vmatprep.subr.bf16.mxu1 %v12049_v14 }
 0x579   :  { %6505 = vmatpush1.bf16.msra.mxu1 %v6504_v62  ;;  %v12054_v62 = vand.u32 4294901760, %v10009_v4 }
 0x57a   :  { %6506 = vmatprep.subr.bf16.mxu1 %v12049_v14 }
 0x57d   :  { %6508 = vmatpush1.bf16.msra.mxu1 %v6507_v2  ;;  %v12052_v2 = vand.u32 4294901760, %v10019_v10 }
 0x57e   :  { %6509 = vmatprep.subr.bf16.mxu1 %v12049_v14 }
 0x581   :  { %6511 = vmatpush1.bf16.msra.mxu1 %v6510_v54  ;;  %v10052_v54 = vld [vmem:[%s11734_s2 + $0xa8] sm:$0xff] }
 0x582   :  { %6512 = vmatprep.subr.bf16.mxu1 %v12049_v14  ;;  %v12060_v36 = vand.u32 4294901760, %v10052_v54 }
 0x585   :  { %6514 = vmatpush1.bf16.msra.mxu1 %v6513_v33  ;;  %v10067_v33 = vpack.c.bf16 %v12054_v62, %v12055_v34 }
 0x586   :  { %6515 = vmatprep.subr.bf16.mxu1 %v12049_v14 }
 0x587   :  { %12884 = vst [vmem:[#allocation94_spill] sm:$0xff] %v10067_v33 }
 0x589   :  { %6517 = vmatpush1.bf16.msra.mxu1 %v6516_v17  ;;  %v10076_v17 = vpack.c.bf16 %v12052_v2, %v12053_v18 }
 0x58a   :  { %6518 = vmatprep.subr.bf16.mxu1 %v12049_v14 }
 0x58b   :  { %12885 = vst [vmem:[#allocation15_spill] sm:$0xff] %v10076_v17 }
 0x58d   :  { %6520 = vmatpush1.bf16.msra.mxu1 %v6519_v6  ;;  %v10083_v6 = vld [vmem:[%s11734_s2 + $0xa0] sm:$0xff] }
 0x58e   :  { %3606 = vmatprep.subr.mxu1 %v12841_v57  ;;  %v12068_v2 = vand.u32 4294901760, %v10083_v6 }
 0x591   :  { %3610 = vmatpush1.msra.mxu1 %v3247_v7  ;;  %v9930_v7 = vld [vmem:[%s11734_s2 + $0x48] sm:$0xff] }
 0x592   :  { %3632 = vmatmul.mubr.f32.vlgmr.msra.gmra.mrb[2].mxu1 %v9669_v45  ;;  %6521 = vmatprep.subr.bf16.mxu1 %v12049_v14  ;;  %v12065_v28 = vand.u32 4294901760, %v9930_v7 }
 0x593   :  { %6523 = vmatpush1.bf16.msra.mxu1 %v9369_v5  ;;  %3725 = vmatprep.mubr.f32.mxu1 %v9667_v49  ;;  %v3793_v5 = vsel %vm215_vm6, %v9653_v59, 0  ;;  %v9916_v49 = vld [vmem:[%s11734_s2 + $0x20] sm:$0xff]  ;;  %v9921_v59 = vld [vmem:[%s11734_s2 + $0x30] sm:$0xff] }
 0x594   :  { %6524 = vmatprep.subr.bf16.mxu1 %v12049_v14  ;;  %v12069_v27 = vand.u32 4294901760, %v9916_v49  ;;  %v12066_v46 = vand.u32 4294901760, %v9921_v59 }
 0x597   :  { %6526 = vmatpush1.bf16.msra.mxu1 %v9394_v32  ;;  %v9865_v32 = vand.u32 4294901760, %v3793_v5 }
 0x598   :  { %6527 = vmatprep.subr.bf16.mxu1 %v12049_v14 }
 0x599   :  { %12874 = vst [vmem:[#allocation74_spill] sm:$0xff] %v9865_v32 }
 0x59b   :  { %6529 = vmatpush1.bf16.msra.mxu1 %v9428_v38  ;;  %v9870_v38 = vsub.f32 %v3793_v5, %v9865_v32  ;;  %v10088_v5 = vld [vmem:[%s11734_s2 + $0xb0] sm:$0xff] }
 0x59c   :  { %6530 = vmatprep.subr.bf16.mxu1 %v12049_v14  ;;  %v12067_v18 = vand.u32 4294901760, %v10088_v5 }
 0x59d   :  { %12875 = vst [vmem:[#allocation14_spill] sm:$0xff] %v9870_v38 }
 0x59e   :  { %v10148_v44 = vpack.c.bf16 %v12067_v18, %v12068_v2  ;;  %v10164_v18 = vld [vmem:[%s11734_s2 + $0xe0] sm:$0xff]  ;;  %v10169_v2 = vld [vmem:[%s11734_s2 + $0xf0] sm:$0xff] }
 0x59f   :  { %6532 = vmatpush1.bf16.msra.mxu1 %v9448_v55  ;;  %v9877_v55 = vld [vmem:[%s11734_s2 + $0x8] sm:$0xff] }
 0x5a0   :  { %6533 = vmatprep.subr.bf16.mxu1 %v12049_v14  ;;  %v12080_v47 = vand.u32 4294901760, %v9877_v55  ;;  %12889 = vst [vmem:[#allocation91_spill] sm:$0xff] %v10148_v44 }
 0x5a3   :  { %6535 = vmatpush1.bf16.msra.mxu1 %v9452_v37  ;;  %v9882_v37 = vld [vmem:[%s11734_s2 + $0x18] sm:$0xff] }
 0x5a4   :  { %6536 = vmatprep.subr.bf16.mxu1 %v12049_v14  ;;  %v12077_v39 = vand.u32 4294901760, %v9882_v37 }
 0x5a7   :  { %6538 = vmatpush1.bf16.msra.mxu1 %v9456_v40  ;;  %v9887_v40 = vld [vmem:[%s11734_s2] sm:$0xff] }
 0x5a8   :  { %6539 = vmatprep.subr.bf16.mxu1 %v12049_v14  ;;  %v12076_v41 = vand.u32 4294901760, %v9887_v40 }
 0x5ab   :  { %6541 = vmatpush1.bf16.msra.mxu1 %v9460_v21  ;;  %v9892_v21 = vld [vmem:[%s11734_s2 + $0x10] sm:$0xff] }
 0x5ac   :  { %6542 = vmatprep.subr.bf16.mxu1 %v12049_v14 }
 0x5af   :  { %6544 = vmatpush1.bf16.msra.mxu1 %v9464_v20  ;;  %v12051_v20 = vand.u32 4294901760, %v9870_v38 }
 0x5b0   :  { %6545 = vmatprep.subr.bf16.mxu1 %v12049_v14 }
 0x5b1   :  { %v3918_v53 = vsub.f32 %v9870_v38, %v12051_v20  ;;  %v10109_v20 = vpack.c.bf16 %v12056_v8, %v12057_v31  ;;  %v10125_v8 = vld [vmem:[%s11734_s2 + $0xc0] sm:$0xff]  ;;  %v10130_v31 = vld [vmem:[%s11734_s2 + $0xd0] sm:$0xff] }
 0x5b2   :  { %v12079_v9 = vand.u32 4294901760, %v10125_v8  ;;  %v12078_v56 = vand.u32 4294901760, %v10130_v31 }
 0x5b3   :  { %6547 = vmatpush1.bf16.msra.mxu1 %v9475_v0  ;;  %v9899_v0 = vld [vmem:[%s11734_s2 + $0x28] sm:$0xff]  ;;  %v3919_v3 = vand.u32 4294901760, %v3918_v53  ;;  %12887 = vst [vmem:[#allocation88_spill] sm:$0xff] %v10109_v20 }
 0x5b4   :  { %6548 = vmatprep.subr.bf16.mxu1 %v12049_v14  ;;  %v12073_v13 = vand.u32 4294901760, %v9899_v0  ;;  %v10093_v53 = vld [vmem:[%s11734_s2 + $0xc8] sm:$0xff] }
 0x5b5   :  { %v12071_v62 = vand.u32 4294901760, %v10093_v53 }
 0x5b6   :  { %v9956_v50 = vpack.c.bf16 %v12072_v11, %v12073_v13  ;;  %v10191_v11 = vpack.c.bf16 %v12078_v56, %v12079_v9  ;;  %v12093_v13 = vand.u32 4294901760, %v10164_v18  ;;  %v10207_v56 = vld [vmem:[%s11734_s2 + $0x100] sm:$0xff]  ;;  %v10212_v9 = vld [vmem:[%s11734_s2 + $0x110] sm:$0xff] }
 0x5b7   :  { %6550 = vmatpush1.bf16.msra.mxu1 %v9498_v60  ;;  %v12074_v60 = vand.u32 4294901760, %v9892_v21 }
 0x5b8   :  { %6551 = vmatprep.subr.bf16.mxu1 %v12049_v14  ;;  %12878 = vst [vmem:[#allocation13_spill] sm:$0xff] %v9956_v50  ;;  %v10102_v14 = vsub.f32 %v9649_v58, %v10060_v61  ;;  %v10118_v58 = vpack.c.bf16 %v12059_v30, %v12060_v36  ;;  %v10140_v30 = vld [vmem:[%s11734_s2 + $0xf8] sm:$0xff]  ;;  %12891 = vst [vmem:[#allocation23_spill] sm:$0xff] %v10191_v11 }
 0x5b9   :  { %v9948_v16 = vpack.c.bf16 %v12074_v60, %v12076_v41  ;;  %v12092_v60 = vand.u32 4294901760, %v10169_v2 }
 0x5ba   :  { %12886 = vst [vmem:[#allocation96_spill] sm:$0xff] %v10102_v14  ;;  %12888 = vst [vmem:[#allocation90_spill] sm:$0xff] %v10118_v58  ;;  %v12075_v36 = vand.u32 4294901760, %v10102_v14 }
 0x5bb   :  { %6553 = vmatpush1.bf16.msra.mxu1 %v9514_v52  ;;  %v9942_v52 = vpack.c.bf16 %v12077_v39, %v12080_v47  ;;  %12877 = vst [vmem:[#allocation17_spill] sm:$0xff] %v9948_v16  ;;  %v10217_v47 = vld [vmem:[%s11734_s2 + $0x128] sm:$0xff]  ;;  %v10230_v39 = vpack.c.bf16 %v12092_v60, %v12093_v13  ;;  %v12903_v13 = vand.u32 4294901760, %v9892_v21 }
 0x5bc   :  { %3703 = vmatprep.subr.mxu1 %v12841_v57  ;;  %v10251_v57 = vld [vmem:[%s11734_s2 + $0x120] sm:$0xff] }
 0x5bd   :  { %12876 = vst [vmem:[#allocation78_spill] sm:$0xff] %v9942_v52  ;;  %12893 = vst [vmem:[#allocation93_spill] sm:$0xff] %v10230_v39  ;;  %v10271_v60 = vsub.f32 %v9892_v21, %v12903_v13  ;;  %v12908_v13 = vand.u32 4294901760, %v9916_v49 }
 0x5bf   :  { %3705 = vmatpush1.msra.mxu1 %v9529_v19  ;;  %v9988_v19 = vpack.c.bf16 %v12066_v46, %v12069_v27  ;;  %v12081_v46 = vand.u32 4294901760, %v10140_v30  ;;  %v10174_v27 = vld [vmem:[%s11734_s2 + $0x108] sm:$0xff]  ;;  %12904 = vst [vmem:[#allocation11_spill] sm:$0xff] %v10271_v60 }
 0x5c0   :  { %3727 = vmatmul.mubr.f32.vlgmr.msra.gmra.mrb[2].mxu1 %v9669_v45  ;;  %6555 = vmatprep.subr.bf16.mxu1 %v9942_v52  ;;  %v9997_v45 = vpack.c.bf16 %v12064_v35, %v12065_v28  ;;  %v12082_v28 = vand.u32 4294901760, %v10135_v12 }
 0x5c1   :  { %6557 = vmatpush1.bf16.msra.mxu1 %v9948_v16  ;;  %3920 = vmatprep.mubr.f32.mxu1 %v3919_v3  ;;  %12879 = vst [vmem:[#allocation84_spill] sm:$0xff] %v9988_v19  ;;  %v10098_v3 = vld [vmem:[%s11734_s2 + $0xd8] sm:$0xff] }
 0x5c2   :  { %6559 = vmatprep.subr.bf16.mxu1 %v9956_v50  ;;  %12880 = vst [vmem:[#allocation19_spill] sm:$0xff] %v9997_v45  ;;  %v12070_v34 = vand.u32 4294901760, %v10098_v3  ;;  %v12936_v50 = vand.u32 4294901760, %v10047_v26  ;;  %v12951_v38 = vand.u32 4294901760, %v10098_v3 }
 0x5c4   :  { %v10157_v35 = vpack.c.bf16 %v12070_v34, %v12071_v62  ;;  %v10179_v34 = vld [vmem:[%s11734_s2 + $0x118] sm:$0xff]  ;;  %v10184_v62 = vsub.f32 %v10102_v14, %v12075_v36  ;;  %v10200_v36 = vpack.c.bf16 %v12081_v46, %v12082_v28  ;;  %v12896_v28 = vand.u32 4294901760, %v10174_v27 }
 0x5c5   :  { %6561 = vmatpush1.bf16.msra.mxu1 %v9988_v19  ;;  %v10222_v46 = vld [vmem:[%s11734_s2 + $0x138] sm:$0xff]  ;;  %v12950_v14 = vand.u32 4294901760, %v10093_v53 }
 0x5c6   :  { %6563 = vmatprep.subr.bf16.mxu1 %v9997_v45  ;;  %12890 = vst [vmem:[#allocation92_spill] sm:$0xff] %v10157_v35  ;;  %12892 = vst [vmem:[#allocation12_spill] sm:$0xff] %v10200_v36  ;;  %v12935_v45 = vand.u32 4294901760, %v10042_v51 }
 0x5c7   :  { %v10462_v52 = vsub.f32 %v10093_v53, %v12950_v14  ;;  %v10483_v14 = vld [vmem:[%s11734_s2 + $0x180] sm:$0xff] }
 0x5c8   :  { %v10394_v19 = vsub.f32 %v10042_v51, %v12935_v45  ;;  %v10413_v45 = vld [vmem:[%s11734_s2 + $0x160] sm:$0xff] }
 0x5c9   :  { %6565 = vmatpush1.bf16.msra.mxu1 %v10026_v42 }
 0x5ca   :  { %6567 = vmatprep.subr.bf16.mxu1 %v10035_v63  ;;  %v12914_v63 = vand.u32 4294901760, %v9935_v1 }
 0x5cd   :  { %6569 = vmatpush1.bf16.msra.mxu1 %v10067_v33 }
 0x5ce   :  { %6571 = vmatprep.subr.bf16.mxu1 %v10076_v17  ;;  %v12912_v17 = vand.u32 4294901760, %v9930_v7 }
 0x5d0   :  { %v10306_v33 = vsub.f32 %v9930_v7, %v12912_v17  ;;  %v12919_v7 = vand.u32 4294901760, %v9963_v22 }
 0x5d1   :  { %6573 = vmatpush1.bf16.msra.mxu1 %v10109_v20 }
 0x5d2   :  { %6575 = vmatprep.subr.bf16.mxu1 %v10118_v58  ;;  %12913 = vst [vmem:[#allocation24_spill] sm:$0xff] %v10306_v33  ;;  %v10325_v17 = vsub.f32 %v9963_v22, %v12919_v7  ;;  %v10344_v22 = vld [vmem:[%s11734_s2 + $0x150] sm:$0xff]  ;;  %v12925_v7 = vand.u32 4294901760, %v9968_v25 }
 0x5d3   :  { %12924 = vst [vmem:[#allocation47_spill] sm:$0xff] %v10344_v22  ;;  %v12956_v53 = vand.u32 4294901760, %v10344_v22 }
 0x5d5   :  { %6577 = vmatpush1.bf16.msra.mxu1 %v10148_v44 }
 0x5d6   :  { %6579 = vmatprep.subr.bf16.mxu1 %v10157_v35  ;;  %v12894_v35 = vand.u32 4294901760, %v9877_v55 }
 0x5d8   :  { %v10237_v44 = vsub.f32 %v9877_v55, %v12894_v35  ;;  %v10256_v55 = vld [vmem:[%s11734_s2 + $0x130] sm:$0xff]  ;;  %v12899_v35 = vand.u32 4294901760, %v9882_v37 }
 0x5d9   :  { %6581 = vmatpush1.bf16.msra.mxu1 %v10191_v11  ;;  %v12897_v11 = vand.u32 4294901760, %v10179_v34 }
 0x5da   :  { %12895 = vst [vmem:[#allocation79_spill] sm:$0xff] %v10237_v44  ;;  %6583 = vmatprep.subr.bf16.mxu1 %v10200_v36  ;;  %v10261_v41 = vsub.f32 %v9882_v37, %v12899_v35  ;;  %v12905_v36 = vand.u32 4294901760, %v9899_v0  ;;  %v10281_v37 = vld [vmem:[%s11734_s2 + $0x148] sm:$0xff]  ;;  %v12907_v35 = vand.u32 4294901760, %v9904_v24 }
 0x5db   :  { %v10244_v58 = vpack.c.bf16 %v12897_v11, %v12896_v28  ;;  %v12901_v11 = vand.u32 4294901760, %v9887_v40 }
 0x5dc   :  { %12900 = vst [vmem:[#allocation81_spill] sm:$0xff] %v10261_v41  ;;  %v10276_v20 = vsub.f32 %v9899_v0, %v12905_v36  ;;  %v10291_v21 = vsub.f32 %v9904_v24, %v12907_v35  ;;  %v10296_v0 = vsub.f32 %v9916_v49, %v12908_v13  ;;  %v12910_v36 = vand.u32 4294901760, %v9921_v59 }
 0x5dd   :  { %12898 = vst [vmem:[#allocation80_spill] sm:$0xff] %v10244_v58  ;;  %v10266_v28 = vsub.f32 %v9887_v40, %v12901_v11  ;;  %v10286_v40 = vld [vmem:[%s11734_s2 + $0x158] sm:$0xff]  ;;  %v10311_v24 = vsub.f32 %v9935_v1, %v12914_v63  ;;  %6585 = vmatpush1.bf16.msra.mxu1 %v10230_v39  ;;  %v12916_v49 = vand.u32 4294901760, %v10207_v56  ;;  %v12917_v35 = vand.u32 4294901760, %v10212_v9 }
 0x5de   :  { %12906 = vst [vmem:[#allocation83_spill] sm:$0xff] %v10276_v20  ;;  %12909 = vst [vmem:[#allocation85_spill] sm:$0xff] %v10296_v0  ;;  %v10301_v11 = vsub.f32 %v9921_v59, %v12910_v36  ;;  %6587 = vmatprep.subr.bf16.mxu1 %v10244_v58  ;;  %v12920_v1 = vand.u32 4294901760, %v10217_v47  ;;  %v12921_v63 = vand.u32 4294901760, %v10222_v46  ;;  %v10339_v36 = vld [vmem:[%s11734_s2 + $0x140] sm:$0xff]  ;;  %v10349_v59 = vsub.f32 %v9968_v25, %v12925_v7  ;;  %v10369_v25 = vld [vmem:[%s11734_s2 + $0x168] sm:$0xff] }
 0x5df   :  { %12902 = vst [vmem:[#allocation82_spill] sm:$0xff] %v10266_v28  ;;  %12915 = vst [vmem:[#allocation25_spill] sm:$0xff] %v10311_v24  ;;  %v10318_v13 = vpack.c.bf16 %v12917_v35, %v12916_v49  ;;  %v12928_v35 = vand.u32 4294901760, %v9979_v43  ;;  %v12930_v58 = vand.u32 4294901760, %v10004_v29  ;;  %v12932_v7 = vand.u32 4294901760, %v10009_v4 }
 0x5e0   :  { %12911 = vst [vmem:[#allocation87_spill] sm:$0xff] %v10301_v11  ;;  %v10332_v39 = vpack.c.bf16 %v12921_v63, %v12920_v1  ;;  %12923 = vst [vmem:[#allocation44_spill] sm:$0xff] %v10339_v36  ;;  %v12926_v1 = vand.u32 4294901760, %v9974_v15 }
 0x5e1   :  { %12918 = vst [vmem:[#allocation41_spill] sm:$0xff] %v10318_v13  ;;  %v10359_v49 = vsub.f32 %v9979_v43, %v12928_v35  ;;  %v10364_v42 = vsub.f32 %v10004_v29, %v12930_v58  ;;  %v10379_v43 = vsub.f32 %v10009_v4, %v12932_v7  ;;  %v12933_v35 = vand.u32 4294901760, %v10014_v48  ;;  %6589 = vmatpush1.bf16.msra.mxu1 %v10318_v13  ;;  %v10432_v13 = vld [vmem:[%s11734_s2 + $0x170] sm:$0xff] }
 0x5e2   :  { %12922 = vst [vmem:[#allocation42_spill] sm:$0xff] %v10332_v39  ;;  %v10354_v63 = vsub.f32 %v9974_v15, %v12926_v1  ;;  %v10374_v15 = vld [vmem:[%s11734_s2 + $0x178] sm:$0xff]  ;;  %v12934_v58 = vand.u32 4294901760, %v10019_v10  ;;  %v10399_v4 = vsub.f32 %v10047_v26, %v12936_v50  ;;  %v12938_v7 = vand.u32 4294901760, %v10256_v55  ;;  %6591 = vmatprep.subr.bf16.mxu1 %v10332_v39  ;;  %12944 = vst [vmem:[#allocation61_spill] sm:$0xff] %v10432_v13 }
 0x5e3   :  { %12929 = vst [vmem:[#allocation52_spill] sm:$0xff] %v10359_v49  ;;  %12931 = vst [vmem:[#allocation55_spill] sm:$0xff] %v10374_v15  ;;  %v10384_v29 = vsub.f32 %v10014_v48, %v12933_v35  ;;  %v12937_v48 = vand.u32 4294901760, %v10251_v57  ;;  %v12940_v50 = vand.u32 4294901760, %v10052_v54  ;;  %v12941_v26 = vand.u32 4294901760, %v10281_v37 }
 0x5e4   :  { %12927 = vst [vmem:[#allocation51_spill] sm:$0xff] %v10354_v63  ;;  %v10389_v1 = vsub.f32 %v10019_v10, %v12934_v58  ;;  %v12948_v10 = vand.u32 4294901760, %v10083_v6  ;;  %v12949_v39 = vand.u32 4294901760, %v10088_v5 }
 0x5e5   :  { %v10406_v35 = vpack.c.bf16 %v12938_v7, %v12937_v48  ;;  %v10418_v51 = vsub.f32 %v10052_v54, %v12940_v50  ;;  %v12942_v48 = vand.u32 4294901760, %v10286_v40  ;;  %v10437_v54 = vld [vmem:[%s11734_s2 + $0x188] sm:$0xff]  ;;  %v10442_v50 = vld [vmem:[%s11734_s2 + $0x198] sm:$0xff] }
 0x5e6   :  { %12945 = vst [vmem:[#allocation62_spill] sm:$0xff] %v10437_v54  ;;  %12946 = vst [vmem:[#allocation63_spill] sm:$0xff] %v10442_v50  ;;  %v10452_v58 = vsub.f32 %v10083_v6, %v12948_v10  ;;  %v10457_v16 = vsub.f32 %v10088_v5, %v12949_v39  ;;  %v12953_v10 = vand.u32 4294901760, %v10130_v31  ;;  %v10503_v5 = vld [vmem:[%s11734_s2 + $0x1a8] sm:$0xff]  ;;  %v12972_v61 = vand.u32 4294901760, %v10437_v54 }
 0x5e7   :  { %12939 = vst [vmem:[#allocation57_spill] sm:$0xff] %v10406_v35  ;;  %v10425_v7 = vpack.c.bf16 %v12942_v48, %v12941_v26  ;;  %v12947_v26 = vand.u32 4294901760, %v10057_v23  ;;  %6593 = vmatpush1.bf16.msra.mxu1 %v10406_v35  ;;  %v12973_v22 = vand.u32 4294901760, %v10442_v50  ;;  %v12979_v54 = vand.u32 4294901760, %v10207_v56 }
 0x5e8   :  { %v10477_v39 = vsub.f32 %v10130_v31, %v12953_v10  ;;  %v10498_v10 = vld [vmem:[%s11734_s2 + $0x190] sm:$0xff] }
 0x5e9   :  { %12943 = vst [vmem:[#allocation58_spill] sm:$0xff] %v10425_v7  ;;  %v10447_v48 = vsub.f32 %v10057_v23, %v12947_v26  ;;  %v10467_v23 = vsub.f32 %v10098_v3, %v12951_v38  ;;  %v12952_v26 = vand.u32 4294901760, %v10125_v8  ;;  %v12955_v38 = vand.u32 4294901760, %v10339_v36  ;;  %6595 = vmatprep.subr.bf16.mxu1 %v10425_v7 }
 0x5ea   :  { %12954 = vst [vmem:[#allocation67_spill] sm:$0xff] %v10477_v39  ;;  %v12962_v3 = vand.u32 4294901760, %v10374_v15  ;;  %v12964_v36 = vand.u32 4294901760, %v10140_v30  ;;  %v10561_v7 = vpack.c.bf16 %v12973_v22, %v12972_v61 }
 0x5eb   :  { %v10472_v6 = vsub.f32 %v10125_v8, %v12952_v26  ;;  %v10490_v8 = vpack.c.bf16 %v12956_v53, %v12955_v38  ;;  %v10508_v38 = vld [vmem:[%s11734_s2 + $0x1b8] sm:$0xff]  ;;  %v12959_v53 = vand.u32 4294901760, %v10135_v12  ;;  %v12961_v26 = vand.u32 4294901760, %v10369_v25 }
 0x5ec   :  { %12958 = vst [vmem:[#allocation77_spill] sm:$0xff] %v10508_v38  ;;  %v10527_v39 = vsub.f32 %v10140_v30, %v12964_v36  ;;  %v12967_v30 = vand.u32 4294901760, %v10169_v2  ;;  %12974 = vst [vmem:[#allocation60_spill] sm:$0xff] %v10561_v7 }
 0x5ed   :  { %12957 = vst [vmem:[#allocation68_spill] sm:$0xff] %v10490_v8  ;;  %v10513_v31 = vsub.f32 %v10135_v12, %v12959_v53  ;;  %v10520_v35 = vpack.c.bf16 %v12962_v3, %v12961_v26  ;;  %v12966_v12 = vand.u32 4294901760, %v10164_v18  ;;  %6597 = vmatpush1.bf16.msra.mxu1 %v10490_v8  ;;  %v12969_v3 = vand.u32 4294901760, %v10413_v45 }
 0x5ee   :  { %12965 = vst [vmem:[#allocation97_spill] sm:$0xff] %v10527_v39  ;;  %v10543_v36 = vsub.f32 %v10169_v2, %v12967_v30  ;;  %v12970_v26 = vand.u32 4294901760, %v10432_v13  ;;  %v10566_v2 = vld [vmem:[%s11734_s2 + $0x1a0] sm:$0xff]  ;;  %v12976_v30 = vand.u32 4294901760, %v10261_v41  ;;  %v12977_v8 = vand.u32 4294901760, %v10179_v34 }
 0x5ef   :  { %12960 = vst [vmem:[#allocation28_spill] sm:$0xff] %v10513_v31  ;;  %12963 = vst [vmem:[#allocation95_spill] sm:$0xff] %v10520_v35  ;;  %v10532_v53 = vsub.f32 %v10164_v18, %v12966_v12  ;;  %v12968_v18 = vand.u32 4294901760, %v10174_v27  ;;  %6599 = vmatprep.subr.bf16.mxu1 %v10520_v35  ;;  %v10590_v35 = vsub.f32 %v10207_v56, %v12979_v54 }
 0x5f0   :  { %v10555_v15 = vpack.c.bf16 %v12970_v26, %v12969_v3  ;;  %v12975_v3 = vand.u32 4294901760, %v10237_v44  ;;  %v3947_v61 = vsub.f32 %v10261_v41, %v12976_v30  ;;  %v10585_v50 = vsub.f32 %v10179_v34, %v12977_v8 }
 0x5f1   :  { %v10548_v12 = vsub.f32 %v10174_v27, %v12968_v18  ;;  %v10571_v27 = vld [vmem:[%s11734_s2 + $0x1b0] sm:$0xff]  ;;  %12980 = vst [vmem:[#allocation75_spill] sm:$0xff] %v10590_v35  ;;  %v12982_v30 = vand.u32 4294901760, %v10271_v60  ;;  %v12983_v18 = vand.u32 4294901760, %v10483_v14  ;;  %v12984_v41 = vand.u32 4294901760, %v10498_v10 }
 0x5f2   :  { %12971 = vst [vmem:[#allocation53_spill] sm:$0xff] %v10555_v15  ;;  %v3935_v26 = vsub.f32 %v10237_v44, %v12975_v3  ;;  %12978 = vst [vmem:[#allocation69_spill] sm:$0xff] %v10585_v50  ;;  %v12981_v3 = vand.u32 4294901760, %v10266_v28  ;;  %v12986_v34 = vand.u32 4294901760, %v10503_v5  ;;  %v12987_v8 = vand.u32 4294901760, %v10508_v38  ;;  %6601 = vmatpush1.bf16.msra.mxu1 %v10555_v15 }
 0x5f3   :  { %v3953_v22 = vsub.f32 %v10271_v60, %v12982_v30  ;;  %v10602_v13 = vpack.c.bf16 %v12984_v41, %v12983_v18  ;;  %6603 = vmatprep.subr.bf16.mxu1 %v10561_v7  ;;  %v3948_v38 = vand.u32 4294901760, %v3947_v61  ;;  %v12991_v41 = vand.u32 4294901760, %v10212_v9 }
 0x5f4   :  { %v3941_v44 = vsub.f32 %v10266_v28, %v12981_v3  ;;  %v10608_v56 = vpack.c.bf16 %v12987_v8, %v12986_v34  ;;  %v3936_v18 = vand.u32 4294901760, %v3935_v26  ;;  %v12989_v34 = vand.u32 4294901760, %v10276_v20 }
 0x5f5   :  { %12985 = vst [vmem:[#allocation73_spill] sm:$0xff] %v10602_v13  ;;  %v12990_v3 = vand.u32 4294901760, %v10291_v21  ;;  %v3954_v30 = vand.u32 4294901760, %v3953_v22  ;;  %v10629_v7 = vsub.f32 %v10212_v9, %v12991_v41  ;;  %v12992_v26 = vand.u32 4294901760, %v10566_v2 }
 0x5f6   :  { %12988 = vst [vmem:[#allocation72_spill] sm:$0xff] %v10608_v56  ;;  %v3959_v8 = vsub.f32 %v10276_v20, %v12989_v34  ;;  %v3942_v15 = vand.u32 4294901760, %v3941_v44  ;;  %v12993_v61 = vand.u32 4294901760, %v10571_v27  ;;  %6605 = vmatpush1.bf16.msra.mxu1 %v10602_v13  ;;  %v12995_v22 = vand.u32 4294901760, %v10296_v0 }
 0x5f7   :  { %v3971_v54 = vsub.f32 %v10291_v21, %v12990_v3  ;;  %v12996_v28 = vand.u32 4294901760, %v10301_v11  ;;  %v12997_v41 = vand.u32 4294901760, %v10306_v33  ;;  %v12999_v44 = vand.u32 4294901760, %v10217_v47  ;;  %6607 = vmatprep.subr.bf16.mxu1 %v10608_v56 }
 0x5f8   :  { %v10635_v34 = vpack.c.bf16 %v12993_v61, %v12992_v26  ;;  %v3965_v3 = vsub.f32 %v10296_v0, %v12995_v22  ;;  %v12998_v26 = vand.u32 4294901760, %v10311_v24  ;;  %v6610_v22 = vpack.c.bf16 %v3948_v38, %v3936_v18 }
 0x5f9   :  { %v3977_v9 = vsub.f32 %v10301_v11, %v12996_v28  ;;  %v3983_v60 = vsub.f32 %v10306_v33, %v12997_v41  ;;  %v10655_v20 = vsub.f32 %v10217_v47, %v12999_v44  ;;  %v3960_v13 = vand.u32 4294901760, %v3959_v8 }
 0x5fa   :  { %12994 = vst [vmem:[#allocation54_spill] sm:$0xff] %v10635_v34  ;;  %v3995_v61 = vsub.f32 %v10311_v24, %v12998_v26  ;;  %v3972_v0 = vand.u32 4294901760, %v3971_v54  ;;  %v13000_v28 = vand.u32 4294901760, %v10222_v46  ;;  %v6612_v41 = vpack.c.bf16 %v3954_v30, %v3942_v15  ;;  %6609 = vmatpush1.bf16.msra.mxu1 %v10635_v34 }
 0x5fb   :  { %v13001_v33 = vand.u32 4294901760, %v10325_v17  ;;  %v13002_v24 = vand.u32 4294901760, %v10349_v59  ;;  %v13003_v44 = vand.u32 4294901760, %v10354_v63  ;;  %v13004_v54 = vand.u32 4294901760, %v10359_v49  ;;  %6611 = vmatprep.subr.bf16.mxu1 %v6610_v22 }
 0x5fc   :  { %v10661_v11 = vsub.f32 %v10222_v46, %v13000_v28  ;;  %v3966_v30 = vand.u32 4294901760, %v3965_v3  ;;  %v3984_v8 = vand.u32 4294901760, %v3983_v60  ;;  %v3996_v28 = vand.u32 4294901760, %v3995_v61 }
 0x5fd   :  { %v3989_v26 = vsub.f32 %v10325_v17, %v13001_v33  ;;  %v4001_v47 = vsub.f32 %v10349_v59, %v13002_v24  ;;  %v4007_v38 = vsub.f32 %v10354_v63, %v13003_v44  ;;  %v4019_v18 = vsub.f32 %v10359_v49, %v13004_v54 }
 0x5fe   :  { %v3978_v33 = vand.u32 4294901760, %v3977_v9  ;;  %v13005_v24 = vand.u32 4294901760, %v10251_v57  ;;  %v6614_v44 = vpack.c.bf16 %v3972_v0, %v3960_v13  ;;  %v12184_v63 = vand.u32 4294901760, %v10384_v29 }
 0x5ff   :  { %v12183_v54 = vand.u32 4294901760, %v10389_v1  ;;  %v3990_v46 = vand.u32 4294901760, %v3989_v26  ;;  %v4002_v49 = vand.u32 4294901760, %v4001_v47  ;;  %v12185_v15 = vand.u32 4294901760, %v10394_v19 }
 0x600   :  { %v10681_v56 = vsub.f32 %v10251_v57, %v13005_v24  ;;  %v12186_v3 = vand.u32 4294901760, %v10399_v4  ;;  %v13006_v60 = vand.u32 4294901760, %v10184_v62  ;;  %v4008_v9 = vand.u32 4294901760, %v4007_v38 }
 0x601   :  { %v4020_v61 = vand.u32 4294901760, %v4019_v18  ;;  %v13007_v57 = vand.u32 4294901760, %v10364_v42  ;;  %v13008_v0 = vand.u32 4294901760, %v10379_v43  ;;  %v13009_v26 = vand.u32 4294901760, %v10256_v55 }
 0x602   :  { %3926 = vmatmul.mubr.f32.vlgmr.msra.gmra.mrb[4].mxu1 %v13006_v60  ;;  %v6616_v62 = vpack.c.bf16 %v3978_v33, %v3966_v30  ;;  %v6618_v24 = vpack.c.bf16 %v3996_v28, %v3984_v8  ;;  %v4031_v38 = vsub.f32 %v10384_v29, %v12184_v63  ;;  %v4043_v18 = vsub.f32 %v10389_v1, %v12183_v54 }
 0x603   :  { %v4013_v22 = vsub.f32 %v10364_v42, %v13007_v57  ;;  %v4025_v13 = vsub.f32 %v10379_v43, %v13008_v0  ;;  %v10698_v47 = vsub.f32 %v10256_v55, %v13009_v26  ;;  %6613 = vmatpush1.bf16.msra.mxu1 %v6612_v41  ;;  %4277 = vmatprep.mubr.f32.mxu1 %v9865_v32  ;;  %v12187_v60 = vand.u32 4294901760, %v10418_v51 }
 0x604   :  { %6615 = vmatprep.subr.bf16.mxu1 %v6614_v44  ;;  %v12188_v57 = vand.u32 4294901760, %v10447_v48  ;;  %v13010_v55 = vand.u32 4294901760, %v10281_v37  ;;  %v13011_v30 = vand.u32 4294901760, %v10286_v40  ;;  %v4037_v8 = vsub.f32 %v10394_v19, %v12185_v15 }
 0x605   :  { %v4049_v28 = vsub.f32 %v10399_v4, %v12186_v3  ;;  %v6620_v44 = vpack.c.bf16 %v4002_v49, %v3990_v46  ;;  %v6622_v0 = vpack.c.bf16 %v4020_v61, %v4008_v9  ;;  %v4014_v26 = vand.u32 4294901760, %v4013_v22  ;;  %v13012_v22 = vld [vmem:[#allocation67_spill] sm:$0xff] }
 0x606   :  { %v10712_v41 = vsub.f32 %v10281_v37, %v13010_v55  ;;  %v10717_v33 = vsub.f32 %v10286_v40, %v13011_v30  ;;  %v4026_v54 = vand.u32 4294901760, %v4025_v13  ;;  %v12189_v37 = vand.u32 4294901760, %v10452_v58 }
 0x607   :  { %6617 = vmatpush1.bf16.msra.mxu1 %v6616_v62  ;;  %v12190_v55 = vand.u32 4294901760, %v10457_v16  ;;  %v12193_v30 = vand.u32 4294901760, %v10467_v23  ;;  %v4032_v63 = vand.u32 4294901760, %v4031_v38  ;;  %v4044_v15 = vand.u32 4294901760, %v4043_v18  ;;  %v13013_v62 = vld [vmem:[#allocation44_spill] sm:$0xff] }
 0x608   :  { %6619 = vmatprep.subr.bf16.mxu1 %v6618_v24  ;;  %v4055_v3 = vsub.f32 %v10418_v51, %v12187_v60  ;;  %v4067_v49 = vsub.f32 %v10447_v48, %v12188_v57  ;;  %v4038_v46 = vand.u32 4294901760, %v4037_v8  ;;  %v4050_v9 = vand.u32 4294901760, %v4049_v28 }
 0x609   :  { %v13014_v40 = vand.u32 4294901760, %v13013_v62  ;;  %v6624_v38 = vpack.c.bf16 %v4026_v54, %v4014_v26  ;;  %v4061_v8 = vsub.f32 %v10452_v58, %v12189_v37  ;;  %v4073_v28 = vsub.f32 %v10457_v16, %v12190_v55  ;;  %v13016_v26 = vld [vmem:[#allocation47_spill] sm:$0xff] }
 0x60a   :  { %v13015_v57 = vand.u32 4294901760, %v10462_v52  ;;  %v4091_v54 = vsub.f32 %v10467_v23, %v12193_v30  ;;  %v4056_v37 = vand.u32 4294901760, %v4055_v3  ;;  %v4068_v60 = vand.u32 4294901760, %v4067_v49 }
 0x60b   :  { %v10740_v24 = vsub.f32 %v13013_v62, %v13014_v40  ;;  %6621 = vmatpush1.bf16.msra.mxu1 %v6620_v44  ;;  %v13017_v40 = vand.u32 4294901760, %v13016_v26  ;;  %v6626_v62 = vpack.c.bf16 %v4044_v15, %v4032_v63  ;;  %v13018_v18 = vand.u32 4294901760, %v10369_v25 }
 0x60c   :  { %v4079_v13 = vsub.f32 %v10462_v52, %v13015_v57  ;;  %6623 = vmatprep.subr.bf16.mxu1 %v6622_v0  ;;  %v6628_v61 = vpack.c.bf16 %v4050_v9, %v4038_v46  ;;  %v13020_v57 = vand.u32 4294901760, %v10472_v6  ;;  %v13021_v30 = vand.u32 4294901760, %v13012_v22 }
 0x60d   :  { %v10759_v44 = vsub.f32 %v13016_v26, %v13017_v40  ;;  %v10764_v55 = vsub.f32 %v10369_v25, %v13018_v18  ;;  %v13022_v26 = vand.u32 4294901760, %v10513_v31  ;;  %v13023_v15 = vand.u32 4294901760, %v10527_v39  ;;  %v13024_v40 = vld [vmem:[#allocation55_spill] sm:$0xff] }
 0x60e   :  { %v4085_v32 = vsub.f32 %v10472_v6, %v13020_v57  ;;  %v4097_v34 = vsub.f32 %v13012_v22, %v13021_v30  ;;  %v4062_v49 = vand.u32 4294901760, %v4061_v8  ;;  %v4074_v46 = vand.u32 4294901760, %v4073_v28 }
 0x60f   :  { %13019 = vst [vmem:[#allocation59_spill] sm:$0xff] %v10764_v55  ;;  %v4103_v63 = vsub.f32 %v10513_v31, %v13022_v26  ;;  %v4115_v3 = vsub.f32 %v10527_v39, %v13023_v15  ;;  %6625 = vmatpush1.bf16.msra.mxu1 %v6624_v38  ;;  %v4080_v9 = vand.u32 4294901760, %v4079_v13  ;;  %v4092_v18 = vand.u32 4294901760, %v4091_v54  ;;  %v13032_v38 = vld [vmem:[#allocation62_spill] sm:$0xff] }
 0x610   :  { %v13025_v57 = vand.u32 4294901760, %v13024_v40  ;;  %6627 = vmatprep.subr.bf16.mxu1 %v6626_v62  ;;  %v6630_v26 = vpack.c.bf16 %v4068_v60, %v4056_v37  ;;  %v12201_v31 = vand.u32 4294901760, %v10548_v12  ;;  %v12200_v15 = vand.u32 4294901760, %v10585_v50 }
 0x611   :  { %v4086_v39 = vand.u32 4294901760, %v4085_v32  ;;  %v4098_v25 = vand.u32 4294901760, %v4097_v34  ;;  %v4104_v8 = vand.u32 4294901760, %v4103_v63  ;;  %v4116_v13 = vand.u32 4294901760, %v4115_v3  ;;  %v13029_v32 = vld [vmem:[#allocation61_spill] sm:$0xff] }
 0x612   :  { %v10783_v30 = vsub.f32 %v13024_v40, %v13025_v57  ;;  %v13026_v28 = vand.u32 4294901760, %v10532_v53  ;;  %v13027_v40 = vand.u32 4294901760, %v10543_v36  ;;  %v13028_v37 = vand.u32 4294901760, %v10413_v45 }
 0x613   :  { %v13030_v34 = vand.u32 4294901760, %v13029_v32  ;;  %6629 = vmatpush1.bf16.msra.mxu1 %v6628_v61  ;;  %v6632_v63 = vpack.c.bf16 %v4074_v46, %v4062_v49  ;;  %v6634_v3 = vpack.c.bf16 %v4092_v18, %v4080_v9  ;;  %v13033_v0 = vand.u32 4294901760, %v13032_v38  ;;  %v13034_v61 = vld [vmem:[#allocation63_spill] sm:$0xff] }
 0x614   :  { %v4109_v54 = vsub.f32 %v10532_v53, %v13026_v28  ;;  %v4121_v60 = vsub.f32 %v10543_v36, %v13027_v40  ;;  %v10798_v62 = vsub.f32 %v10413_v45, %v13028_v37  ;;  %6631 = vmatprep.subr.bf16.mxu1 %v6630_v26  ;;  %v4127_v28 = vsub.f32 %v10548_v12, %v12201_v31 }
 0x615   :  { %v10803_v57 = vsub.f32 %v13029_v32, %v13030_v34  ;;  %v4139_v40 = vsub.f32 %v10585_v50, %v12200_v15  ;;  %v10816_v32 = vsub.f32 %v13032_v38, %v13033_v0  ;;  %v13035_v49 = vand.u32 4294901760, %v13034_v61 }
 0x616   :  { %v13036_v9 = vand.u32 4294901760, %v10590_v35  ;;  %v13037_v26 = vand.u32 4294901760, %v10629_v7  ;;  %v6636_v15 = vpack.c.bf16 %v4098_v25, %v4086_v39  ;;  %v6638_v31 = vpack.c.bf16 %v4116_v13, %v4104_v8 }
 0x617   :  { %13031 = vst [vmem:[#allocation65_spill] sm:$0xff] %v10803_v57  ;;  %v10821_v46 = vsub.f32 %v13034_v61, %v13035_v49  ;;  %v4110_v37 = vand.u32 4294901760, %v4109_v54  ;;  %v4122_v45 = vand.u32 4294901760, %v4121_v60  ;;  %6633 = vmatpush1.bf16.msra.mxu1 %v6632_v63  ;;  %v12206_v0 = vand.u32 4294901760, %v10681_v56 }
 0x618   :  { %v4133_v18 = vsub.f32 %v10590_v35, %v13036_v9  ;;  %v4145_v34 = vsub.f32 %v10629_v7, %v13037_v26  ;;  %v12207_v38 = vand.u32 4294901760, %v10698_v47  ;;  %v12208_v61 = vand.u32 4294901760, %v10712_v41  ;;  %6635 = vmatprep.subr.bf16.mxu1 %v6634_v3 }
 0x619   :  { %v12209_v49 = vand.u32 4294901760, %v10717_v33  ;;  %v4128_v50 = vand.u32 4294901760, %v4127_v28  ;;  %v4140_v9 = vand.u32 4294901760, %v4139_v40  ;;  %v13038_v35 = vand.u32 4294901760, %v10655_v20 }
 0x61a   :  { %v13039_v39 = vand.u32 4294901760, %v10661_v11  ;;  %v4134_v8 = vand.u32 4294901760, %v4133_v18  ;;  %v4146_v13 = vand.u32 4294901760, %v4145_v34  ;;  %v12210_v54 = vand.u32 4294901760, %v10740_v24 }
 0x61b   :  { %v4151_v26 = vsub.f32 %v10655_v20, %v13038_v35  ;;  %v12211_v60 = vand.u32 4294901760, %v10759_v44  ;;  %v13040_v63 = vand.u32 4294901760, %v10483_v14  ;;  %v6640_v28 = vpack.c.bf16 %v4122_v45, %v4110_v37  ;;  %6637 = vmatpush1.bf16.msra.mxu1 %v6636_v15 }
 0x61c   :  { %v4163_v25 = vsub.f32 %v10661_v11, %v13039_v39  ;;  %v4157_v18 = vsub.f32 %v10681_v56, %v12206_v0  ;;  %v4169_v34 = vsub.f32 %v10698_v47, %v12207_v38  ;;  %v4175_v39 = vsub.f32 %v10712_v41, %v12208_v61  ;;  %6639 = vmatprep.subr.bf16.mxu1 %v6638_v31 }
 0x61d   :  { %v10844_v3 = vsub.f32 %v10483_v14, %v13040_v63  ;;  %v4187_v14 = vsub.f32 %v10717_v33, %v12209_v49  ;;  %v13041_v45 = vand.u32 4294901760, %v10498_v10  ;;  %v6642_v37 = vpack.c.bf16 %v4140_v9, %v4128_v50 }
 0x61e   :  { %v4152_v63 = vand.u32 4294901760, %v4151_v26  ;;  %v4164_v0 = vand.u32 4294901760, %v4163_v25  ;;  %v13043_v35 = vand.u32 4294901760, %v10503_v5  ;;  %v6644_v40 = vpack.c.bf16 %v4146_v13, %v4134_v8 }
 0x61f   :  { %v10863_v15 = vsub.f32 %v10498_v10, %v13041_v45  ;;  %v4181_v61 = vsub.f32 %v10740_v24, %v12210_v54  ;;  %v4193_v49 = vsub.f32 %v10759_v44, %v12211_v60  ;;  %v13044_v10 = vand.u32 4294901760, %v10764_v55  ;;  %6641 = vmatpush1.bf16.msra.mxu1 %v6640_v28  ;;  %v13046_v45 = vld [vmem:[#allocation77_spill] sm:$0xff] }
 0x620   :  { %v10868_v38 = vsub.f32 %v10503_v5, %v13043_v35  ;;  %v13045_v31 = vand.u32 4294901760, %v10783_v30  ;;  %v4158_v25 = vand.u32 4294901760, %v4157_v18  ;;  %v4170_v8 = vand.u32 4294901760, %v4169_v34  ;;  %6643 = vmatprep.subr.bf16.mxu1 %v6642_v37 }
 0x621   :  { %13042 = vst [vmem:[#allocation70_spill] sm:$0xff] %v10863_v15  ;;  %v4199_v50 = vsub.f32 %v10764_v55, %v13044_v10  ;;  %v4176_v13 = vand.u32 4294901760, %v4175_v39  ;;  %v4188_v35 = vand.u32 4294901760, %v4187_v14  ;;  %v13047_v54 = vand.u32 4294901760, %v13046_v45 }
 0x622   :  { %v4211_v9 = vsub.f32 %v10783_v30, %v13045_v31  ;;  %v6646_v10 = vpack.c.bf16 %v4164_v0, %v4152_v63  ;;  %v12214_v55 = vand.u32 4294901760, %v10816_v32  ;;  %v13049_v5 = vand.u32 4294901760, %v10566_v2 }
 0x623   :  { %v10887_v60 = vsub.f32 %v13046_v45, %v13047_v54  ;;  %v13050_v28 = vand.u32 4294901760, %v10571_v27  ;;  %v4182_v34 = vand.u32 4294901760, %v4181_v61  ;;  %v4194_v39 = vand.u32 4294901760, %v4193_v49  ;;  %6645 = vmatpush1.bf16.msra.mxu1 %v6644_v40 }
 0x624   :  { %v10894_v26 = vsub.f32 %v10566_v2, %v13049_v5  ;;  %v4200_v54 = vand.u32 4294901760, %v4199_v50  ;;  %v4212_v14 = vand.u32 4294901760, %v4211_v9  ;;  %v13052_v0 = vand.u32 4294901760, %v10798_v62  ;;  %6647 = vmatprep.subr.bf16.mxu1 %v6646_v10 }
 0x625   :  { %13048 = vst [vmem:[#allocation76_spill] sm:$0xff] %v10887_v60  ;;  %v10899_v18 = vsub.f32 %v10571_v27, %v13050_v28  ;;  %v13053_v63 = vand.u32 4294901760, %v10803_v57  ;;  %v6648_v2 = vpack.c.bf16 %v4170_v8, %v4158_v25  ;;  %v6650_v5 = vpack.c.bf16 %v4188_v35, %v4176_v13 }
 0x626   :  { %v4205_v37 = vsub.f32 %v10798_v62, %v13052_v0  ;;  %v12219_v31 = vand.u32 4294901760, %v10844_v3  ;;  %v12216_v27 = vand.u32 4294901760, %v10863_v15  ;;  %v4223_v61 = vsub.f32 %v10816_v32, %v12214_v55 }
 0x627   :  { %13051 = vst [vmem:[#allocation16_spill] sm:$0xff] %v10899_v18  ;;  %v4217_v45 = vsub.f32 %v10803_v57, %v13053_v63  ;;  %v13054_v49 = vand.u32 4294901760, %v10821_v46  ;;  %v12215_v9 = vand.u32 4294901760, %v10868_v38  ;;  %v12217_v28 = vand.u32 4294901760, %v10887_v60  ;;  %6649 = vmatpush1.bf16.msra.mxu1 %v6648_v2 }
 0x628   :  { %v6652_v40 = vpack.c.bf16 %v4194_v39, %v4182_v34  ;;  %v6654_v25 = vpack.c.bf16 %v4212_v14, %v4200_v54  ;;  %v4206_v8 = vand.u32 4294901760, %v4205_v37  ;;  %v4229_v35 = vsub.f32 %v10844_v3, %v12219_v31  ;;  %6651 = vmatprep.subr.bf16.mxu1 %v6650_v5  ;;  %v13058_v31 = vld [vmem:[#allocation11_spill] sm:$0xff] }
 0x629   :  { %v4235_v50 = vsub.f32 %v10821_v46, %v13054_v49  ;;  %v4218_v13 = vand.u32 4294901760, %v4217_v45  ;;  %v4241_v10 = vsub.f32 %v10863_v15, %v12216_v27  ;;  %v12218_v0 = vand.u32 4294901760, %v10894_v26 }
 0x62a   :  { %v12220_v63 = vand.u32 4294901760, %v10899_v18  ;;  %v4224_v49 = vand.u32 4294901760, %v4223_v61  ;;  %v4247_v34 = vsub.f32 %v10868_v38, %v12215_v9  ;;  %v4259_v39 = vsub.f32 %v10887_v60, %v12217_v28 }
 0x62b   :  { %v4236_v55 = vand.u32 4294901760, %v4235_v50  ;;  %v6656_v54 = vpack.c.bf16 %v4218_v13, %v4206_v8  ;;  %6653 = vmatpush1.bf16.msra.mxu1 %v6652_v40  ;;  %v4230_v14 = vand.u32 4294901760, %v4229_v35  ;;  %v4242_v37 = vand.u32 4294901760, %v4241_v10  ;;  %v13055_v13 = vld [vmem:[#allocation79_spill] sm:$0xff]  ;;  %v13056_v35 = vld [vmem:[#allocation81_spill] sm:$0xff] }
 0x62c   :  { %v4253_v45 = vsub.f32 %v10894_v26, %v12218_v0  ;;  %v4265_v2 = vsub.f32 %v10899_v18, %v12220_v63  ;;  %6655 = vmatprep.subr.bf16.mxu1 %v6654_v25  ;;  %v4248_v61 = vand.u32 4294901760, %v4247_v34  ;;  %v4260_v50 = vand.u32 4294901760, %v4259_v39  ;;  %v13057_v0 = vld [vmem:[#allocation82_spill] sm:$0xff]  ;;  %v13062_v39 = vld [vmem:[#allocation85_spill] sm:$0xff] }
 0x62d   :  { %v6658_v5 = vpack.c.bf16 %v4236_v55, %v4224_v49  ;;  %v6660_v9 = vpack.c.bf16 %v4242_v37, %v4230_v14  ;;  %v6666_v10 = vpack.c.bf16 %v13056_v35, %v13055_v13  ;;  %v6668_v63 = vpack.c.bf16 %v13058_v31, %v13057_v0  ;;  %v13059_v55 = vld [vmem:[#allocation83_spill] sm:$0xff]  ;;  %v13060_v49 = vld [vmem:[#allocation89_spill] sm:$0xff]  ;;  %v13061_v34 = vld [vmem:[#allocation14_spill] sm:$0xff] }
 0x62e   :  { %v4254_v27 = vand.u32 4294901760, %v4253_v45  ;;  %v4266_v28 = vand.u32 4294901760, %v4265_v2  ;;  %v6662_v40 = vpack.c.bf16 %v4260_v50, %v4248_v61  ;;  %v6670_v25 = vpack.c.bf16 %v10291_v21, %v13059_v55  ;;  %v13066_v45 = vld [vmem:[#allocation51_spill] sm:$0xff]  ;;  %v13067_v2 = vld [vmem:[#allocation52_spill] sm:$0xff] }
 0x62f   :  { %6657 = vmatpush1.bf16.msra.mxu1 %v6656_v54  ;;  %v13065_v54 = vld [vmem:[#allocation25_spill] sm:$0xff]  ;;  %v6676_v37 = vpack.c.bf16 %v10349_v59, %v10325_v17  ;;  %v6682_v61 = vpack.c.bf16 %v10389_v1, %v10384_v29  ;;  %v6684_v50 = vpack.c.bf16 %v10399_v4, %v10394_v19 }
 0x630   :  { %6659 = vmatprep.subr.bf16.mxu1 %v6658_v5  ;;  %v6664_v8 = vpack.c.bf16 %v4266_v28, %v4254_v27  ;;  %v13064_v28 = vld [vmem:[#allocation24_spill] sm:$0xff]  ;;  %v6678_v5 = vpack.c.bf16 %v13067_v2, %v13066_v45 }
 0x631   :  { %v6674_v14 = vpack.c.bf16 %v13065_v54, %v13064_v28 }
 0x633   :  { %6661 = vmatpush1.bf16.msra.mxu1 %v6660_v9  ;;  %v13063_v9 = vld [vmem:[#allocation87_spill] sm:$0xff] }
 0x634   :  { %6663 = vmatprep.subr.bf16.mxu1 %v6662_v40  ;;  %v6672_v27 = vpack.c.bf16 %v13063_v9, %v13062_v39  ;;  %v6686_v40 = vpack.c.bf16 %v10447_v48, %v10418_v51 }
 0x637   :  { %6665 = vmatpush1.bf16.msra.mxu1 %v6664_v8  ;;  %v6688_v8 = vpack.c.bf16 %v10457_v16, %v10452_v58 }
 0x638   :  { %6667 = vmatprep.subr.bf16.mxu1 %v6666_v10  ;;  %v6690_v10 = vpack.c.bf16 %v10467_v23, %v10462_v52 }
 0x63a   :  { %4279 = vmatmul.mubr.f32.vlgmr.msra.gmra.mrb[4].mxu1 %v13060_v49 }
 0x63b   :  { %6669 = vmatpush1.bf16.msra.mxu1 %v6668_v63  ;;  %4463 = vmatprep.mubr.f32.mxu1 %v13061_v34  ;;  %v6680_v63 = vpack.c.bf16 %v10379_v43, %v10364_v42 }
 0x63c   :  { %6671 = vmatprep.subr.bf16.mxu1 %v6670_v25  ;;  %v6692_v25 = vpack.c.bf16 %v13012_v22, %v10472_v6 }
 0x63f   :  { %6673 = vmatpush1.bf16.msra.mxu1 %v6672_v27  ;;  %v13068_v27 = vld [vmem:[#allocation28_spill] sm:$0xff] }
 0x640   :  { %6675 = vmatprep.subr.bf16.mxu1 %v6674_v14  ;;  %v13069_v14 = vld [vmem:[#allocation97_spill] sm:$0xff] }
 0x643   :  { %6677 = vmatpush1.bf16.msra.mxu1 %v6676_v37  ;;  %v6694_v37 = vpack.c.bf16 %v13069_v14, %v13068_v27 }
 0x644   :  { %6679 = vmatprep.subr.bf16.mxu1 %v6678_v5  ;;  %v6696_v5 = vpack.c.bf16 %v10543_v36, %v10532_v53 }
 0x647   :  { %6681 = vmatpush1.bf16.msra.mxu1 %v6680_v63  ;;  %v13070_v63 = vld [vmem:[#allocation69_spill] sm:$0xff] }
 0x648   :  { %6683 = vmatprep.subr.bf16.mxu1 %v6682_v61  ;;  %v6698_v61 = vpack.c.bf16 %v13070_v63, %v10548_v12 }
 0x64b   :  { %6685 = vmatpush1.bf16.msra.mxu1 %v6684_v50  ;;  %v13071_v50 = vld [vmem:[#allocation75_spill] sm:$0xff] }
 0x64c   :  { %6687 = vmatprep.subr.bf16.mxu1 %v6686_v40  ;;  %v6700_v40 = vpack.c.bf16 %v10629_v7, %v13071_v50 }
 0x64f   :  { %6689 = vmatpush1.bf16.msra.mxu1 %v6688_v8  ;;  %v6702_v8 = vpack.c.bf16 %v10661_v11, %v10655_v20 }
 0x650   :  { %6691 = vmatprep.subr.bf16.mxu1 %v6690_v10  ;;  %v6704_v10 = vpack.c.bf16 %v10698_v47, %v10681_v56 }
 0x653   :  { %6693 = vmatpush1.bf16.msra.mxu1 %v6692_v25  ;;  %v6706_v25 = vpack.c.bf16 %v10717_v33, %v10712_v41 }
 0x654   :  { %6695 = vmatprep.subr.bf16.mxu1 %v6694_v37  ;;  %v6708_v37 = vpack.c.bf16 %v10759_v44, %v10740_v24 }
 0x657   :  { %6697 = vmatpush1.bf16.msra.mxu1 %v6696_v5  ;;  %v13072_v5 = vld [vmem:[#allocation59_spill] sm:$0xff] }
 0x658   :  { %6699 = vmatprep.subr.bf16.mxu1 %v6698_v61  ;;  %v6710_v49 = vpack.c.bf16 %v10783_v30, %v13072_v5  ;;  %v6712_v61 = vpack.c.bf16 %v10803_v57, %v10798_v62  ;;  %v13075_v57 = vld [vmem:[#allocation17_spill] sm:$0xff] }
 0x65b   :  { %6701 = vmatpush1.bf16.msra.mxu1 %v6700_v40  ;;  %v6714_v40 = vpack.c.bf16 %v10821_v46, %v10816_v32 }
 0x65c   :  { %6703 = vmatprep.subr.bf16.mxu1 %v6702_v8  ;;  %v6716_v8 = vpack.c.bf16 %v10863_v15, %v10844_v3  ;;  %v13077_v15 = vld [vmem:[#allocation13_spill] sm:$0xff] }
 0x65f   :  { %6705 = vmatpush1.bf16.msra.mxu1 %v6704_v10  ;;  %v6718_v10 = vpack.c.bf16 %v10887_v60, %v10868_v38  ;;  %v13079_v60 = vld [vmem:[#allocation19_spill] sm:$0xff] }
 0x660   :  { %6707 = vmatprep.subr.bf16.mxu1 %v6706_v25  ;;  %v6720_v25 = vpack.c.bf16 %v10899_v18, %v10894_v26  ;;  %v13081_v18 = vld [vmem:[#allocation20_spill] sm:$0xff] }
 0x663   :  { %6709 = vmatpush1.bf16.msra.mxu1 %v6708_v37  ;;  %v13073_v37 = vld [vmem:[#allocation78_spill] sm:$0xff] }
 0x664   :  { %6711 = vmatprep.subr.bf16.mxu1 %v6710_v49  ;;  %v13074_v49 = vld [vmem:[#allocation96_spill] sm:$0xff] }
 0x667   :  { %6713 = vmatpush1.bf16.msra.mxu1 %v6712_v61  ;;  %v13076_v61 = vand.u32 4294901760, %v13061_v34  ;;  %v13086_v34 = vld [vmem:[#allocation91_spill] sm:$0xff] }
 0x668   :  { %6715 = vmatprep.subr.bf16.mxu1 %v6714_v40  ;;  %v13078_v40 = vld [vmem:[#allocation84_spill] sm:$0xff] }
 0x66b   :  { %6717 = vmatpush1.bf16.msra.mxu1 %v6716_v8  ;;  %v13080_v8 = vld [vmem:[#allocation86_spill] sm:$0xff] }
 0x66c   :  { %6719 = vmatprep.subr.bf16.mxu1 %v6718_v10  ;;  %v13082_v10 = vld [vmem:[#allocation94_spill] sm:$0xff] }
 0x66f   :  { %6721 = vmatpush1.bf16.msra.mxu1 %v6720_v25  ;;  %v13083_v25 = vld [vmem:[#allocation15_spill] sm:$0xff] }
 0x670   :  { %6723 = vmatprep.subr.bf16.mxu1 %v13073_v37  ;;  %v13084_v37 = vld [vmem:[#allocation88_spill] sm:$0xff] }
 0x672   :  { %4466 = vmatmul.mubr.f32.vlgmr.msra.gmra.mrb[4].mxu1 %v13074_v49 }
 0x673   :  { %6725 = vmatpush1.bf16.msra.mxu1 %v13075_v57  ;;  %4595 = vmatprep.mubr.f32.mxu1 %v13076_v61  ;;  %v13085_v57 = vld [vmem:[#allocation90_spill] sm:$0xff]  ;;  %v13087_v61 = vld [vmem:[#allocation92_spill] sm:$0xff] }
 0x674   :  { %6727 = vmatprep.subr.bf16.mxu1 %v13077_v15  ;;  %v13088_v15 = vld [vmem:[#allocation23_spill] sm:$0xff] }
 0x677   :  { %6729 = vmatpush1.bf16.msra.mxu1 %v13078_v40  ;;  %v13089_v40 = vld [vmem:[#allocation12_spill] sm:$0xff] }
 0x678   :  { %6731 = vmatprep.subr.bf16.mxu1 %v13079_v60  ;;  %v13090_v60 = vld [vmem:[#allocation93_spill] sm:$0xff] }
 0x67b   :  { %6733 = vmatpush1.bf16.msra.mxu1 %v13080_v8  ;;  %v13091_v8 = vld [vmem:[#allocation80_spill] sm:$0xff] }
 0x67c   :  { %6735 = vmatprep.subr.bf16.mxu1 %v13081_v18  ;;  %v13092_v18 = vld [vmem:[#allocation41_spill] sm:$0xff] }
 0x67f   :  { %6737 = vmatpush1.bf16.msra.mxu1 %v13082_v10  ;;  %v13093_v10 = vld [vmem:[#allocation42_spill] sm:$0xff] }
 0x680   :  { %6739 = vmatprep.subr.bf16.mxu1 %v13083_v25  ;;  %v13094_v25 = vld [vmem:[#allocation57_spill] sm:$0xff] }
 0x683   :  { %6741 = vmatpush1.bf16.msra.mxu1 %v13084_v37  ;;  %v13095_v37 = vld [vmem:[#allocation58_spill] sm:$0xff] }
 0x684   :  { %6743 = vmatprep.subr.bf16.mxu1 %v13085_v57  ;;  %v13096_v57 = vld [vmem:[#allocation68_spill] sm:$0xff] }
 0x687   :  { %6745 = vmatpush1.bf16.msra.mxu1 %v13086_v34  ;;  %v13104_v34 = vld [vmem:[#allocation54_spill] sm:$0xff] }
 0x688   :  { %6747 = vmatprep.subr.bf16.mxu1 %v13087_v61  ;;  %v13097_v61 = vld [vmem:[#allocation95_spill] sm:$0xff] }
 0x68b   :  { %6749 = vmatpush1.bf16.msra.mxu1 %v13088_v15 }
 0x68c   :  { %6751 = vmatprep.subr.bf16.mxu1 %v13089_v40 }
 0x68f   :  { %6753 = vmatpush1.bf16.msra.mxu1 %v13090_v60  ;;  %v13098_v60 = vld [vmem:[#allocation53_spill] sm:$0xff] }
 0x690   :  { %6755 = vmatprep.subr.bf16.mxu1 %v13091_v8  ;;  %v13099_v8 = vld [vmem:[#allocation60_spill] sm:$0xff] }
 0x693   :  { %6757 = vmatpush1.bf16.msra.mxu1 %v13092_v18  ;;  %v3728_v15 = vpop.f32.mrb[2].mxu1  ;;  %v13100_v18 = vld [vmem:[#allocation73_spill] sm:$0xff] }
 0x694   :  { %6759 = vmatprep.subr.bf16.mxu1 %v13093_v10  ;;  %3733 = vst.msk [vmem:[#allocation8] sm:$0xff] %vm3732_vm13, %v3728_v15  ;;  %v3730_v40 = vpop.f32.mrb[3].mxu1  ;;  %v13101_v10 = vld [vmem:[#allocation72_spill] sm:$0xff]  ;;  %v13106_v15 = vand.u32 4294901760, %v13058_v31  ;;  %v13113_v31 = vand.u32 4294901760, %v13064_v28 }
 0x697   :  { %6761 = vmatpush1.bf16.msra.mxu1 %v13094_v25  ;;  %v13102_v25 = vand.u32 4294901760, %v13055_v13  ;;  %v13110_v13 = vld [vmem:[#allocation74_spill] sm:$0xff] }
 0x698   :  { %6763 = vmatprep.subr.bf16.mxu1 %v13095_v37  ;;  %v13103_v37 = vand.u32 4294901760, %v13056_v35  ;;  %v13111_v35 = vand.u32 4294901760, %v13062_v39  ;;  %v13118_v39 = vand.u32 4294901760, %v13067_v2  ;;  %v13125_v2 = vand.u32 4294901760, %v10418_v51 }
 0x699   :  { %v13132_v51 = vand.u32 4294901760, %v13012_v22  ;;  %v13139_v22 = vand.u32 4294901760, %v13071_v50  ;;  %v13146_v50 = vand.u32 4294901760, %v10717_v33  ;;  %v13154_v33 = vand.u32 4294901760, %v10816_v32 }
 0x69b   :  { %6765 = vmatpush1.bf16.msra.mxu1 %v13096_v57  ;;  %v6778_v57 = vpack.c.bf16 %v13103_v37, %v13102_v25  ;;  %v13112_v37 = vand.u32 4294901760, %v13063_v9  ;;  %v13120_v9 = vand.u32 4294901760, %v10379_v43  ;;  %v13127_v43 = vand.u32 4294901760, %v10452_v58 }
 0x69c   :  { %6767 = vmatprep.subr.bf16.mxu1 %v13097_v61  ;;  %v13105_v61 = vand.u32 4294901760, %v13057_v0  ;;  %v13134_v58 = vand.u32 4294901760, %v13069_v14  ;;  %v13141_v14 = vand.u32 4294901760, %v10655_v20  ;;  %v13148_v20 = vand.u32 4294901760, %v10759_v44 }
 0x69d   :  { %v6784_v0 = vpack.c.bf16 %v13112_v37, %v13111_v35  ;;  %v13156_v44 = vand.u32 4294901760, %v10844_v3  ;;  %v13166_v3 = vld [vmem:[#allocation89_spill] sm:$0xff] }
 0x69e   :  { %v6780_v40 = vpack.c.bf16 %v13106_v15, %v13105_v61 }
 0x69f   :  { %6769 = vmatpush1.bf16.msra.mxu1 %v13098_v60  ;;  %v13107_v60 = vand.u32 4294901760, %v13059_v55 }
 0x6a0   :  { %6771 = vmatprep.subr.bf16.mxu1 %v13099_v8  ;;  %v13108_v8 = vand.u32 4294901760, %v10291_v21  ;;  %v13115_v21 = vand.u32 4294901760, %v10325_v17  ;;  %v13122_v17 = vand.u32 4294901760, %v10389_v1  ;;  %v13129_v1 = vand.u32 4294901760, %v10462_v52 }
 0x6a1   :  { %v13136_v52 = vand.u32 4294901760, %v10543_v36  ;;  %v13143_v36 = vand.u32 4294901760, %v10681_v56  ;;  %v13150_v56 = vand.u32 4294901760, %v10783_v30  ;;  %v13159_v30 = vand.u32 4294901760, %v10868_v38  ;;  %v13168_v38 = vld [vmem:[#allocation13_spill] sm:$0xff] }
 0x6a3   :  { %6773 = vmatpush1.bf16.msra.mxu1 %v13100_v18  ;;  %v6782_v18 = vpack.c.bf16 %v13108_v8, %v13107_v60  ;;  %v13116_v60 = vand.u32 4294901760, %v10349_v59  ;;  %v13117_v8 = vand.u32 4294901760, %v13066_v45  ;;  %v13123_v59 = vand.u32 4294901760, %v10394_v19 }
 0x6a4   :  { %6775 = vmatprep.subr.bf16.mxu1 %v13101_v10  ;;  %v13109_v10 = vand.u32 4294901760, %v13074_v49  ;;  %v13124_v45 = vand.u32 4294901760, %v10399_v4  ;;  %v13130_v19 = vand.u32 4294901760, %v10467_v23  ;;  %v13131_v4 = vand.u32 4294901760, %v10472_v6 }
 0x6a5   :  { %v6788_v49 = vpack.c.bf16 %v13116_v60, %v13115_v21  ;;  %v13137_v23 = vand.u32 4294901760, %v10548_v12  ;;  %v13138_v6 = vand.u32 4294901760, %v13070_v63  ;;  %v13144_v12 = vand.u32 4294901760, %v10698_v47 }
 0x6a6   :  { %v6796_v61 = vpack.c.bf16 %v13124_v45, %v13123_v59  ;;  %v6802_v35 = vpack.c.bf16 %v13130_v19, %v13129_v1  ;;  %v6804_v37 = vpack.c.bf16 %v13132_v51, %v13131_v4  ;;  %v13145_v63 = vand.u32 4294901760, %v10712_v41  ;;  %v13163_v45 = vld [vmem:[#allocation16_spill] sm:$0xff]  ;;  %v13176_v19 = vld [vmem:[#allocation90_spill] sm:$0xff]  ;;  %v13179_v4 = vld [vmem:[#allocation23_spill] sm:$0xff] }
 0x6a7   :  { %6777 = vmatpush1.bf16.msra.mxu1 %v13104_v34  ;;  %v6816_v60 = vpack.c.bf16 %v13144_v12, %v13143_v36  ;;  %v13151_v47 = vand.u32 4294901760, %v10798_v62  ;;  %v13162_v59 = vand.u32 4294901760, %v10894_v26  ;;  %v13164_v32 = vand.u32 4294901760, %v13163_v45  ;;  %v13171_v26 = vld [vmem:[#allocation86_spill] sm:$0xff]  ;;  %v13175_v1 = vld [vmem:[#allocation88_spill] sm:$0xff] }
 0x6a8   :  { %6779 = vmatprep.subr.bf16.mxu1 %v6778_v57  ;;  %v13114_v57 = vand.u32 4294901760, %v13065_v54  ;;  %v13121_v54 = vand.u32 4294901760, %v10384_v29  ;;  %v13128_v29 = vand.u32 4294901760, %v10457_v16  ;;  %v13135_v16 = vand.u32 4294901760, %v10532_v53  ;;  %v13180_v51 = vld [vmem:[#allocation12_spill] sm:$0xff] }
 0x6a9   :  { %v13142_v53 = vand.u32 4294901760, %v10661_v11  ;;  %v13149_v11 = vand.u32 4294901760, %v13072_v5 }
 0x6aa   :  { %4599 = vmatmul.mubr.f32.vlgmr.msra.gmra.mrb[4].mxu1 %v13109_v10  ;;  %v6786_v55 = vpack.c.bf16 %v13114_v57, %v13113_v31  ;;  %v6790_v10 = vpack.c.bf16 %v13118_v39, %v13117_v8  ;;  %v6794_v25 = vpack.c.bf16 %v13122_v17, %v13121_v54  ;;  %v6808_v31 = vpack.c.bf16 %v13136_v52, %v13135_v16  ;;  %v13160_v17 = vld [vmem:[#allocation76_spill] sm:$0xff]  ;;  %v13185_v16 = vld [vmem:[#allocation57_spill] sm:$0xff]  ;;  %v13186_v52 = vld [vmem:[#allocation58_spill] sm:$0xff] }
 0x6ab   :  { %6781 = vmatpush1.bf16.msra.mxu1 %v6780_v40  ;;  %4838 = vmatprep.mubr.f32.mxu1 %v13110_v13  ;;  %v6800_v40 = vpack.c.bf16 %v13128_v29, %v13127_v43  ;;  %v6810_v57 = vpack.c.bf16 %v13138_v6, %v13137_v23  ;;  %v6814_v21 = vpack.c.bf16 %v13142_v53, %v13141_v14  ;;  %v13161_v62 = vand.u32 4294901760, %v13160_v17  ;;  %v13172_v43 = vld [vmem:[#allocation20_spill] sm:$0xff]  ;;  %v13173_v29 = vld [vmem:[#allocation94_spill] sm:$0xff]  ;;  %v13188_v23 = vld [vmem:[#allocation95_spill] sm:$0xff] }
 0x6ac   :  { %6783 = vmatprep.subr.bf16.mxu1 %v6782_v18  ;;  %v13119_v18 = vand.u32 4294901760, %v10364_v42  ;;  %v13126_v42 = vand.u32 4294901760, %v10447_v48  ;;  %v13133_v48 = vand.u32 4294901760, %v13068_v27  ;;  %v13140_v27 = vand.u32 4294901760, %v10629_v7  ;;  %v13189_v6 = vld [vmem:[#allocation53_spill] sm:$0xff]  ;;  %v5006_v14 = vld [vmem:[%s11735_s3 + $0x8] sm:$0xff] }
 0x6ad   :  { %v13147_v7 = vand.u32 4294901760, %v10740_v24  ;;  %v6822_v39 = vpack.c.bf16 %v13150_v56, %v13149_v11  ;;  %v13155_v24 = vand.u32 4294901760, %v10821_v46  ;;  %v13165_v46 = vld [vmem:[#allocation78_spill] sm:$0xff]  ;;  %v5007_v53 = vld [vmem:[%s11735_s3 + $0x10] sm:$0xff]  ;;  %v5038_v36 = vand.u32 4294901760, %v5006_v14 }
 0x6ae   :  { %v6792_v28 = vpack.c.bf16 %v13120_v9, %v13119_v18  ;;  %v6798_v15 = vpack.c.bf16 %v13126_v42, %v13125_v2  ;;  %v13167_v2 = vld [vmem:[#allocation17_spill] sm:$0xff]  ;;  %v13169_v42 = vld [vmem:[#allocation84_spill] sm:$0xff]  ;;  %v5041_v12 = vand.u32 4294901760, %v5007_v53 }
 0x6af   :  { %6785 = vmatpush1.bf16.msra.mxu1 %v6784_v0  ;;  %v6806_v0 = vpack.c.bf16 %v13134_v58, %v13133_v48  ;;  %v6820_v8 = vpack.c.bf16 %v13148_v20, %v13147_v7  ;;  %v6826_v9 = vpack.c.bf16 %v13155_v24, %v13154_v33  ;;  %v13182_v48 = vld [vmem:[#allocation80_spill] sm:$0xff]  ;;  %v13183_v58 = vld [vmem:[#allocation41_spill] sm:$0xff]  ;;  %v5011_v20 = vld [vmem:[%s11735_s3 + $0x30] sm:$0xff] }
 0x6b0   :  { %6787 = vmatprep.subr.bf16.mxu1 %v6786_v55  ;;  %v6812_v55 = vpack.c.bf16 %v13140_v27, %v13139_v22  ;;  %v13191_v22 = vld [vmem:[#allocation73_spill] sm:$0xff]  ;;  %v13192_v27 = vld [vmem:[#allocation72_spill] sm:$0xff] }
 0x6b3   :  { %6789 = vmatpush1.bf16.msra.mxu1 %v6788_v49  ;;  %v6818_v49 = vpack.c.bf16 %v13146_v50, %v13145_v63  ;;  %v5010_v63 = vld [vmem:[%s11735_s3 + $0x28] sm:$0xff] }
 0x6b4   :  { %6791 = vmatprep.subr.bf16.mxu1 %v6790_v10  ;;  %v13152_v10 = vld [vmem:[#allocation65_spill] sm:$0xff]  ;;  %v5050_v7 = vand.u32 4294901760, %v5010_v63 }
 0x6b5   :  { %v13153_v41 = vand.u32 4294901760, %v13152_v10  ;;  %v5013_v10 = vld [vmem:[%s11735_s3 + $0x40] sm:$0xff] }
 0x6b7   :  { %6793 = vmatpush1.bf16.msra.mxu1 %v6792_v28  ;;  %v6824_v18 = vpack.c.bf16 %v13153_v41, %v13151_v47  ;;  %v13157_v28 = vld [vmem:[#allocation70_spill] sm:$0xff]  ;;  %v11203_v47 = vsub.f32 %v5007_v53, %v5041_v12 }
 0x6b8   :  { %6795 = vmatprep.subr.bf16.mxu1 %v6794_v25  ;;  %v13158_v5 = vand.u32 4294901760, %v13157_v28  ;;  %v6830_v25 = vpack.c.bf16 %v13161_v62, %v13159_v30  ;;  %v5014_v41 = vld [vmem:[%s11735_s3 + $0x48] sm:$0xff]  ;;  %v11224_v28 = vsub.f32 %v5010_v63, %v5050_v7  ;;  %v5017_v30 = vld [vmem:[%s11735_s3 + $0x60] sm:$0xff]  ;;  %v13193_v62 = vmov 0.0|0.0  }
 0x6b9   :  { %v5025_v63 = vld [vmem:[%s11735_s3 + $0xa0] sm:$0xff] }
 0x6ba   :  { %v6828_v54 = vpack.c.bf16 %v13158_v5, %v13156_v44  ;;  %v5053_v5 = vand.u32 4294901760, %v5011_v20 }
 0x6bb   :  { %6797 = vmatpush1.bf16.msra.mxu1 %v6796_v61  ;;  %v6832_v61 = vpack.c.bf16 %v13164_v32, %v13162_v59  ;;  %v5062_v59 = vand.u32 4294901760, %v5014_v41  ;;  %v5018_v32 = vld [vmem:[%s11735_s3 + $0x68] sm:$0xff] }
 0x6bc   :  { %6799 = vmatprep.subr.bf16.mxu1 %v6798_v15  ;;  %v13170_v15 = vld [vmem:[#allocation19_spill] sm:$0xff] }
 0x6bf   :  { %6801 = vmatpush1.bf16.msra.mxu1 %v6800_v40  ;;  %v13174_v40 = vld [vmem:[#allocation15_spill] sm:$0xff] }
 0x6c0   :  { %6803 = vmatprep.subr.bf16.mxu1 %v6802_v35  ;;  %v13177_v35 = vld [vmem:[#allocation91_spill] sm:$0xff] }
 0x6c3   :  { %6805 = vmatpush1.bf16.msra.mxu1 %v6804_v37  ;;  %v13181_v37 = vld [vmem:[#allocation93_spill] sm:$0xff] }
 0x6c4   :  { %6807 = vmatprep.subr.bf16.mxu1 %v6806_v0  ;;  %v13184_v0 = vld [vmem:[#allocation42_spill] sm:$0xff] }
 0x6c7   :  { %6809 = vmatpush1.bf16.msra.mxu1 %v6808_v31  ;;  %v13187_v31 = vld [vmem:[#allocation68_spill] sm:$0xff] }
 0x6c8   :  { %6811 = vmatprep.subr.bf16.mxu1 %v6810_v57  ;;  %v13190_v57 = vld [vmem:[#allocation60_spill] sm:$0xff] }
 0x6cb   :  { %6813 = vmatpush1.bf16.msra.mxu1 %v6812_v55  ;;  %v5005_v55 = vld [vmem:[%s11735_s3] sm:$0xff] }
 0x6cc   :  { %6815 = vmatprep.subr.bf16.mxu1 %v6814_v21  ;;  %v5035_v21 = vand.u32 4294901760, %v5005_v55 }
 0x6ce   :  { %v11197_v11 = vpack.c.bf16 %v5038_v36, %v5035_v21  ;;  %v11199_v56 = vsub.f32 %v5005_v55, %v5035_v21 }
 0x6cf   :  { %6817 = vmatpush1.bf16.msra.mxu1 %v6816_v60  ;;  %v5009_v60 = vld [vmem:[%s11735_s3 + $0x20] sm:$0xff] }
 0x6d0   :  { %6819 = vmatprep.subr.bf16.mxu1 %v6818_v49  ;;  %v5047_v49 = vand.u32 4294901760, %v5009_v60  ;;  %6892 = vmatpush1.bf16.msra.mxu0 %v11197_v11 }
 0x6d1   :  { %6893 = vmatprep.subr.bf16.mxu0 %v13193_v62 }
 0x6d2   :  { %v11216_v24 = vsub.f32 %v5009_v60, %v5047_v49 }
 0x6d3   :  { %6821 = vmatpush1.bf16.msra.mxu1 %v6820_v8  ;;  %v5012_v8 = vld [vmem:[%s11735_s3 + $0x38] sm:$0xff] }
 0x6d4   :  { %6823 = vmatprep.subr.bf16.mxu1 %v6822_v39  ;;  %v11201_v39 = vsub.f32 %v5006_v14, %v5038_v36  ;;  %v5023_v36 = vld [vmem:[%s11735_s3 + $0x90] sm:$0xff] }
 0x6d7   :  { %6825 = vmatpush1.bf16.msra.mxu1 %v6824_v18  ;;  %v5015_v18 = vld [vmem:[%s11735_s3 + $0x50] sm:$0xff] }
 0x6d8   :  { %6827 = vmatprep.subr.bf16.mxu1 %v6826_v9  ;;  %v5016_v9 = vld [vmem:[%s11735_s3 + $0x58] sm:$0xff]  ;;  %v5065_v45 = vand.u32 4294901760, %v5015_v18 }
 0x6db   :  { %6829 = vmatpush1.bf16.msra.mxu1 %v6828_v54  ;;  %v5056_v54 = vand.u32 4294901760, %v5012_v8 }
 0x6dc   :  { %6831 = vmatprep.subr.bf16.mxu1 %v6830_v25  ;;  %v5059_v25 = vand.u32 4294901760, %v5013_v10 }
 0x6df   :  { %6833 = vmatpush1.bf16.msra.mxu1 %v6832_v61 }
 0x6e0   :  { %6835 = vmatprep.subr.bf16.mxu1 %v13165_v46 }
 0x6e2   :  { %4840 = vmatmul.mubr.f32.vlgmr.msra.gmra.mrb[4].mxu1 %v13166_v3 }
 0x6e3   :  { %6837 = vmatpush1.bf16.msra.mxu1 %v13167_v2  ;;  %4967 = vmatprep.mubr.f32.mxu1 %v13110_v13  ;;  %v13178_v13 = vld [vmem:[#allocation92_spill] sm:$0xff]  ;;  %v11237_v2 = vsub.f32 %v5012_v8, %v5056_v54 }
 0x6e4   :  { %6839 = vmatprep.subr.bf16.mxu1 %v13168_v38  ;;  %v5068_v38 = vand.u32 4294901760, %v5016_v9 }
 0x6e5   :  { %13194 = vst [vmem:[#allocation71_spill] sm:$0xff] %v11237_v2 }
 0x6e7   :  { %6841 = vmatpush1.bf16.msra.mxu1 %v13169_v42  ;;  %v5019_v42 = vld [vmem:[%s11735_s3 + $0x70] sm:$0xff] }
 0x6e8   :  { %6843 = vmatprep.subr.bf16.mxu1 %v13170_v15  ;;  %v5020_v15 = vld [vmem:[%s11735_s3 + $0x78] sm:$0xff] }
 0x6eb   :  { %6845 = vmatpush1.bf16.msra.mxu1 %v13171_v26 }
 0x6ec   :  { %6847 = vmatprep.subr.bf16.mxu1 %v13172_v43  ;;  %v11248_v43 = vsub.f32 %v5013_v10, %v5059_v25  ;;  %v5095_v10 = vand.u32 4294901760, %v5025_v63 }
 0x6ef   :  { %6849 = vmatpush1.bf16.msra.mxu1 %v13173_v29  ;;  %v11250_v29 = vsub.f32 %v5014_v41, %v5062_v59  ;;  %v5027_v41 = vld [vmem:[%s11735_s3 + $0xb0] sm:$0x1f] }
 0x6f0   :  { %6851 = vmatprep.subr.bf16.mxu1 %v13174_v40  ;;  %v5071_v40 = vand.u32 4294901760, %v5017_v30 }
 0x6f3   :  { %6853 = vmatpush1.bf16.msra.mxu1 %v13175_v1  ;;  %v11256_v1 = vpack.c.bf16 %v5050_v7, %v5047_v49 }
 0x6f4   :  { %6855 = vmatprep.subr.bf16.mxu1 %v13176_v19  ;;  %v11258_v19 = vsub.f32 %v5015_v18, %v5065_v45 }
 0x6f7   :  { %6857 = vmatpush1.bf16.msra.mxu1 %v13177_v35  ;;  %v11260_v35 = vsub.f32 %v5016_v9, %v5068_v38 }
 0x6f8   :  { %6859 = vmatprep.subr.bf16.mxu1 %v13178_v13  ;;  %v5074_v13 = vand.u32 4294901760, %v5018_v32 }
 0x6fb   :  { %6861 = vmatpush1.bf16.msra.mxu1 %v13179_v4  ;;  %v11267_v4 = vsub.f32 %v5017_v30, %v5071_v40  ;;  %v11337_v30 = vsub.f32 %v5025_v63, %v5095_v10 }
 0x6fc   :  { %6863 = vmatprep.subr.bf16.mxu1 %v13180_v51  ;;  %v5077_v51 = vand.u32 4294901760, %v5019_v42 }
 0x6ff   :  { %6865 = vmatpush1.bf16.msra.mxu1 %v13181_v37  ;;  %v5080_v37 = vand.u32 4294901760, %v5020_v15 }
 0x700   :  { %6867 = vmatprep.subr.bf16.mxu1 %v13182_v48  ;;  %v11269_v48 = vsub.f32 %v5018_v32, %v5074_v13  ;;  %v12246_v32 = vand.u32 4294901760, %v11199_v56 }
 0x703   :  { %6869 = vmatpush1.bf16.msra.mxu1 %v13183_v58  ;;  %v11271_v58 = vsub.f32 %v5019_v42, %v5077_v51 }
 0x704   :  { %6871 = vmatprep.subr.bf16.mxu1 %v13184_v0  ;;  %v11273_v0 = vsub.f32 %v5020_v15, %v5080_v37  ;;  %v13195_v15 = vmov 0.0  }
 0x707   :  { %6873 = vmatpush1.bf16.msra.mxu1 %v13185_v16  ;;  %v11276_v16 = vpack.c.bf16 %v5056_v54, %v5053_v5 }
 0x708   :  { %6875 = vmatprep.subr.bf16.mxu1 %v13186_v52  ;;  %v11280_v52 = vpack.c.bf16 %v5062_v59, %v5059_v25 }
 0x70b   :  { %6877 = vmatpush1.bf16.msra.mxu1 %v13187_v31  ;;  %v11284_v31 = vpack.c.bf16 %v5068_v38, %v5065_v45  ;;  %v11348_v45 = vsel %vm2983_vm11, %v5027_v41, 0  ;;  %v5141_v38 = vsub.f32 %v11199_v56, %v12246_v32  ;;  %v12230_v41 = vand.u32 4294901760, %v11237_v2 }
 0x70c   :  { %6879 = vmatprep.subr.bf16.mxu1 %v13188_v23  ;;  %v11288_v23 = vpack.c.bf16 %v5074_v13, %v5071_v40 }
 0x70d   :  { %v5142_v13 = vand.u32 4294901760, %v5141_v38 }
 0x70f   :  { %6881 = vmatpush1.bf16.msra.mxu1 %v13189_v6  ;;  %v11292_v6 = vpack.c.bf16 %v5080_v37, %v5077_v51 }
 0x710   :  { %6883 = vmatprep.subr.bf16.mxu1 %v13190_v57  ;;  %v5021_v57 = vld [vmem:[%s11735_s3 + $0x80] sm:$0xff] }
 0x713   :  { %6885 = vmatpush1.bf16.msra.mxu1 %v13191_v22  ;;  %v5022_v22 = vld [vmem:[%s11735_s3 + $0x88] sm:$0xff] }
 0x714   :  { %6887 = vmatprep.subr.bf16.mxu1 %v13192_v27  ;;  %v5083_v27 = vand.u32 4294901760, %v5021_v57  ;;  %v5086_v55 = vand.u32 4294901760, %v5022_v22 }
 0x716   :  { %v11303_v14 = vpack.c.bf16 %v5086_v55, %v5083_v27  ;;  %v11305_v53 = vsub.f32 %v5021_v57, %v5083_v27  ;;  %v11307_v21 = vsub.f32 %v5022_v22, %v5086_v55 }
 0x717   :  { %6889 = vmatpush1.bf16.msra.mxu1 %v13104_v34  ;;  %v5008_v34 = vld [vmem:[%s11735_s3 + $0x18] sm:$0xff] }
 0x718   :  { %v5044_v50 = vand.u32 4294901760, %v5008_v34 }
 0x71a   :  { %4969 = vmatmul.mubr.f32.vlgmr.msra.gmra.mrb[4].mxu1 %v13166_v3  ;;  %v11214_v33 = vsub.f32 %v5008_v34, %v5044_v50  ;;  %v11222_v44 = vpack.c.bf16 %v5044_v50, %v5041_v12  ;;  %v11235_v3 = vsub.f32 %v5011_v20, %v5053_v5  ;;  %v5024_v34 = vld [vmem:[%s11735_s3 + $0x98] sm:$0xff]  ;;  %v5089_v12 = vand.u32 4294901760, %v5023_v36  ;;  %v5026_v50 = vld [vmem:[%s11735_s3 + $0xa8] sm:$0xff]  ;;  %s7247_s3 = smov [#allocation6]  }
 0x71b   :  { %v5092_v60 = vand.u32 4294901760, %v5024_v34  ;;  %v5098_v9 = vand.u32 4294901760, %v5026_v50 }
 0x71c   :  { %6895 = vmatpush1.bf16.msra.mxu0 %v11222_v44  ;;  %v11325_v20 = vsub.f32 %v5023_v36, %v5089_v12  ;;  %v12240_v40 = vand.u32 4294901760, %v11214_v33  ;;  %v12237_v36 = vand.u32 4294901760, %v11216_v24 }
 0x71d   :  { %6896 = vmatprep.subr.bf16.mxu0 %v13193_v62  ;;  %v11323_v7 = vpack.c.bf16 %v5092_v60, %v5089_v12  ;;  %v11327_v8 = vsub.f32 %v5024_v34, %v5092_v60  ;;  %v11343_v25 = vpack.c.bf16 %v5098_v9, %v5095_v10  ;;  %v11345_v59 = vsub.f32 %v5026_v50, %v5098_v9 }
 0x71e   :  { %v5162_v57 = vsub.f32 %v11214_v33, %v12240_v40  ;;  %v12236_v34 = vand.u32 4294901760, %v11224_v28  ;;  %v5169_v60 = vsub.f32 %v11216_v24, %v12237_v36  ;;  %v12233_v10 = vand.u32 4294901760, %v11235_v3 }
 0x71f   :  { %v12241_v36 = vand.u32 4294901760, %v11337_v30 }
 0x720   :  { %6898 = vmatpush1.bf16.msra.mxu0 %v11256_v1  ;;  %v5163_v55 = vand.u32 4294901760, %v5162_v57  ;;  %v5176_v63 = vsub.f32 %v11224_v28, %v12236_v34  ;;  %v5170_v50 = vand.u32 4294901760, %v5169_v60  ;;  %v5183_v9 = vsub.f32 %v11235_v3, %v12233_v10 }
 0x721   :  { %6899 = vmatprep.subr.bf16.mxu0 %v13193_v62 }
 0x722   :  { %v5184_v38 = vand.u32 4294901760, %v5183_v9 }
 0x724   :  { %6901 = vmatpush1.bf16.msra.mxu0 %v11276_v16 }
 0x725   :  { %6902 = vmatprep.subr.bf16.mxu0 %v13193_v62 }
 0x728   :  { %6904 = vmatpush1.bf16.msra.mxu0 %v11280_v52 }
 0x729   :  { %6905 = vmatprep.subr.bf16.mxu0 %v13193_v62 }
 0x72c   :  { %6907 = vmatpush1.bf16.msra.mxu0 %v11284_v31 }
 0x72d   :  { %6908 = vmatprep.subr.bf16.mxu0 %v13193_v62 }
 0x730   :  { %6910 = vmatpush1.bf16.msra.mxu0 %v11288_v23 }
 0x731   :  { %6911 = vmatprep.subr.bf16.mxu0 %v13193_v62 }
 0x734   :  { %6913 = vmatpush1.bf16.msra.mxu0 %v11292_v6 }
 0x735   :  { %6914 = vmatprep.subr.bf16.mxu0 %v13193_v62 }
 0x738   :  { %6916 = vmatpush1.bf16.msra.mxu0 %v11303_v14 }
 0x739   :  { %6917 = vmatprep.subr.bf16.mxu0 %v13193_v62 }
 0x73c   :  { %6919 = vmatpush1.bf16.msra.mxu0 %v11323_v7 }
 0x73d   :  { %6920 = vmatprep.subr.bf16.mxu0 %v13193_v62 }
 0x740   :  { %6922 = vmatpush1.bf16.msra.mxu0 %v11343_v25 }
 0x741   :  { %5100 = vmatprep.subr.mxu0 %v13195_v15 }
 0x7ed   :  { %v4970_v17 = vpop.f32.mrb[4].mxu1 }
 0x7ee   :  { %v11233_v61 = vmax.f32 %v4970_v17, 0.0  ;;  %4978 = vst [vmem:[#allocation4 + $0x10] sm:$0xff] %v4970_v17  ;;  %v4972_v46 = vpop.f32.mrb[5].mxu1 }
 0x7ef   :  { %v11245_v26 = vmax.f32 %v4972_v46, 0.0  ;;  %4979 = vst.msk [vmem:[#allocation4 + $0x18] sm:$0xff] %vm2929_vm9, %v4972_v46  ;;  %v12245_v46 = vand.u32 4294901760, %v11201_v39 }
 0x7f0   :  { %4981 = vst [vmem:[#allocation6 + $0x10] sm:$0xff] %v11233_v61  ;;  %4985 = vrot.lane.b32.xlu0 %v11233_v61, %s7246_s11 }
 0x7f1   :  { %4982 = vst.msk [vmem:[#allocation6 + $0x18] sm:$0xff] %vm2929_vm9, %v11245_v26  ;;  %4987 = vrot.lane.b32.xlu1 %v11245_v26, %s7246_s11  ;;  %v5148_v42 = vsub.f32 %v11201_v39, %v12245_v46 }
 0x7f3   :  { %v5149_v51 = vand.u32 4294901760, %v5148_v42 }
 0x7f5   :  { %v11376_v22 = vpack.c.bf16 %v5149_v51, %v5142_v13  ;;  %v12227_v13 = vand.u32 4294901760, %v11248_v43  ;;  %v12225_v51 = vand.u32 4294901760, %v11250_v29 }
 0x7f7   :  { %v5197_v57 = vsub.f32 %v11248_v43, %v12227_v13 }
 0x862   :  { %v4986_v49 = vpop.permute.xlu0 %4985 }
 0x863   :  { %v4988_v18 = vpop.permute.xlu1 %4987 }
 0x864   :  { %v4989_v5 = vsel %vm2939_vm10, %v4986_v49, %v4988_v18  ;;  %v11334_v54 = vmax.f32 %v11245_v26, %v4988_v18  ;;  %v12244_v26 = vand.u32 4294901760, %v11203_v47  ;;  %v5177_v49 = vand.u32 4294901760, %v5176_v63 }
 0x865   :  { %v11340_v17 = vmax.f32 %v11233_v61, %v4989_v5  ;;  %v11358_v61 = vand.u32 4294901760, %v11348_v45  ;;  %v5190_v5 = vsub.f32 %v11237_v2, %v12230_v41  ;;  %v12226_v63 = vand.u32 4294901760, %v11258_v19 }
 0x866   :  { %4998 = vrot.lane.b32.xlu0 %v11334_v54, %s7236_s25  ;;  %v5155_v37 = vsub.f32 %v11203_v47, %v12244_v26  ;;  %v11391_v18 = vpack.c.bf16 %v5177_v49, %v5170_v50  ;;  %v12228_v50 = vand.u32 4294901760, %v11260_v35 }
 0x867   :  { %4996 = vrot.lane.b32.xlu1 %v11340_v17, %s7236_s25  ;;  %5102 = vmatpush1.msra.mxu0 %v11358_v61  ;;  %v5191_v42 = vand.u32 4294901760, %v5190_v5  ;;  %v5211_v9 = vsub.f32 %v11258_v19, %v12226_v63  ;;  %s5798_s25 = sshll.u32 %s7247_s3, 4  ;;  %s5799_s25 = int_to_ptr.vmem [resolvable:$true] %s5798_s25 }
 0x868   :  { %6923 = vmatprep.subr.bf16.mxu0 %v13193_v62  ;;  %v5156_v27 = vand.u32 4294901760, %v5155_v37  ;;  %v5218_v5 = vsub.f32 %v11260_v35, %v12228_v50  ;;  %v12232_v50 = vand.u32 4294901760, %v11271_v58  ;;  %s7166_s0 = scalar_lea.vmem %s5799_s25, 512  ;;  %p7171_p1 = scmp.lt.s32.totalorder %s5799_s25, %s5799_s25 }
 0x869   :  { %v11401_v37 = vpack.c.bf16 %v5191_v42, %v5184_v38  ;;  %v5212_v38 = vand.u32 4294901760, %v5211_v9  ;;  %v12234_v9 = vand.u32 4294901760, %v11273_v0  ;;  %p7167_p0 = scmp.ne.s32.totalorder %s5799_s25, %s7166_s0  ;;  %p7172_p2 = scmp.lt.s32.totalorder %s7166_s0, %s7166_s0 }
 0x86a   :  { %v11381_v12 = vpack.c.bf16 %v5163_v55, %v5156_v27  ;;  %v5204_v27 = vsub.f32 %v11250_v29, %v12225_v51  ;;  %v5198_v55 = vand.u32 4294901760, %v5197_v57  ;;  %v5219_v42 = vand.u32 4294901760, %v5218_v5 }
 0x86b   :  { %v12229_v51 = vand.u32 4294901760, %v11267_v4  ;;  %v12231_v57 = vand.u32 4294901760, %v11269_v48  ;;  %p7173_p3 = por %p7172_p2, %p7171_p1 }
 0x86c   :  { %v5205_v60 = vand.u32 4294901760, %v5204_v27  ;;  %v11421_v27 = vpack.c.bf16 %v5219_v42, %v5212_v38  ;;  %v5239_v38 = vsub.f32 %v11271_v58, %v12232_v50  ;;  %v5246_v42 = vsub.f32 %v11273_v0, %v12234_v9 }
 0x86d   :  { %v12239_v9 = vand.u32 4294901760, %v11325_v20  ;;  %p7174_p4 = pnand %p7173_p3, %p7167_p0 }
 0x86e   :  { %v11411_v49 = vpack.c.bf16 %v5205_v60, %v5198_v55  ;;  %v5225_v55 = vsub.f32 %v11267_v4, %v12229_v51  ;;  %v5232_v60 = vsub.f32 %v11269_v48, %v12231_v57  ;;  %v5240_v51 = vand.u32 4294901760, %v5239_v38 }
 0x86f   :  { %v5247_v41 = vand.u32 4294901760, %v5246_v42  ;;  %v12235_v57 = vand.u32 4294901760, %v11305_v53  ;;  %v12243_v38 = vand.u32 4294901760, %v11327_v8 }
 0x870   :  { %v5226_v63 = vand.u32 4294901760, %v5225_v55  ;;  %v5233_v13 = vand.u32 4294901760, %v5232_v60  ;;  %v12238_v55 = vand.u32 4294901760, %v11307_v21 }
 0x871   :  { %v11441_v60 = vpack.c.bf16 %v5247_v41, %v5240_v51  ;;  %v5267_v41 = vsub.f32 %v11325_v20, %v12239_v9  ;;  %v5274_v51 = vsub.f32 %v11327_v8, %v12243_v38 }
 0x872   :  { %v11431_v5 = vpack.c.bf16 %v5233_v13, %v5226_v63  ;;  %v5253_v13 = vsub.f32 %v11305_v53, %v12235_v57  ;;  %v5260_v63 = vsub.f32 %v11307_v21, %v12238_v55  ;;  %v5281_v55 = vsub.f32 %v11337_v30, %v12241_v36 }
 0x873   :  { %v5268_v57 = vand.u32 4294901760, %v5267_v41  ;;  %v5275_v34 = vand.u32 4294901760, %v5274_v51  ;;  %v6957_v41 = vpack.c.bf16 %v11201_v39, %v11199_v56  ;;  %v6960_v51 = vpack.c.bf16 %v11214_v33, %v11203_v47 }
 0x874   :  { %v5254_v50 = vand.u32 4294901760, %v5253_v13  ;;  %v5261_v10 = vand.u32 4294901760, %v5260_v63  ;;  %v12242_v13 = vand.u32 4294901760, %v11345_v59 }
 0x875   :  { %v6951_v63 = vpack.c.bf16 %v5275_v34, %v5268_v57  ;;  %v6963_v34 = vpack.c.bf16 %v11224_v28, %v11216_v24  ;;  %v6966_v57 = vpack.c.bf16 %v11237_v2, %v11235_v3 }
 0x876   :  { %v6948_v42 = vpack.c.bf16 %v5261_v10, %v5254_v50  ;;  %v5288_v10 = vsub.f32 %v11345_v59, %v12242_v13  ;;  %v5282_v50 = vand.u32 4294901760, %v5281_v55 }
 0x878   :  { %v5289_v9 = vand.u32 4294901760, %v5288_v10 }
 0x87a   :  { %v6954_v40 = vpack.c.bf16 %v5289_v9, %v5282_v50 }
 0x8d8   :  { %v4999_v26 = vpop.permute.xlu0 %4998 }
 0x8d9   :  { %v5004_v46 = vmax.f32 %v11334_v54, %v4999_v26  ;;  %v4997_v32 = vpop.permute.xlu1 %4996 }
 0x8da   :  { %v5000_v55 = vsel %vm50_vm0, %v4997_v32, %v4999_v26 }
 0x8db   :  { %v5029_v9 = vsel %vm2979_vm12, %v5004_v46, 0  ;;  %v5003_v36 = vmax.f32 %v11340_v17, %v5000_v55  ;;  %v13210_v55 = vld [vmem:[#allocation71_spill] sm:$0xff] }
 0x8dc   :  { %v11491_v10 = vand.u32 4294901760, %v5029_v9 }
 0x8dd   :  { %v11493_v2 = vand.u32 4294901760, %v5003_v36 }
 0x8de   :  { %v11496_v50 = vsub.f32 %v5029_v9, %v11491_v10  ;;  %v13211_v9 = vand.u32 4294901760, %v13210_v55 }
 0x8df   :  { %v11499_v13 = vsub.f32 %v5003_v36, %v11493_v2 }
 0x8e0   :  { %v5123_v38 = vand.u32 4294901760, %v11496_v50 }
 0x8e1   :  { %v5129_v54 = vand.u32 4294901760, %v11499_v13 }
 0x8e2   :  { %v5124_v32 = vsub.f32 %v11496_v50, %v5123_v38 }
 0x8e3   :  { %v5130_v17 = vsub.f32 %v11499_v13, %v5129_v54 }
 0x8e4   :  { %v5125_v46 = vand.u32 4294901760, %v5124_v32 }
 0x8e5   :  { %v5131_v26 = vand.u32 4294901760, %v5130_v17  ;;  %v13217_v17 = vand.u32 4294901760, %v11269_v48 }
 0x8e6   :  { %5126 = vmatprep.mubr.f32.mxu0 %v5125_v46 }
 0x8e7   :  { %5132 = vmatmul.mubr.f32.vlgmr.msra.gmra.mrb[4].mxu0 %v5131_v26 }
 0x8e8   :  { %6925 = vmatpush1.bf16.msra.mxu0 %v11376_v22  ;;  %5317 = vmatprep.mubr.f32.mxu0 %v11491_v10  ;;  %v11526_v22 = vsub.f32 %v11348_v45, %v11358_v61  ;;  %v13196_v45 = vpack.c.bf16 %v11250_v29, %v11248_v43 }
 0x8e9   :  { %6926 = vmatprep.subr.bf16.mxu0 %v13193_v62 }
 0x8ea   :  { %v5294_v36 = vand.u32 4294901760, %v11526_v22 }
 0x8ec   :  { %6928 = vmatpush1.bf16.msra.mxu0 %v11381_v12  ;;  %v5295_v12 = vsub.f32 %v11526_v22, %v5294_v36 }
 0x8ed   :  { %6929 = vmatprep.subr.bf16.mxu0 %v13193_v62 }
 0x8f0   :  { %6931 = vmatpush1.bf16.msra.mxu0 %v11391_v18  ;;  %v5296_v18 = vand.u32 4294901760, %v5295_v12 }
 0x8f1   :  { %6932 = vmatprep.subr.bf16.mxu0 %v13193_v62 }
 0x8f4   :  { %6934 = vmatpush1.bf16.msra.mxu0 %v11401_v37  ;;  %v13198_v37 = vpack.c.bf16 %v11269_v48, %v11267_v4  ;;  %v13223_v48 = vand.u32 4294901760, %v11327_v8 }
 0x8f5   :  { %6935 = vmatprep.subr.bf16.mxu0 %v13193_v62 }
 0x8f8   :  { %6937 = vmatpush1.bf16.msra.mxu0 %v11411_v49  ;;  %v13199_v49 = vpack.c.bf16 %v11273_v0, %v11271_v58 }
 0x8f9   :  { %6938 = vmatprep.subr.bf16.mxu0 %v13193_v62 }
 0x8fc   :  { %6940 = vmatpush1.bf16.msra.mxu0 %v11421_v27  ;;  %v13200_v27 = vpack.c.bf16 %v11307_v21, %v11305_v53 }
 0x8fd   :  { %6941 = vmatprep.subr.bf16.mxu0 %v13193_v62 }
 0x900   :  { %6943 = vmatpush1.bf16.msra.mxu0 %v11431_v5  ;;  %v13201_v5 = vpack.c.bf16 %v11327_v8, %v11325_v20 }
 0x901   :  { %6944 = vmatprep.subr.bf16.mxu0 %v13193_v62 }
 0x904   :  { %6946 = vmatpush1.bf16.msra.mxu0 %v11441_v60  ;;  %v13202_v60 = vpack.c.bf16 %v11345_v59, %v11337_v30 }
 0x905   :  { %6947 = vmatprep.subr.bf16.mxu0 %v13193_v62 }
 0x908   :  { %6949 = vmatpush1.bf16.msra.mxu0 %v6948_v42  ;;  %v13204_v42 = vand.u32 4294901760, %v11201_v39  ;;  %v13208_v39 = vand.u32 4294901760, %v11224_v28  ;;  %v13215_v28 = vand.u32 4294901760, %v11260_v35 }
 0x909   :  { %6950 = vmatprep.subr.bf16.mxu0 %v13193_v62 }
 0x90c   :  { %6952 = vmatpush1.bf16.msra.mxu0 %v6951_v63 }
 0x90d   :  { %6953 = vmatprep.subr.bf16.mxu0 %v13193_v62 }
 0x910   :  { %6955 = vmatpush1.bf16.msra.mxu0 %v6954_v40  ;;  %v13197_v40 = vpack.c.bf16 %v11260_v35, %v11258_v19  ;;  %v13221_v35 = vand.u32 4294901760, %v11307_v21 }
 0x911   :  { %5291 = vmatprep.subr.mxu0 %v13195_v15 }
 0x914   :  { %5297 = vmatpush1.msra.mxu0 %v5296_v18 }
 0x915   :  { %5319 = vmatmul.mubr.f32.vlgmr.msra.gmra.mrb[4].mxu0 %v11493_v2  ;;  %6956 = vmatprep.subr.bf16.mxu0 %v13193_v62 }
 0x916   :  { %6958 = vmatpush1.bf16.msra.mxu0 %v6957_v41  ;;  %5436 = vmatprep.mubr.f32.mxu0 %v11496_v50  ;;  %v13205_v41 = vand.u32 4294901760, %v11203_v47  ;;  %v13212_v47 = vand.u32 4294901760, %v11248_v43  ;;  %v13218_v43 = vand.u32 4294901760, %v11271_v58  ;;  %v13224_v58 = vand.u32 4294901760, %v11337_v30 }
 0x917   :  { %6959 = vmatprep.subr.bf16.mxu0 %v13193_v62 }
 0x91a   :  { %6961 = vmatpush1.bf16.msra.mxu0 %v6960_v51  ;;  %v13206_v51 = vand.u32 4294901760, %v11214_v33  ;;  %v13213_v33 = vand.u32 4294901760, %v11250_v29  ;;  %v13219_v29 = vand.u32 4294901760, %v11273_v0  ;;  %v13225_v0 = vand.u32 4294901760, %v11345_v59 }
 0x91b   :  { %6962 = vmatprep.subr.bf16.mxu0 %v13193_v62 }
 0x91c   :  { %v7044_v26 = vpack.c.bf16 %v13219_v29, %v13218_v43 }
 0x91e   :  { %6964 = vmatpush1.bf16.msra.mxu0 %v6963_v34  ;;  %v7026_v34 = vpack.c.bf16 %v13206_v51, %v13205_v41 }
 0x91f   :  { %6965 = vmatprep.subr.bf16.mxu0 %v13193_v62 }
 0x922   :  { %6967 = vmatpush1.bf16.msra.mxu0 %v6966_v57 }
 0x923   :  { %6968 = vmatprep.subr.bf16.mxu0 %v13193_v62 }
 0x926   :  { %6970 = vmatpush1.bf16.msra.mxu0 %v13196_v45  ;;  %v7053_v45 = vpack.c.bf16 %v13225_v0, %v13224_v58 }
 0x927   :  { %6971 = vmatprep.subr.bf16.mxu0 %v13193_v62 }
 0x92a   :  { %6973 = vmatpush1.bf16.msra.mxu0 %v13197_v40 }
 0x92b   :  { %6974 = vmatprep.subr.bf16.mxu0 %v13193_v62 }
 0x92e   :  { %6976 = vmatpush1.bf16.msra.mxu0 %v13198_v37 }
 0x92f   :  { %6977 = vmatprep.subr.bf16.mxu0 %v13193_v62 }
 0x932   :  { %6979 = vmatpush1.bf16.msra.mxu0 %v13199_v49 }
 0x933   :  { %6980 = vmatprep.subr.bf16.mxu0 %v13193_v62 }
 0x936   :  { %6982 = vmatpush1.bf16.msra.mxu0 %v13200_v27 }
 0x937   :  { %6983 = vmatprep.subr.bf16.mxu0 %v13193_v62 }
 0x93a   :  { %6985 = vmatpush1.bf16.msra.mxu0 %v13201_v5 }
 0x93b   :  { %6986 = vmatprep.subr.bf16.mxu0 %v13193_v62 }
 0x93e   :  { %6988 = vmatpush1.bf16.msra.mxu0 %v13202_v60 }
 0x93f   :  { %5412 = vmatprep.subr.mxu0 %v13195_v15 }
 0x942   :  { %5415 = vmatpush1.msra.mxu0 %v11526_v22 }
 0x943   :  { %5439 = vmatmul.mubr.f32.vlgmr.msra.gmra.mrb[4].mxu0 %v11499_v13  ;;  %6989 = vmatprep.subr.bf16.mxu0 %v13193_v62  ;;  %v13209_v13 = vand.u32 4294901760, %v11235_v3  ;;  %v13216_v3 = vand.u32 4294901760, %v11267_v4  ;;  %v13222_v4 = vand.u32 4294901760, %v11325_v20 }
 0x944   :  { %6991 = vmatpush1.bf16.msra.mxu0 %v11197_v11  ;;  %5534 = vmatprep.mubr.f32.mxu0 %v5123_v38  ;;  %v13203_v38 = vand.u32 4294901760, %v11199_v56  ;;  %v13207_v56 = vand.u32 4294901760, %v11216_v24  ;;  %v13214_v24 = vand.u32 4294901760, %v11258_v19  ;;  %v13220_v19 = vand.u32 4294901760, %v11305_v53 }
 0x945   :  { %6992 = vmatprep.subr.bf16.mxu0 %v13193_v62  ;;  %v7032_v50 = vpack.c.bf16 %v13211_v9, %v13209_v13  ;;  %v7041_v46 = vpack.c.bf16 %v13217_v17, %v13216_v3  ;;  %v7050_v18 = vpack.c.bf16 %v13223_v48, %v13222_v4 }
 0x946   :  { %v7023_v63 = vpack.c.bf16 %v13204_v42, %v13203_v38  ;;  %v7029_v57 = vpack.c.bf16 %v13208_v39, %v13207_v56  ;;  %v7038_v32 = vpack.c.bf16 %v13215_v28, %v13214_v24  ;;  %v7047_v12 = vpack.c.bf16 %v13221_v35, %v13220_v19 }
 0x948   :  { %6994 = vmatpush1.bf16.msra.mxu0 %v11222_v44 }
 0x949   :  { %6995 = vmatprep.subr.bf16.mxu0 %v13193_v62 }
 0x94c   :  { %6997 = vmatpush1.bf16.msra.mxu0 %v11256_v1 }
 0x94d   :  { %6998 = vmatprep.subr.bf16.mxu0 %v13193_v62 }
 0x950   :  { %7000 = vmatpush1.bf16.msra.mxu0 %v11276_v16 }
 0x951   :  { %7001 = vmatprep.subr.bf16.mxu0 %v13193_v62 }
 0x954   :  { %7003 = vmatpush1.bf16.msra.mxu0 %v11280_v52 }
 0x955   :  { %7004 = vmatprep.subr.bf16.mxu0 %v13193_v62 }
 0x958   :  { %7006 = vmatpush1.bf16.msra.mxu0 %v11284_v31 }
 0x959   :  { %7007 = vmatprep.subr.bf16.mxu0 %v13193_v62 }
 0x95c   :  { %7009 = vmatpush1.bf16.msra.mxu0 %v11288_v23 }
 0x95d   :  { %7010 = vmatprep.subr.bf16.mxu0 %v13193_v62 }
 0x960   :  { %7012 = vmatpush1.bf16.msra.mxu0 %v11292_v6 }
 0x961   :  { %7013 = vmatprep.subr.bf16.mxu0 %v13193_v62 }
 0x964   :  { %7015 = vmatpush1.bf16.msra.mxu0 %v11303_v14 }
 0x965   :  { %7016 = vmatprep.subr.bf16.mxu0 %v13193_v62 }
 0x968   :  { %7018 = vmatpush1.bf16.msra.mxu0 %v11323_v7 }
 0x969   :  { %7019 = vmatprep.subr.bf16.mxu0 %v13193_v62 }
 0x96c   :  { %7021 = vmatpush1.bf16.msra.mxu0 %v11343_v25 }
 0x96d   :  { %5510 = vmatprep.subr.mxu0 %v13195_v15 }
 0x970   :  { %5512 = vmatpush1.msra.mxu0 %v11358_v61 }
 0x971   :  { %5538 = vmatmul.mubr.f32.vlgmr.msra.gmra.mrb[4].mxu0 %v5129_v54  ;;  %7022 = vmatprep.subr.bf16.mxu0 %v13193_v62  ;;  %v7035_v54 = vpack.c.bf16 %v13213_v33, %v13212_v47 }
 0x972   :  { %7024 = vmatpush1.bf16.msra.mxu0 %v7023_v63  ;;  %5677 = vmatprep.mubr.f32.mxu0 %v11491_v10 }
 0x973   :  { %7025 = vmatprep.subr.bf16.mxu0 %v13193_v62 }
 0x976   :  { %7027 = vmatpush1.bf16.msra.mxu0 %v7026_v34 }
 0x977   :  { %7028 = vmatprep.subr.bf16.mxu0 %v13193_v62 }
 0x97a   :  { %7030 = vmatpush1.bf16.msra.mxu0 %v7029_v57 }
 0x97b   :  { %7031 = vmatprep.subr.bf16.mxu0 %v13193_v62 }
 0x97e   :  { %7033 = vmatpush1.bf16.msra.mxu0 %v7032_v50 }
 0x97f   :  { %7034 = vmatprep.subr.bf16.mxu0 %v13193_v62 }
 0x982   :  { %7036 = vmatpush1.bf16.msra.mxu0 %v7035_v54 }
 0x983   :  { %7037 = vmatprep.subr.bf16.mxu0 %v13193_v62 }
 0x986   :  { %7039 = vmatpush1.bf16.msra.mxu0 %v7038_v32 }
 0x987   :  { %7040 = vmatprep.subr.bf16.mxu0 %v13193_v62 }
 0x98a   :  { %7042 = vmatpush1.bf16.msra.mxu0 %v7041_v46 }
 0x98b   :  { %7043 = vmatprep.subr.bf16.mxu0 %v13193_v62 }
 0x98e   :  { %7045 = vmatpush1.bf16.msra.mxu0 %v7044_v26 }
 0x98f   :  { %7046 = vmatprep.subr.bf16.mxu0 %v13193_v62 }
 0x992   :  { %7048 = vmatpush1.bf16.msra.mxu0 %v7047_v12 }
 0x993   :  { %7049 = vmatprep.subr.bf16.mxu0 %v13193_v62 }
 0x996   :  { %7051 = vmatpush1.bf16.msra.mxu0 %v7050_v18 }
 0x997   :  { %7052 = vmatprep.subr.bf16.mxu0 %v13193_v62 }
 0x99a   :  { %7054 = vmatpush1.bf16.msra.mxu0 %v7053_v45 }
 0x99b   :  { %5653 = vmatprep.subr.mxu0 %v13195_v15 }
 0x99e   :  { %5657 = vmatpush1.msra.mxu0 %v5294_v36 }
 0x99f   :  { %5679 = vmatmul.mubr.f32.vlgmr.msra.gmra.mrb[4].mxu0 %v11493_v2  ;;  %7055 = vmatprep.subr.bf16.mxu0 %v13193_v62 }
 0x9a0   :  { %7057 = vmatpush1.bf16.msra.mxu0 %v11197_v11  ;;  %5772 = vmatprep.mubr.f32.mxu0 %v11491_v10 }
 0x9a1   :  { %7058 = vmatprep.subr.bf16.mxu0 %v13193_v62 }
 0x9a4   :  { %7060 = vmatpush1.bf16.msra.mxu0 %v11222_v44 }
 0x9a5   :  { %7061 = vmatprep.subr.bf16.mxu0 %v13193_v62 }
 0x9a8   :  { %7063 = vmatpush1.bf16.msra.mxu0 %v11256_v1 }
 0x9a9   :  { %7064 = vmatprep.subr.bf16.mxu0 %v13193_v62 }
 0x9ac   :  { %7066 = vmatpush1.bf16.msra.mxu0 %v11276_v16 }
 0x9ad   :  { %7067 = vmatprep.subr.bf16.mxu0 %v13193_v62 }
 0x9b0   :  { %7069 = vmatpush1.bf16.msra.mxu0 %v11280_v52 }
 0x9b1   :  { %7070 = vmatprep.subr.bf16.mxu0 %v13193_v62 }
 0x9b4   :  { %7072 = vmatpush1.bf16.msra.mxu0 %v11284_v31 }
 0x9b5   :  { %7073 = vmatprep.subr.bf16.mxu0 %v13193_v62 }
 0x9b8   :  { %7075 = vmatpush1.bf16.msra.mxu0 %v11288_v23 }
 0x9b9   :  { %7076 = vmatprep.subr.bf16.mxu0 %v13193_v62 }
 0x9bc   :  { %7078 = vmatpush1.bf16.msra.mxu0 %v11292_v6 }
 0x9bd   :  { %7079 = vmatprep.subr.bf16.mxu0 %v13193_v62 }
 0x9c0   :  { %7081 = vmatpush1.bf16.msra.mxu0 %v11303_v14 }
 0x9c1   :  { %7082 = vmatprep.subr.bf16.mxu0 %v13193_v62 }
 0x9c4   :  { %7084 = vmatpush1.bf16.msra.mxu0 %v11323_v7 }
 0x9c5   :  { %7085 = vmatprep.subr.bf16.mxu0 %v13193_v62 }
 0x9c8   :  { %7087 = vmatpush1.bf16.msra.mxu0 %v11343_v25 }
 0x9c9   :  { %5750 = vmatprep.subr.mxu0 %v13195_v15 }
 0x9cc   :  { %5752 = vmatpush1.msra.mxu0 %v11358_v61 }
 0x9cd   :  { %5774 = vmatmul.mubr.f32.vlgmr.msra.gmra.mrb[4].mxu0 %v11493_v2 }
 0x9ce   :  { %7177 = shalt.err (!%p7174_p4)
}
 0x9cf   :  { %s7178_s2 = scalar_lea.hbm %s11737_s5, 512 }
 0x9d0   :  { %p7179_p5 = scmp.ne.s32.totalorder %s11737_s5, %s7178_s2  ;;  %p7182_p6 = scmp.lt.u32.totalorder %s7178_s2, %s11737_s5 }
 0x9d2   :  { %p7184_p7 = pnand %p7182_p6, %p7179_p5 }
 0x9d4   :  { %7187 = shalt.err (!%p7184_p7)
}
 0x9d5   :  { %s7249_s20 = smov 256   ;;  %s7250_s21 = smov 16  }
 0x9d6   :  { %5804 = dma.vmem_to_hbm [thread:$0]  %s5799_s25, 512, %s11737_s5, [#allocation7], %s7249_s20, %s7249_s20, %s7250_s21  }
 0x9d7   :  { %s7188_s23 = scalar_lea.vmem %s11688_s14, 512  ;;  %p7193_p9 = scmp.lt.s32.totalorder %s11688_s14, %s11688_s14 }
 0x9d8   :  { %p7189_p8 = scmp.ne.s32.totalorder %s11688_s14, %s7188_s23  ;;  %p7194_p10 = scmp.lt.s32.totalorder %s7188_s23, %s7188_s23 }
 0x9da   :  { %p7195_p11 = por %p7194_p10, %p7193_p9 }
 0x9dc   :  { %p7196_p12 = pnand %p7195_p11, %p7189_p8 }
 0x9de   :  { %7199 = shalt.err (!%p7196_p12)
}
 0x9df   :  { %s7200_s27 = scalar_lea.hbm %s11736_s4, 512 }
 0x9e0   :  { %p7201_p13 = scmp.ne.s32.totalorder %s11736_s4, %s7200_s27  ;;  %p7204_p0 = scmp.lt.u32.totalorder %s7200_s27, %s11736_s4 }
 0x9e2   :  { %p7206_p1 = pnand %p7204_p0, %p7201_p13 }
 0x9e4   :  { %7209 = shalt.err (!%p7206_p1)
}
 0x9e5   :  { %5792 = dma.vmem_to_hbm [thread:$0]  %s11688_s14, 512, %s11736_s4, [#allocation5], %s7249_s20, %s7249_s20, %s7250_s21  }
 0x9e6   :  { %s7251_s9 = smov [#allocation8]  }
 0x9e7   :  { %s5810_s10 = sshll.u32 %s7251_s9, 4  ;;  %s5811_s10 = int_to_ptr.vmem [resolvable:$true] %s5810_s10 }
 0x9e8   :  { %s7210_s12 = scalar_lea.vmem %s5811_s10, 256  ;;  %p7215_p3 = scmp.lt.s32.totalorder %s5811_s10, %s5811_s10 }
 0x9e9   :  { %p7211_p2 = scmp.ne.s32.totalorder %s5811_s10, %s7210_s12  ;;  %p7216_p4 = scmp.lt.s32.totalorder %s7210_s12, %s7210_s12 }
 0x9eb   :  { %p7217_p5 = por %p7216_p4, %p7215_p3 }
 0x9ed   :  { %p7218_p6 = pnand %p7217_p5, %p7211_p2 }
 0xaa0   :  { %v5775_v11 = vpop.f32.mrb[4].mxu0 }
 0xaa1   :  { %5780 = vst.msk [vmem:[#allocation8 + $0x8] sm:$0xff] %vm3732_vm13, %v5775_v11  ;;  %v5777_v44 = vpop.f32.mrb[5].mxu0 }
 0xaa2   :  { %7221 = shalt.err (!%p7218_p6)
}
 0xaa3   :  { %s7222_s13 = scalar_lea.hbm %s11738_s6, 256 }
 0xaa4   :  { %p7223_p7 = scmp.ne.s32.totalorder %s11738_s6, %s7222_s13  ;;  %p7226_p8 = scmp.lt.u32.totalorder %s7222_s13, %s11738_s6 }
 0xaa6   :  { %p7228_p9 = pnand %p7226_p8, %p7223_p7 }
 0xaa8   :  { %7231 = shalt.err (!%p7228_p9)
}
 0xaa9   :  { %s7252_s1 = smov 128   ;;  %s7253_s2 = smov 8  }
 0xaaa   :  { %5816 = dma.vmem_to_hbm [thread:$0]  %s5811_s10, 256, %s11738_s6, [#allocation7], %s7252_s1, %s7252_s1, %s7253_s2  }
 0xaab   :  { %7232 = dma.done.wait [#allocation5], 512  }
 0xaac   :  { %7233 = vsyncadd [#allocation5], 4294966784 }
 0xaad   :  { %7234 = dma.done.wait [#allocation7], 768  }
 0xaae   :  { %7235 = vsyncadd [#allocation7], 4294966528 }
 0xaaf   :  { %5826 = vsyncpa [#allocation5], 1 }
 0xab0   :  { %5827 = vsyncpa [#allocation7], 1 }

</bundles_post_ra>
